<compile_context>
chip_gen: v7x
topology: tpu7x:2x2x1
jax: 0.10.0
libtpu: 0.0.40
codegen_flags: <defaults>
</compile_context>

<pallas_src>
import math
from functools import partial

import jax
import jax.numpy as jnp
from jax.experimental import pallas as pl
from jax.experimental.pallas import tpu as pltpu

# ----------------------------- config ---------------------------------------
B = 2            # batch
L = 16           # sequence length
D = 32           # d_model
H = 4            # attention heads
HD = D // H      # head dim
DFF = 64         # d_ff (pointwise-conv hidden width)
MOVING_AVG = 5   # series-decomposition window
PAD = (MOVING_AVG - 1) // 2
N_LAYERS = 2
EPS = 1e-5


# ---------------------------- fused encoder kernel ---------------------------
def fused_encoder_kernel(x_ref, wqkv_ref, wo_ref, w1_ref, w2_ref, b_ref, gb_ref,
                         out_ref, attn_ref, *, bb):
    """One grid step processes `bb` batch elements; x stays resident in
    VMEM/vregs across both encoder layers and the final LayerNorm."""
    m = bb * L                                    # rows processed per grid step

    # (bb, L, D) -> (bb*L, D): pure major-dim relabel, no data movement.
    x = x_ref[...].reshape(m, D).astype(jnp.float32)

    # Moving-average operator, block-diagonal over the bb batch elements, built
    # from iota so it needs no HBM input:
    #   ma[r, c] = (1/k) * #{t in [0,k) : clip(r - pad + t, blk_lo, blk_hi) == c}
    # == replicate padding + AvgPool1d(k, stride=1), as in Autoformer series_decomp.
    rows = jax.lax.broadcasted_iota(jnp.int32, (m, m), 0)
    cols = jax.lax.broadcasted_iota(jnp.int32, (m, m), 1)
    lo = jax.lax.broadcasted_iota(jnp.int32, (bb, L, m), 0).reshape(m, m) * L
    hi = lo + (L - 1)
    ma = jnp.zeros((m, m), jnp.float32)
    for t in range(MOVING_AVG):
        tgt = jnp.clip(rows - PAD + t, lo, hi)
        ma = ma + jnp.where(tgt == cols, 1.0 / MOVING_AVG, 0.0)
    ma = ma.astype(jnp.bfloat16)                  # bf16 MXU operand (single pass)

    for layer in range(N_LAYERS):                 # static unroll over the layers
        xb = x.astype(jnp.bfloat16)

        # --- fused QKV projection (1/sqrt(HD) already folded into Q weights) ---
        qkv = (jnp.dot(xb, wqkv_ref[layer], preferred_element_type=jnp.float32)
               + b_ref[layer, 0:1, 0:3 * D])                         # (m, 3D) f32

        # --- head split: static slices + one stack per tensor (batch-major) ---
        qh = jnp.stack([qkv[b * L:(b + 1) * L, h * HD:(h + 1) * HD]
                        for b in range(bb) for h in range(H)], axis=0)
        kh = jnp.stack([qkv[b * L:(b + 1) * L, D + h * HD:D + (h + 1) * HD]
                        for b in range(bb) for h in range(H)], axis=0)
        vh = jnp.stack([qkv[b * L:(b + 1) * L, 2 * D + h * HD:2 * D + (h + 1) * HD]
                        for b in range(bb) for h in range(H)], axis=0)  # (bb*H, L, HD)

        # --- attention scores for all (batch, head) pairs: one batched dot ---
        s = jax.lax.dot_general(
            qh.astype(jnp.bfloat16), kh.astype(jnp.bfloat16),
            dimension_numbers=(((2,), (2,)), ((0,), (0,))),
            preferred_element_type=jnp.float32)                      # (bb*H, L, L)

        # softmax (f32 elementwise; EUP approx reciprocal for the denominator)
        s = s - jnp.max(s, axis=-1, keepdims=True)
        e = jnp.exp(s)
        p = e * pl.reciprocal(jnp.sum(e, axis=-1, keepdims=True), approx=True)

        # store this layer's attention map (leading-dim split of p is free)
        attn_ref[:, layer] = p.reshape(bb, H, L, L).astype(attn_ref.dtype)

        # --- context + output projection ---
        ctx = jax.lax.dot_general(
            p.astype(jnp.bfloat16), vh.astype(jnp.bfloat16),
            dimension_numbers=(((2,), (1,)), ((0,), (0,))),
            preferred_element_type=jnp.float32)                      # (bb*H, L, HD)
        ctx2d = jnp.stack(
            [jnp.concatenate([ctx[b * H + h] for h in range(H)], axis=-1)
             for b in range(bb)], axis=0).reshape(m, D)              # (m, D)
        attn_out = (jnp.dot(ctx2d.astype(jnp.bfloat16), wo_ref[layer],
                            preferred_element_type=jnp.float32)
                    + b_ref[layer, 0:1, 3 * D:4 * D])

        # --- residual + series decomposition 1 (x - moving_mean) ---
        x1 = x + attn_out                              # dropout = identity (eval)
        x1 = x1 - jnp.dot(ma, x1.astype(jnp.bfloat16),
                          preferred_element_type=jnp.float32)

        # --- FFN: Conv1d(D->DFF, 1) + ReLU + Conv1d(DFF->D, 1), per position ---
        y = (jnp.dot(x1.astype(jnp.bfloat16), w1_ref[layer],
                     preferred_element_type=jnp.float32)
             + b_ref[layer, 1:2, 0:DFF])
        y = jnp.maximum(y, 0.0)
        y = (jnp.dot(y.astype(jnp.bfloat16), w2_ref[layer],
                     preferred_element_type=jnp.float32)
             + b_ref[layer, 1:2, DFF:DFF + D])

        # --- residual + series decomposition 2 ---
        z = x1 + y
        x = z - jnp.dot(ma, z.astype(jnp.bfloat16),
                        preferred_element_type=jnp.float32)

    # --- final LayerNorm (f32) ---
    mu = jnp.mean(x, axis=-1, keepdims=True)
    xc = x - mu
    var = jnp.mean(xc * xc, axis=-1, keepdims=True)
    xn = xc * jax.lax.rsqrt(var + EPS)
    out = xn * gb_ref[0:1, :] + gb_ref[1:2, :]
    out_ref[...] = out.reshape(bb, L, D).astype(out_ref.dtype)


# ------------------------------- wrapper -------------------------------------
def _batch_per_step():
    """v7x has 2 TensorCores/chip -> keep one batch element per grid step so
    ("parallel",) spreads B across both cores; single-TC v5e/v6e (and anything
    else) fold the whole batch into one grid step — a grid there is just a
    serial loop costing ~0.35us/step of pure overhead at this problem size."""
    try:
        kind = jax.devices()[0].device_kind.lower()
    except Exception:
        return B
    if "tpu" in kind and "7" in kind:
        return 1
    return B


def enhanced_encoder(x, params, gamma_beta):
    """Mirrors EnhancedEncoder.forward (conv_layers=None) in one pallas_call.

    x: (B, L, D) f32.  Returns (x_out (B, L, D), attns (B, N_LAYERS, H, L, L));
    the per-layer attention i is attns[:, i] (returned stacked to avoid extra
    HBM copies after the kernel)."""
    wqkv, wo, w1, w2, b_pack = params
    bb = _batch_per_step()
    grid = (B // bb,)

    def full(a):
        return pl.BlockSpec(a.shape, lambda i, _nd=a.ndim: (0,) * _nd)

    in_specs = [pl.BlockSpec((bb, L, D), lambda i: (i, 0, 0)),
                full(wqkv), full(wo), full(w1), full(w2),
                full(b_pack), full(gamma_beta)]
    out_specs = (
        pl.BlockSpec((bb, L, D), lambda i: (i, 0, 0)),
        pl.BlockSpec((bb, N_LAYERS, H, L, L), lambda i: (i, 0, 0, 0, 0)),
    )
    out_shape = (
        jax.ShapeDtypeStruct((B, L, D), jnp.float32),
        jax.ShapeDtypeStruct((B, N_LAYERS, H, L, L), jnp.float32),
    )
    x_out, attns = pl.pallas_call(
        partial(fused_encoder_kernel, bb=bb),
        grid=grid,
        in_specs=in_specs,
        out_specs=out_specs,
        out_shape=out_shape,
        compiler_params=pltpu.CompilerParams(dimension_semantics=("parallel",)),
    )(x, wqkv, wo, w1, w2, b_pack, gamma_beta)
    return x_out, attns


# --------------------------- parameter init ----------------------------------
def init_params(key):
    """Packed per-layer parameters (weights bf16 for the MXU, biases f32).

    PyTorch-trained weights map in as: Linear / Conv1d(kernel_size=1) weight
    (out, in[, 1]) -> transpose to (in, out) before packing; the 1/sqrt(HD)
    attention scale is folded into the Q projection so the kernel never
    multiplies by it."""
    scale = 1.0 / math.sqrt(HD)
    keys = iter(jax.random.split(key, N_LAYERS * 12))

    def lin(fan_in, fan_out):
        bound = 1.0 / math.sqrt(fan_in)
        w = jax.random.uniform(next(keys), (fan_in, fan_out), jnp.float32, -bound, bound)
        b = jax.random.uniform(next(keys), (fan_out,), jnp.float32, -bound, bound)
        return w, b

    wqkv_l, wo_l, w1_l, w2_l, b_l = [], [], [], [], []
    for _ in range(N_LAYERS):
        wq, bq = lin(D, D)
        wk, bk = lin(D, D)
        wv, bv = lin(D, D)
        wo, bo = lin(D, D)
        w1, b1 = lin(D, DFF)        # Conv1d(D, DFF, 1) as a per-position matmul
        w2, b2 = lin(DFF, D)        # Conv1d(DFF, D, 1) as a per-position matmul
        wq, bq = wq * scale, bq * scale            # fold attention scale into Q
        wqkv_l.append(jnp.concatenate([wq, wk, wv], axis=1))            # (D, 3D)
        wo_l.append(wo)
        w1_l.append(w1)
        w2_l.append(w2)
        b_l.append(jnp.stack([
            jnp.concatenate([bq, bk, bv, bo]),                          # 128 lanes
            jnp.concatenate([b1, b2, jnp.zeros((D,), jnp.float32)]),    # 128 lanes
        ]))                                                             # (2, 128)

    bf16 = lambda xs: jnp.stack(xs).astype(jnp.bfloat16)
    return (bf16(wqkv_l), bf16(wo_l), bf16(w1_l), bf16(w2_l), jnp.stack(b_l))


if __name__ == "__main__":
    key = jax.random.PRNGKey(0)
    kx, kp = jax.random.split(key)
    x = jax.random.normal(kx, (B, L, D), jnp.float32)
    params = init_params(kp)
    gamma_beta = jnp.stack([jnp.ones((D,), jnp.float32),      # LayerNorm gamma
                            jnp.zeros((D,), jnp.float32)])    # LayerNorm beta

    x_out, attns = enhanced_encoder(x, params, gamma_beta)
    x_out = jax.block_until_ready(x_out)
    attns = jax.block_until_ready(attns)

    assert x_out.shape == (B, L, D)
    assert attns.shape == (B, N_LAYERS, H, L, L)
    print("KERNEL_OK")
</pallas_src>

<mosaic_0001>
module attributes {stable_mosaic.version = 11 : i64} {
  func.func @fused_encoder_kernel(%arg0: i32, %arg1: memref<2x16x32xf32, #tpu.memory_space<vmem>>, %arg2: memref<2x32x96xbf16, #tpu.memory_space<vmem>>, %arg3: memref<2x32x32xbf16, #tpu.memory_space<vmem>>, %arg4: memref<2x32x64xbf16, #tpu.memory_space<vmem>>, %arg5: memref<2x64x32xbf16, #tpu.memory_space<vmem>>, %arg6: memref<2x2x128xf32, #tpu.memory_space<vmem>>, %arg7: memref<2x32xf32, #tpu.memory_space<vmem>>, %arg8: memref<2x16x32xf32, #tpu.memory_space<vmem>>, %arg9: memref<2x2x4x16x16xf32, #tpu.memory_space<vmem>>) attributes {dimension_semantics = [#tpu.dimension_semantics<parallel>], iteration_bounds = array<i64: 1>, scalar_prefetch = 0 : i64, scratch_operands = 0 : i64, tpu.core_type = #tpu.core_type<tc>, window_params = [{transform_indices = @transform_0, window_bounds = array<i64: 2, 16, 32>}, {pipeline_mode = #tpu.pipeline_mode<synchronous>, transform_indices = @transform_1, window_bounds = array<i64: 2, 32, 96>}, {pipeline_mode = #tpu.pipeline_mode<synchronous>, transform_indices = @transform_2, window_bounds = array<i64: 2, 32, 32>}, {pipeline_mode = #tpu.pipeline_mode<synchronous>, transform_indices = @transform_3, window_bounds = array<i64: 2, 32, 64>}, {pipeline_mode = #tpu.pipeline_mode<synchronous>, transform_indices = @transform_4, window_bounds = array<i64: 2, 64, 32>}, {pipeline_mode = #tpu.pipeline_mode<synchronous>, transform_indices = @transform_5, window_bounds = array<i64: 2, 2, 128>}, {pipeline_mode = #tpu.pipeline_mode<synchronous>, transform_indices = @transform_6, window_bounds = array<i64: 2, 32>}, {transform_indices = @transform_7, window_bounds = array<i64: 2, 16, 32>}, {transform_indices = @transform_8, window_bounds = array<i64: 2, 2, 4, 16, 16>}]} {
    %c0 = arith.constant 0 : index
    %c0_0 = arith.constant 0 : index
    %c0_1 = arith.constant 0 : index
    %0 = vector.load %arg1[%c0, %c0_0, %c0_1] : memref<2x16x32xf32, #tpu.memory_space<vmem>>, vector<2x16x32xf32>
    %1 = vector.shape_cast %0 : vector<2x16x32xf32> to vector<32x32xf32>
    %2 = tpu.iota {dimensions = array<i32: 0>} : vector<32x32xi32>
    %3 = tpu.iota {dimensions = array<i32: 1>} : vector<32x32xi32>
    %4 = tpu.iota {dimensions = array<i32: 0>} : vector<2x16x32xi32>
    %5 = vector.shape_cast %4 : vector<2x16x32xi32> to vector<32x32xi32>
    %c16_i32 = arith.constant 16 : i32
    %6 = vector.broadcast %c16_i32 : i32 to vector<32x32xi32>
    %7 = arith.muli %5, %6 : vector<32x32xi32>
    %c15_i32 = arith.constant 15 : i32
    %8 = vector.broadcast %c15_i32 : i32 to vector<32x32xi32>
    %9 = arith.addi %7, %8 : vector<32x32xi32>
    %cst = arith.constant 0.000000e+00 : f32
    %10 = vector.broadcast %cst : f32 to vector<32x32xf32>
    %c2_i32 = arith.constant 2 : i32
    %11 = vector.broadcast %c2_i32 : i32 to vector<32x32xi32>
    %12 = arith.subi %2, %11 : vector<32x32xi32>
    %c0_i32 = arith.constant 0 : i32
    %13 = vector.broadcast %c0_i32 : i32 to vector<32x32xi32>
    %14 = arith.addi %12, %13 : vector<32x32xi32>
    %15 = arith.maxsi %7, %14 : vector<32x32xi32>
    %16 = arith.minsi %9, %15 : vector<32x32xi32>
    %17 = arith.cmpi eq, %16, %3 : vector<32x32xi32>
    %cst_2 = arith.constant 2.000000e-01 : f32
    %cst_3 = arith.constant 0.000000e+00 : f32
    %18 = vector.broadcast %cst_2 : f32 to vector<32x32xf32>
    %19 = vector.broadcast %cst_3 : f32 to vector<32x32xf32>
    %20 = arith.select %17, %18, %19 : vector<32x32xi1>, vector<32x32xf32>
    %21 = arith.addf %10, %20 : vector<32x32xf32>
    %c2_i32_4 = arith.constant 2 : i32
    %22 = vector.broadcast %c2_i32_4 : i32 to vector<32x32xi32>
    %23 = arith.subi %2, %22 : vector<32x32xi32>
    %c1_i32 = arith.constant 1 : i32
    %24 = vector.broadcast %c1_i32 : i32 to vector<32x32xi32>
    %25 = arith.addi %23, %24 : vector<32x32xi32>
    %26 = arith.maxsi %7, %25 : vector<32x32xi32>
    %27 = arith.minsi %9, %26 : vector<32x32xi32>
    %28 = arith.cmpi eq, %27, %3 : vector<32x32xi32>
    %cst_5 = arith.constant 2.000000e-01 : f32
    %cst_6 = arith.constant 0.000000e+00 : f32
    %29 = vector.broadcast %cst_5 : f32 to vector<32x32xf32>
    %30 = vector.broadcast %cst_6 : f32 to vector<32x32xf32>
    %31 = arith.select %28, %29, %30 : vector<32x32xi1>, vector<32x32xf32>
    %32 = arith.addf %21, %31 : vector<32x32xf32>
    %c2_i32_7 = arith.constant 2 : i32
    %33 = vector.broadcast %c2_i32_7 : i32 to vector<32x32xi32>
    %34 = arith.subi %2, %33 : vector<32x32xi32>
    %c2_i32_8 = arith.constant 2 : i32
    %35 = vector.broadcast %c2_i32_8 : i32 to vector<32x32xi32>
    %36 = arith.addi %34, %35 : vector<32x32xi32>
    %37 = arith.maxsi %7, %36 : vector<32x32xi32>
    %38 = arith.minsi %9, %37 : vector<32x32xi32>
    %39 = arith.cmpi eq, %38, %3 : vector<32x32xi32>
    %cst_9 = arith.constant 2.000000e-01 : f32
    %cst_10 = arith.constant 0.000000e+00 : f32
    %40 = vector.broadcast %cst_9 : f32 to vector<32x32xf32>
    %41 = vector.broadcast %cst_10 : f32 to vector<32x32xf32>
    %42 = arith.select %39, %40, %41 : vector<32x32xi1>, vector<32x32xf32>
    %43 = arith.addf %32, %42 : vector<32x32xf32>
    %c2_i32_11 = arith.constant 2 : i32
    %44 = vector.broadcast %c2_i32_11 : i32 to vector<32x32xi32>
    %45 = arith.subi %2, %44 : vector<32x32xi32>
    %c3_i32 = arith.constant 3 : i32
    %46 = vector.broadcast %c3_i32 : i32 to vector<32x32xi32>
    %47 = arith.addi %45, %46 : vector<32x32xi32>
    %48 = arith.maxsi %7, %47 : vector<32x32xi32>
    %49 = arith.minsi %9, %48 : vector<32x32xi32>
    %50 = arith.cmpi eq, %49, %3 : vector<32x32xi32>
    %cst_12 = arith.constant 2.000000e-01 : f32
    %cst_13 = arith.constant 0.000000e+00 : f32
    %51 = vector.broadcast %cst_12 : f32 to vector<32x32xf32>
    %52 = vector.broadcast %cst_13 : f32 to vector<32x32xf32>
    %53 = arith.select %50, %51, %52 : vector<32x32xi1>, vector<32x32xf32>
    %54 = arith.addf %43, %53 : vector<32x32xf32>
    %c2_i32_14 = arith.constant 2 : i32
    %55 = vector.broadcast %c2_i32_14 : i32 to vector<32x32xi32>
    %56 = arith.subi %2, %55 : vector<32x32xi32>
    %c4_i32 = arith.constant 4 : i32
    %57 = vector.broadcast %c4_i32 : i32 to vector<32x32xi32>
    %58 = arith.addi %56, %57 : vector<32x32xi32>
    %59 = arith.maxsi %7, %58 : vector<32x32xi32>
    %60 = arith.minsi %9, %59 : vector<32x32xi32>
    %61 = arith.cmpi eq, %60, %3 : vector<32x32xi32>
    %cst_15 = arith.constant 2.000000e-01 : f32
    %cst_16 = arith.constant 0.000000e+00 : f32
    %62 = vector.broadcast %cst_15 : f32 to vector<32x32xf32>
    %63 = vector.broadcast %cst_16 : f32 to vector<32x32xf32>
    %64 = arith.select %61, %62, %63 : vector<32x32xi1>, vector<32x32xf32>
    %65 = arith.addf %54, %64 : vector<32x32xf32>
    %66 = arith.truncf %65 : vector<32x32xf32> to vector<32x32xbf16>
    %67 = arith.truncf %1 : vector<32x32xf32> to vector<32x32xbf16>
    %c0_17 = arith.constant 0 : index
    %c0_18 = arith.constant 0 : index
    %c0_19 = arith.constant 0 : index
    %68 = vector.load %arg2[%c0_17, %c0_18, %c0_19] : memref<2x32x96xbf16, #tpu.memory_space<vmem>>, vector<1x32x96xbf16>
    %69 = vector.shape_cast %68 : vector<1x32x96xbf16> to vector<32x96xbf16>
    %cst_20 = arith.constant dense<0.000000e+00> : vector<32x96xf32>
    %70 = tpu.matmul %67, %69, %cst_20 {dimension_numbers = #tpu.dot_dimension_numbers<[1], [0], [0], [1], [0, 0, 1, 1], [], []>} : vector<32x32xbf16>, vector<32x96xbf16>, vector<32x96xf32> -> vector<32x96xf32>
    %c0_21 = arith.constant 0 : index
    %c0_22 = arith.constant 0 : index
    %c0_23 = arith.constant 0 : index
    %71 = vector.load %arg6[%c0_21, %c0_22, %c0_23] : memref<2x2x128xf32, #tpu.memory_space<vmem>>, vector<1x1x96xf32>
    %72 = vector.shape_cast %71 : vector<1x1x96xf32> to vector<1x96xf32>
    %73 = vector.broadcast %72 : vector<1x96xf32> to vector<32x96xf32>
    %74 = arith.addf %70, %73 : vector<32x96xf32>
    %75 = vector.extract_strided_slice %74 {offsets = [0, 0], sizes = [16, 8], strides = [1, 1]} : vector<32x96xf32> to vector<16x8xf32>
    %76 = vector.extract_strided_slice %74 {offsets = [0, 8], sizes = [16, 8], strides = [1, 1]} : vector<32x96xf32> to vector<16x8xf32>
    %77 = vector.extract_strided_slice %74 {offsets = [0, 16], sizes = [16, 8], strides = [1, 1]} : vector<32x96xf32> to vector<16x8xf32>
    %78 = vector.extract_strided_slice %74 {offsets = [0, 24], sizes = [16, 8], strides = [1, 1]} : vector<32x96xf32> to vector<16x8xf32>
    %79 = vector.extract_strided_slice %74 {offsets = [16, 0], sizes = [16, 8], strides = [1, 1]} : vector<32x96xf32> to vector<16x8xf32>
    %80 = vector.extract_strided_slice %74 {offsets = [16, 8], sizes = [16, 8], strides = [1, 1]} : vector<32x96xf32> to vector<16x8xf32>
    %81 = vector.extract_strided_slice %74 {offsets = [16, 16], sizes = [16, 8], strides = [1, 1]} : vector<32x96xf32> to vector<16x8xf32>
    %82 = vector.extract_strided_slice %74 {offsets = [16, 24], sizes = [16, 8], strides = [1, 1]} : vector<32x96xf32> to vector<16x8xf32>
    %83 = vector.shape_cast %75 : vector<16x8xf32> to vector<1x16x8xf32>
    %84 = vector.shape_cast %76 : vector<16x8xf32> to vector<1x16x8xf32>
    %85 = vector.shape_cast %77 : vector<16x8xf32> to vector<1x16x8xf32>
    %86 = vector.shape_cast %78 : vector<16x8xf32> to vector<1x16x8xf32>
    %87 = vector.shape_cast %79 : vector<16x8xf32> to vector<1x16x8xf32>
    %88 = vector.shape_cast %80 : vector<16x8xf32> to vector<1x16x8xf32>
    %89 = vector.shape_cast %81 : vector<16x8xf32> to vector<1x16x8xf32>
    %90 = vector.shape_cast %82 : vector<16x8xf32> to vector<1x16x8xf32>
    %91 = tpu.concatenate %83, %84, %85, %86, %87, %88, %89, %90 in 0 : vector<1x16x8xf32>, vector<1x16x8xf32>, vector<1x16x8xf32>, vector<1x16x8xf32>, vector<1x16x8xf32>, vector<1x16x8xf32>, vector<1x16x8xf32>, vector<1x16x8xf32> -> vector<8x16x8xf32>
    %92 = vector.extract_strided_slice %74 {offsets = [0, 32], sizes = [16, 8], strides = [1, 1]} : vector<32x96xf32> to vector<16x8xf32>
    %93 = vector.extract_strided_slice %74 {offsets = [0, 40], sizes = [16, 8], strides = [1, 1]} : vector<32x96xf32> to vector<16x8xf32>
    %94 = vector.extract_strided_slice %74 {offsets = [0, 48], sizes = [16, 8], strides = [1, 1]} : vector<32x96xf32> to vector<16x8xf32>
    %95 = vector.extract_strided_slice %74 {offsets = [0, 56], sizes = [16, 8], strides = [1, 1]} : vector<32x96xf32> to vector<16x8xf32>
    %96 = vector.extract_strided_slice %74 {offsets = [16, 32], sizes = [16, 8], strides = [1, 1]} : vector<32x96xf32> to vector<16x8xf32>
    %97 = vector.extract_strided_slice %74 {offsets = [16, 40], sizes = [16, 8], strides = [1, 1]} : vector<32x96xf32> to vector<16x8xf32>
    %98 = vector.extract_strided_slice %74 {offsets = [16, 48], sizes = [16, 8], strides = [1, 1]} : vector<32x96xf32> to vector<16x8xf32>
    %99 = vector.extract_strided_slice %74 {offsets = [16, 56], sizes = [16, 8], strides = [1, 1]} : vector<32x96xf32> to vector<16x8xf32>
    %100 = vector.shape_cast %92 : vector<16x8xf32> to vector<1x16x8xf32>
    %101 = vector.shape_cast %93 : vector<16x8xf32> to vector<1x16x8xf32>
    %102 = vector.shape_cast %94 : vector<16x8xf32> to vector<1x16x8xf32>
    %103 = vector.shape_cast %95 : vector<16x8xf32> to vector<1x16x8xf32>
    %104 = vector.shape_cast %96 : vector<16x8xf32> to vector<1x16x8xf32>
    %105 = vector.shape_cast %97 : vector<16x8xf32> to vector<1x16x8xf32>
    %106 = vector.shape_cast %98 : vector<16x8xf32> to vector<1x16x8xf32>
    %107 = vector.shape_cast %99 : vector<16x8xf32> to vector<1x16x8xf32>
    %108 = tpu.concatenate %100, %101, %102, %103, %104, %105, %106, %107 in 0 : vector<1x16x8xf32>, vector<1x16x8xf32>, vector<1x16x8xf32>, vector<1x16x8xf32>, vector<1x16x8xf32>, vector<1x16x8xf32>, vector<1x16x8xf32>, vector<1x16x8xf32> -> vector<8x16x8xf32>
    %109 = vector.extract_strided_slice %74 {offsets = [0, 64], sizes = [16, 8], strides = [1, 1]} : vector<32x96xf32> to vector<16x8xf32>
    %110 = vector.extract_strided_slice %74 {offsets = [0, 72], sizes = [16, 8], strides = [1, 1]} : vector<32x96xf32> to vector<16x8xf32>
    %111 = vector.extract_strided_slice %74 {offsets = [0, 80], sizes = [16, 8], strides = [1, 1]} : vector<32x96xf32> to vector<16x8xf32>
    %112 = vector.extract_strided_slice %74 {offsets = [0, 88], sizes = [16, 8], strides = [1, 1]} : vector<32x96xf32> to vector<16x8xf32>
    %113 = vector.extract_strided_slice %74 {offsets = [16, 64], sizes = [16, 8], strides = [1, 1]} : vector<32x96xf32> to vector<16x8xf32>
    %114 = vector.extract_strided_slice %74 {offsets = [16, 72], sizes = [16, 8], strides = [1, 1]} : vector<32x96xf32> to vector<16x8xf32>
    %115 = vector.extract_strided_slice %74 {offsets = [16, 80], sizes = [16, 8], strides = [1, 1]} : vector<32x96xf32> to vector<16x8xf32>
    %116 = vector.extract_strided_slice %74 {offsets = [16, 88], sizes = [16, 8], strides = [1, 1]} : vector<32x96xf32> to vector<16x8xf32>
    %117 = vector.shape_cast %109 : vector<16x8xf32> to vector<1x16x8xf32>
    %118 = vector.shape_cast %110 : vector<16x8xf32> to vector<1x16x8xf32>
    %119 = vector.shape_cast %111 : vector<16x8xf32> to vector<1x16x8xf32>
    %120 = vector.shape_cast %112 : vector<16x8xf32> to vector<1x16x8xf32>
    %121 = vector.shape_cast %113 : vector<16x8xf32> to vector<1x16x8xf32>
    %122 = vector.shape_cast %114 : vector<16x8xf32> to vector<1x16x8xf32>
    %123 = vector.shape_cast %115 : vector<16x8xf32> to vector<1x16x8xf32>
    %124 = vector.shape_cast %116 : vector<16x8xf32> to vector<1x16x8xf32>
    %125 = tpu.concatenate %117, %118, %119, %120, %121, %122, %123, %124 in 0 : vector<1x16x8xf32>, vector<1x16x8xf32>, vector<1x16x8xf32>, vector<1x16x8xf32>, vector<1x16x8xf32>, vector<1x16x8xf32>, vector<1x16x8xf32>, vector<1x16x8xf32> -> vector<8x16x8xf32>
    %126 = arith.truncf %91 : vector<8x16x8xf32> to vector<8x16x8xbf16>
    %127 = arith.truncf %108 : vector<8x16x8xf32> to vector<8x16x8xbf16>
    %cst_24 = arith.constant dense<0.000000e+00> : vector<8x16x16xf32>
    %128 = tpu.matmul %126, %127, %cst_24 {dimension_numbers = #tpu.dot_dimension_numbers<[2], [2], [1], [1], [0, 0, 0, 1, 1, 1], [0], [0]>} : vector<8x16x8xbf16>, vector<8x16x8xbf16>, vector<8x16x16xf32> -> vector<8x16x16xf32>
    %cst_25 = arith.constant dense<0xFF800000> : vector<8x16xf32>
    %129 = vector.multi_reduction <maximumf>, %128, %cst_25 [2] : vector<8x16x16xf32> to vector<8x16xf32>
    %130 = vector.shape_cast %129 : vector<8x16xf32> to vector<8x16x1xf32>
    %131 = vector.broadcast %130 : vector<8x16x1xf32> to vector<8x16x16xf32>
    %132 = arith.subf %128, %131 : vector<8x16x16xf32>
    %133 = math.exp %132 : vector<8x16x16xf32>
    %cst_26 = arith.constant dense<0.000000e+00> : vector<8x16xf32>
    %134 = vector.multi_reduction <add>, %133, %cst_26 [2] : vector<8x16x16xf32> to vector<8x16xf32>
    %135 = vector.shape_cast %134 : vector<8x16xf32> to vector<8x16x1xf32>
    %136 = tpu.reciprocal %135 {approx = true} : vector<8x16x1xf32> -> vector<8x16x1xf32>
    %137 = vector.broadcast %136 : vector<8x16x1xf32> to vector<8x16x16xf32>
    %138 = arith.mulf %133, %137 : vector<8x16x16xf32>
    %139 = vector.shape_cast %138 : vector<8x16x16xf32> to vector<2x4x16x16xf32>
    %c0_27 = arith.constant 0 : index
    %c0_28 = arith.constant 0 : index
    %c0_29 = arith.constant 0 : index
    %c0_30 = arith.constant 0 : index
    %c0_31 = arith.constant 0 : index
    %140 = vector.load %arg9[%c0_27, %c0_28, %c0_29, %c0_30, %c0_31] : memref<2x2x4x16x16xf32, #tpu.memory_space<vmem>>, vector<2x1x4x16x16xf32>
    %141 = vector.shape_cast %140 : vector<2x1x4x16x16xf32> to vector<2x4x16x16xf32>
    %142 = vector.shape_cast %139 : vector<2x4x16x16xf32> to vector<2x1x4x16x16xf32>
    tpu.vector_store %arg9[%c0_27, %c0_28, %c0_29, %c0_30, %c0_31], %142 {strides = array<i32>} : memref<2x2x4x16x16xf32, #tpu.memory_space<vmem>>, vector<2x1x4x16x16xf32>,
    %143 = arith.truncf %138 : vector<8x16x16xf32> to vector<8x16x16xbf16>
    %144 = arith.truncf %125 : vector<8x16x8xf32> to vector<8x16x8xbf16>
    %cst_32 = arith.constant dense<0.000000e+00> : vector<8x16x8xf32>
    %145 = tpu.matmul %143, %144, %cst_32 {dimension_numbers = #tpu.dot_dimension_numbers<[2], [1], [1], [2], [0, 0, 0, 1, 1, 2], [0], [0]>} : vector<8x16x16xbf16>, vector<8x16x8xbf16>, vector<8x16x8xf32> -> vector<8x16x8xf32>
    %146 = vector.extract_strided_slice %145 {offsets = [0, 0, 0], sizes = [1, 16, 8], strides = [1, 1, 1]} : vector<8x16x8xf32> to vector<1x16x8xf32>
    %147 = vector.shape_cast %146 : vector<1x16x8xf32> to vector<16x8xf32>
    %148 = vector.extract_strided_slice %145 {offsets = [1, 0, 0], sizes = [1, 16, 8], strides = [1, 1, 1]} : vector<8x16x8xf32> to vector<1x16x8xf32>
    %149 = vector.shape_cast %148 : vector<1x16x8xf32> to vector<16x8xf32>
    %150 = vector.extract_strided_slice %145 {offsets = [2, 0, 0], sizes = [1, 16, 8], strides = [1, 1, 1]} : vector<8x16x8xf32> to vector<1x16x8xf32>
    %151 = vector.shape_cast %150 : vector<1x16x8xf32> to vector<16x8xf32>
    %152 = vector.extract_strided_slice %145 {offsets = [3, 0, 0], sizes = [1, 16, 8], strides = [1, 1, 1]} : vector<8x16x8xf32> to vector<1x16x8xf32>
    %153 = vector.shape_cast %152 : vector<1x16x8xf32> to vector<16x8xf32>
    %154 = tpu.concatenate %147, %149, %151, %153 in 1 : vector<16x8xf32>, vector<16x8xf32>, vector<16x8xf32>, vector<16x8xf32> -> vector<16x32xf32>
    %155 = vector.extract_strided_slice %145 {offsets = [4, 0, 0], sizes = [1, 16, 8], strides = [1, 1, 1]} : vector<8x16x8xf32> to vector<1x16x8xf32>
    %156 = vector.shape_cast %155 : vector<1x16x8xf32> to vector<16x8xf32>
    %157 = vector.extract_strided_slice %145 {offsets = [5, 0, 0], sizes = [1, 16, 8], strides = [1, 1, 1]} : vector<8x16x8xf32> to vector<1x16x8xf32>
    %158 = vector.shape_cast %157 : vector<1x16x8xf32> to vector<16x8xf32>
    %159 = vector.extract_strided_slice %145 {offsets = [6, 0, 0], sizes = [1, 16, 8], strides = [1, 1, 1]} : vector<8x16x8xf32> to vector<1x16x8xf32>
    %160 = vector.shape_cast %159 : vector<1x16x8xf32> to vector<16x8xf32>
    %161 = vector.extract_strided_slice %145 {offsets = [7, 0, 0], sizes = [1, 16, 8], strides = [1, 1, 1]} : vector<8x16x8xf32> to vector<1x16x8xf32>
    %162 = vector.shape_cast %161 : vector<1x16x8xf32> to vector<16x8xf32>
    %163 = tpu.concatenate %156, %158, %160, %162 in 1 : vector<16x8xf32>, vector<16x8xf32>, vector<16x8xf32>, vector<16x8xf32> -> vector<16x32xf32>
    %164 = vector.shape_cast %154 : vector<16x32xf32> to vector<1x16x32xf32>
    %165 = vector.shape_cast %163 : vector<16x32xf32> to vector<1x16x32xf32>
    %166 = tpu.concatenate %164, %165 in 0 : vector<1x16x32xf32>, vector<1x16x32xf32> -> vector<2x16x32xf32>
    %167 = vector.shape_cast %166 : vector<2x16x32xf32> to vector<32x32xf32>
    %168 = arith.truncf %167 : vector<32x32xf32> to vector<32x32xbf16>
    %c0_33 = arith.constant 0 : index
    %c0_34 = arith.constant 0 : index
    %c0_35 = arith.constant 0 : index
    %169 = vector.load %arg3[%c0_33, %c0_34, %c0_35] : memref<2x32x32xbf16, #tpu.memory_space<vmem>>, vector<1x32x32xbf16>
    %170 = vector.shape_cast %169 : vector<1x32x32xbf16> to vector<32x32xbf16>
    %cst_36 = arith.constant dense<0.000000e+00> : vector<32x32xf32>
    %171 = tpu.matmul %168, %170, %cst_36 {dimension_numbers = #tpu.dot_dimension_numbers<[1], [0], [0], [1], [0, 0, 1, 1], [], []>} : vector<32x32xbf16>, vector<32x32xbf16>, vector<32x32xf32> -> vector<32x32xf32>
    %c0_37 = arith.constant 0 : index
    %c0_38 = arith.constant 0 : index
    %c96 = arith.constant 96 : index
    %172 = vector.load %arg6[%c0_37, %c0_38, %c96] : memref<2x2x128xf32, #tpu.memory_space<vmem>>, vector<1x1x32xf32>
    %173 = vector.shape_cast %172 : vector<1x1x32xf32> to vector<1x32xf32>
    %174 = vector.broadcast %173 : vector<1x32xf32> to vector<32x32xf32>
    %175 = arith.addf %171, %174 : vector<32x32xf32>
    %176 = arith.addf %1, %175 : vector<32x32xf32>
    %177 = arith.truncf %176 : vector<32x32xf32> to vector<32x32xbf16>
    %cst_39 = arith.constant dense<0.000000e+00> : vector<32x32xf32>
    %178 = tpu.matmul %66, %177, %cst_39 {dimension_numbers = #tpu.dot_dimension_numbers<[1], [0], [0], [1], [0, 0, 1, 1], [], []>} : vector<32x32xbf16>, vector<32x32xbf16>, vector<32x32xf32> -> vector<32x32xf32>
    %179 = arith.subf %176, %178 : vector<32x32xf32>
    %180 = arith.truncf %179 : vector<32x32xf32> to vector<32x32xbf16>
    %c0_40 = arith.constant 0 : index
    %c0_41 = arith.constant 0 : index
    %c0_42 = arith.constant 0 : index
    %181 = vector.load %arg4[%c0_40, %c0_41, %c0_42] : memref<2x32x64xbf16, #tpu.memory_space<vmem>>, vector<1x32x64xbf16>
    %182 = vector.shape_cast %181 : vector<1x32x64xbf16> to vector<32x64xbf16>
    %cst_43 = arith.constant dense<0.000000e+00> : vector<32x64xf32>
    %183 = tpu.matmul %180, %182, %cst_43 {dimension_numbers = #tpu.dot_dimension_numbers<[1], [0], [0], [1], [0, 0, 1, 1], [], []>} : vector<32x32xbf16>, vector<32x64xbf16>, vector<32x64xf32> -> vector<32x64xf32>
    %c0_44 = arith.constant 0 : index
    %c1 = arith.constant 1 : index
    %c0_45 = arith.constant 0 : index
    %184 = vector.load %arg6[%c0_44, %c1, %c0_45] : memref<2x2x128xf32, #tpu.memory_space<vmem>>, vector<1x1x64xf32>
    %185 = vector.shape_cast %184 : vector<1x1x64xf32> to vector<1x64xf32>
    %186 = vector.broadcast %185 : vector<1x64xf32> to vector<32x64xf32>
    %187 = arith.addf %183, %186 : vector<32x64xf32>
    %cst_46 = arith.constant 0.000000e+00 : f32
    %188 = vector.broadcast %cst_46 : f32 to vector<32x64xf32>
    %189 = arith.maximumf %187, %188 : vector<32x64xf32>
    %190 = arith.truncf %189 : vector<32x64xf32> to vector<32x64xbf16>
    %c0_47 = arith.constant 0 : index
    %c0_48 = arith.constant 0 : index
    %c0_49 = arith.constant 0 : index
    %191 = vector.load %arg5[%c0_47, %c0_48, %c0_49] : memref<2x64x32xbf16, #tpu.memory_space<vmem>>, vector<1x64x32xbf16>
    %192 = vector.shape_cast %191 : vector<1x64x32xbf16> to vector<64x32xbf16>
    %cst_50 = arith.constant dense<0.000000e+00> : vector<32x32xf32>
    %193 = tpu.matmul %190, %192, %cst_50 {dimension_numbers = #tpu.dot_dimension_numbers<[1], [0], [0], [1], [0, 0, 1, 1], [], []>} : vector<32x64xbf16>, vector<64x32xbf16>, vector<32x32xf32> -> vector<32x32xf32>
    %c0_51 = arith.constant 0 : index
    %c1_52 = arith.constant 1 : index
    %c64 = arith.constant 64 : index
    %194 = vector.load %arg6[%c0_51, %c1_52, %c64] : memref<2x2x128xf32, #tpu.memory_space<vmem>>, vector<1x1x32xf32>
    %195 = vector.shape_cast %194 : vector<1x1x32xf32> to vector<1x32xf32>
    %196 = vector.broadcast %195 : vector<1x32xf32> to vector<32x32xf32>
    %197 = arith.addf %193, %196 : vector<32x32xf32>
    %198 = arith.addf %179, %197 : vector<32x32xf32>
    %199 = arith.truncf %198 : vector<32x32xf32> to vector<32x32xbf16>
    %cst_53 = arith.constant dense<0.000000e+00> : vector<32x32xf32>
    %200 = tpu.matmul %66, %199, %cst_53 {dimension_numbers = #tpu.dot_dimension_numbers<[1], [0], [0], [1], [0, 0, 1, 1], [], []>} : vector<32x32xbf16>, vector<32x32xbf16>, vector<32x32xf32> -> vector<32x32xf32>
    %201 = arith.subf %198, %200 : vector<32x32xf32>
    %202 = arith.truncf %201 : vector<32x32xf32> to vector<32x32xbf16>
    %c1_54 = arith.constant 1 : index
    %c0_55 = arith.constant 0 : index
    %c0_56 = arith.constant 0 : index
    %203 = vector.load %arg2[%c1_54, %c0_55, %c0_56] : memref<2x32x96xbf16, #tpu.memory_space<vmem>>, vector<1x32x96xbf16>
    %204 = vector.shape_cast %203 : vector<1x32x96xbf16> to vector<32x96xbf16>
    %cst_57 = arith.constant dense<0.000000e+00> : vector<32x96xf32>
    %205 = tpu.matmul %202, %204, %cst_57 {dimension_numbers = #tpu.dot_dimension_numbers<[1], [0], [0], [1], [0, 0, 1, 1], [], []>} : vector<32x32xbf16>, vector<32x96xbf16>, vector<32x96xf32> -> vector<32x96xf32>
    %c1_58 = arith.constant 1 : index
    %c0_59 = arith.constant 0 : index
    %c0_60 = arith.constant 0 : index
    %206 = vector.load %arg6[%c1_58, %c0_59, %c0_60] : memref<2x2x128xf32, #tpu.memory_space<vmem>>, vector<1x1x96xf32>
    %207 = vector.shape_cast %206 : vector<1x1x96xf32> to vector<1x96xf32>
    %208 = vector.broadcast %207 : vector<1x96xf32> to vector<32x96xf32>
    %209 = arith.addf %205, %208 : vector<32x96xf32>
    %210 = vector.extract_strided_slice %209 {offsets = [0, 0], sizes = [16, 8], strides = [1, 1]} : vector<32x96xf32> to vector<16x8xf32>
    %211 = vector.extract_strided_slice %209 {offsets = [0, 8], sizes = [16, 8], strides = [1, 1]} : vector<32x96xf32> to vector<16x8xf32>
    %212 = vector.extract_strided_slice %209 {offsets = [0, 16], sizes = [16, 8], strides = [1, 1]} : vector<32x96xf32> to vector<16x8xf32>
    %213 = vector.extract_strided_slice %209 {offsets = [0, 24], sizes = [16, 8], strides = [1, 1]} : vector<32x96xf32> to vector<16x8xf32>
    %214 = vector.extract_strided_slice %209 {offsets = [16, 0], sizes = [16, 8], strides = [1, 1]} : vector<32x96xf32> to vector<16x8xf32>
    %215 = vector.extract_strided_slice %209 {offsets = [16, 8], sizes = [16, 8], strides = [1, 1]} : vector<32x96xf32> to vector<16x8xf32>
    %216 = vector.extract_strided_slice %209 {offsets = [16, 16], sizes = [16, 8], strides = [1, 1]} : vector<32x96xf32> to vector<16x8xf32>
    %217 = vector.extract_strided_slice %209 {offsets = [16, 24], sizes = [16, 8], strides = [1, 1]} : vector<32x96xf32> to vector<16x8xf32>
    %218 = vector.shape_cast %210 : vector<16x8xf32> to vector<1x16x8xf32>
    %219 = vector.shape_cast %211 : vector<16x8xf32> to vector<1x16x8xf32>
    %220 = vector.shape_cast %212 : vector<16x8xf32> to vector<1x16x8xf32>
    %221 = vector.shape_cast %213 : vector<16x8xf32> to vector<1x16x8xf32>
    %222 = vector.shape_cast %214 : vector<16x8xf32> to vector<1x16x8xf32>
    %223 = vector.shape_cast %215 : vector<16x8xf32> to vector<1x16x8xf32>
    %224 = vector.shape_cast %216 : vector<16x8xf32> to vector<1x16x8xf32>
    %225 = vector.shape_cast %217 : vector<16x8xf32> to vector<1x16x8xf32>
    %226 = tpu.concatenate %218, %219, %220, %221, %222, %223, %224, %225 in 0 : vector<1x16x8xf32>, vector<1x16x8xf32>, vector<1x16x8xf32>, vector<1x16x8xf32>, vector<1x16x8xf32>, vector<1x16x8xf32>, vector<1x16x8xf32>, vector<1x16x8xf32> -> vector<8x16x8xf32>
    %227 = vector.extract_strided_slice %209 {offsets = [0, 32], sizes = [16, 8], strides = [1, 1]} : vector<32x96xf32> to vector<16x8xf32>
    %228 = vector.extract_strided_slice %209 {offsets = [0, 40], sizes = [16, 8], strides = [1, 1]} : vector<32x96xf32> to vector<16x8xf32>
    %229 = vector.extract_strided_slice %209 {offsets = [0, 48], sizes = [16, 8], strides = [1, 1]} : vector<32x96xf32> to vector<16x8xf32>
    %230 = vector.extract_strided_slice %209 {offsets = [0, 56], sizes = [16, 8], strides = [1, 1]} : vector<32x96xf32> to vector<16x8xf32>
    %231 = vector.extract_strided_slice %209 {offsets = [16, 32], sizes = [16, 8], strides = [1, 1]} : vector<32x96xf32> to vector<16x8xf32>
    %232 = vector.extract_strided_slice %209 {offsets = [16, 40], sizes = [16, 8], strides = [1, 1]} : vector<32x96xf32> to vector<16x8xf32>
    %233 = vector.extract_strided_slice %209 {offsets = [16, 48], sizes = [16, 8], strides = [1, 1]} : vector<32x96xf32> to vector<16x8xf32>
    %234 = vector.extract_strided_slice %209 {offsets = [16, 56], sizes = [16, 8], strides = [1, 1]} : vector<32x96xf32> to vector<16x8xf32>
    %235 = vector.shape_cast %227 : vector<16x8xf32> to vector<1x16x8xf32>
    %236 = vector.shape_cast %228 : vector<16x8xf32> to vector<1x16x8xf32>
    %237 = vector.shape_cast %229 : vector<16x8xf32> to vector<1x16x8xf32>
    %238 = vector.shape_cast %230 : vector<16x8xf32> to vector<1x16x8xf32>
    %239 = vector.shape_cast %231 : vector<16x8xf32> to vector<1x16x8xf32>
    %240 = vector.shape_cast %232 : vector<16x8xf32> to vector<1x16x8xf32>
    %241 = vector.shape_cast %233 : vector<16x8xf32> to vector<1x16x8xf32>
    %242 = vector.shape_cast %234 : vector<16x8xf32> to vector<1x16x8xf32>
    %243 = tpu.concatenate %235, %236, %237, %238, %239, %240, %241, %242 in 0 : vector<1x16x8xf32>, vector<1x16x8xf32>, vector<1x16x8xf32>, vector<1x16x8xf32>, vector<1x16x8xf32>, vector<1x16x8xf32>, vector<1x16x8xf32>, vector<1x16x8xf32> -> vector<8x16x8xf32>
    %244 = vector.extract_strided_slice %209 {offsets = [0, 64], sizes = [16, 8], strides = [1, 1]} : vector<32x96xf32> to vector<16x8xf32>
    %245 = vector.extract_strided_slice %209 {offsets = [0, 72], sizes = [16, 8], strides = [1, 1]} : vector<32x96xf32> to vector<16x8xf32>
    %246 = vector.extract_strided_slice %209 {offsets = [0, 80], sizes = [16, 8], strides = [1, 1]} : vector<32x96xf32> to vector<16x8xf32>
    %247 = vector.extract_strided_slice %209 {offsets = [0, 88], sizes = [16, 8], strides = [1, 1]} : vector<32x96xf32> to vector<16x8xf32>
    %248 = vector.extract_strided_slice %209 {offsets = [16, 64], sizes = [16, 8], strides = [1, 1]} : vector<32x96xf32> to vector<16x8xf32>
    %249 = vector.extract_strided_slice %209 {offsets = [16, 72], sizes = [16, 8], strides = [1, 1]} : vector<32x96xf32> to vector<16x8xf32>
    %250 = vector.extract_strided_slice %209 {offsets = [16, 80], sizes = [16, 8], strides = [1, 1]} : vector<32x96xf32> to vector<16x8xf32>
    %251 = vector.extract_strided_slice %209 {offsets = [16, 88], sizes = [16, 8], strides = [1, 1]} : vector<32x96xf32> to vector<16x8xf32>
    %252 = vector.shape_cast %244 : vector<16x8xf32> to vector<1x16x8xf32>
    %253 = vector.shape_cast %245 : vector<16x8xf32> to vector<1x16x8xf32>
    %254 = vector.shape_cast %246 : vector<16x8xf32> to vector<1x16x8xf32>
    %255 = vector.shape_cast %247 : vector<16x8xf32> to vector<1x16x8xf32>
    %256 = vector.shape_cast %248 : vector<16x8xf32> to vector<1x16x8xf32>
    %257 = vector.shape_cast %249 : vector<16x8xf32> to vector<1x16x8xf32>
    %258 = vector.shape_cast %250 : vector<16x8xf32> to vector<1x16x8xf32>
    %259 = vector.shape_cast %251 : vector<16x8xf32> to vector<1x16x8xf32>
    %260 = tpu.concatenate %252, %253, %254, %255, %256, %257, %258, %259 in 0 : vector<1x16x8xf32>, vector<1x16x8xf32>, vector<1x16x8xf32>, vector<1x16x8xf32>, vector<1x16x8xf32>, vector<1x16x8xf32>, vector<1x16x8xf32>, vector<1x16x8xf32> -> vector<8x16x8xf32>
    %261 = arith.truncf %226 : vector<8x16x8xf32> to vector<8x16x8xbf16>
    %262 = arith.truncf %243 : vector<8x16x8xf32> to vector<8x16x8xbf16>
    %cst_61 = arith.constant dense<0.000000e+00> : vector<8x16x16xf32>
    %263 = tpu.matmul %261, %262, %cst_61 {dimension_numbers = #tpu.dot_dimension_numbers<[2], [2], [1], [1], [0, 0, 0, 1, 1, 1], [0], [0]>} : vector<8x16x8xbf16>, vector<8x16x8xbf16>, vector<8x16x16xf32> -> vector<8x16x16xf32>
    %cst_62 = arith.constant dense<0xFF800000> : vector<8x16xf32>
    %264 = vector.multi_reduction <maximumf>, %263, %cst_62 [2] : vector<8x16x16xf32> to vector<8x16xf32>
    %265 = vector.shape_cast %264 : vector<8x16xf32> to vector<8x16x1xf32>
    %266 = vector.broadcast %265 : vector<8x16x1xf32> to vector<8x16x16xf32>
    %267 = arith.subf %263, %266 : vector<8x16x16xf32>
    %268 = math.exp %267 : vector<8x16x16xf32>
    %cst_63 = arith.constant dense<0.000000e+00> : vector<8x16xf32>
    %269 = vector.multi_reduction <add>, %268, %cst_63 [2] : vector<8x16x16xf32> to vector<8x16xf32>
    %270 = vector.shape_cast %269 : vector<8x16xf32> to vector<8x16x1xf32>
    %271 = tpu.reciprocal %270 {approx = true} : vector<8x16x1xf32> -> vector<8x16x1xf32>
    %272 = vector.broadcast %271 : vector<8x16x1xf32> to vector<8x16x16xf32>
    %273 = arith.mulf %268, %272 : vector<8x16x16xf32>
    %274 = vector.shape_cast %273 : vector<8x16x16xf32> to vector<2x4x16x16xf32>
    %c0_64 = arith.constant 0 : index
    %c1_65 = arith.constant 1 : index
    %c0_66 = arith.constant 0 : index
    %c0_67 = arith.constant 0 : index
    %c0_68 = arith.constant 0 : index
    %275 = vector.load %arg9[%c0_64, %c1_65, %c0_66, %c0_67, %c0_68] : memref<2x2x4x16x16xf32, #tpu.memory_space<vmem>>, vector<2x1x4x16x16xf32>
    %276 = vector.shape_cast %275 : vector<2x1x4x16x16xf32> to vector<2x4x16x16xf32>
    %277 = vector.shape_cast %274 : vector<2x4x16x16xf32> to vector<2x1x4x16x16xf32>
    tpu.vector_store %arg9[%c0_64, %c1_65, %c0_66, %c0_67, %c0_68], %277 {strides = array<i32>} : memref<2x2x4x16x16xf32, #tpu.memory_space<vmem>>, vector<2x1x4x16x16xf32>,
    %278 = arith.truncf %273 : vector<8x16x16xf32> to vector<8x16x16xbf16>
    %279 = arith.truncf %260 : vector<8x16x8xf32> to vector<8x16x8xbf16>
    %cst_69 = arith.constant dense<0.000000e+00> : vector<8x16x8xf32>
    %280 = tpu.matmul %278, %279, %cst_69 {dimension_numbers = #tpu.dot_dimension_numbers<[2], [1], [1], [2], [0, 0, 0, 1, 1, 2], [0], [0]>} : vector<8x16x16xbf16>, vector<8x16x8xbf16>, vector<8x16x8xf32> -> vector<8x16x8xf32>
    %281 = vector.extract_strided_slice %280 {offsets = [0, 0, 0], sizes = [1, 16, 8], strides = [1, 1, 1]} : vector<8x16x8xf32> to vector<1x16x8xf32>
    %282 = vector.shape_cast %281 : vector<1x16x8xf32> to vector<16x8xf32>
    %283 = vector.extract_strided_slice %280 {offsets = [1, 0, 0], sizes = [1, 16, 8], strides = [1, 1, 1]} : vector<8x16x8xf32> to vector<1x16x8xf32>
    %284 = vector.shape_cast %283 : vector<1x16x8xf32> to vector<16x8xf32>
    %285 = vector.extract_strided_slice %280 {offsets = [2, 0, 0], sizes = [1, 16, 8], strides = [1, 1, 1]} : vector<8x16x8xf32> to vector<1x16x8xf32>
    %286 = vector.shape_cast %285 : vector<1x16x8xf32> to vector<16x8xf32>
    %287 = vector.extract_strided_slice %280 {offsets = [3, 0, 0], sizes = [1, 16, 8], strides = [1, 1, 1]} : vector<8x16x8xf32> to vector<1x16x8xf32>
    %288 = vector.shape_cast %287 : vector<1x16x8xf32> to vector<16x8xf32>
    %289 = tpu.concatenate %282, %284, %286, %288 in 1 : vector<16x8xf32>, vector<16x8xf32>, vector<16x8xf32>, vector<16x8xf32> -> vector<16x32xf32>
    %290 = vector.extract_strided_slice %280 {offsets = [4, 0, 0], sizes = [1, 16, 8], strides = [1, 1, 1]} : vector<8x16x8xf32> to vector<1x16x8xf32>
    %291 = vector.shape_cast %290 : vector<1x16x8xf32> to vector<16x8xf32>
    %292 = vector.extract_strided_slice %280 {offsets = [5, 0, 0], sizes = [1, 16, 8], strides = [1, 1, 1]} : vector<8x16x8xf32> to vector<1x16x8xf32>
    %293 = vector.shape_cast %292 : vector<1x16x8xf32> to vector<16x8xf32>
    %294 = vector.extract_strided_slice %280 {offsets = [6, 0, 0], sizes = [1, 16, 8], strides = [1, 1, 1]} : vector<8x16x8xf32> to vector<1x16x8xf32>
    %295 = vector.shape_cast %294 : vector<1x16x8xf32> to vector<16x8xf32>
    %296 = vector.extract_strided_slice %280 {offsets = [7, 0, 0], sizes = [1, 16, 8], strides = [1, 1, 1]} : vector<8x16x8xf32> to vector<1x16x8xf32>
    %297 = vector.shape_cast %296 : vector<1x16x8xf32> to vector<16x8xf32>
    %298 = tpu.concatenate %291, %293, %295, %297 in 1 : vector<16x8xf32>, vector<16x8xf32>, vector<16x8xf32>, vector<16x8xf32> -> vector<16x32xf32>
    %299 = vector.shape_cast %289 : vector<16x32xf32> to vector<1x16x32xf32>
    %300 = vector.shape_cast %298 : vector<16x32xf32> to vector<1x16x32xf32>
    %301 = tpu.concatenate %299, %300 in 0 : vector<1x16x32xf32>, vector<1x16x32xf32> -> vector<2x16x32xf32>
    %302 = vector.shape_cast %301 : vector<2x16x32xf32> to vector<32x32xf32>
    %303 = arith.truncf %302 : vector<32x32xf32> to vector<32x32xbf16>
    %c1_70 = arith.constant 1 : index
    %c0_71 = arith.constant 0 : index
    %c0_72 = arith.constant 0 : index
    %304 = vector.load %arg3[%c1_70, %c0_71, %c0_72] : memref<2x32x32xbf16, #tpu.memory_space<vmem>>, vector<1x32x32xbf16>
    %305 = vector.shape_cast %304 : vector<1x32x32xbf16> to vector<32x32xbf16>
    %cst_73 = arith.constant dense<0.000000e+00> : vector<32x32xf32>
    %306 = tpu.matmul %303, %305, %cst_73 {dimension_numbers = #tpu.dot_dimension_numbers<[1], [0], [0], [1], [0, 0, 1, 1], [], []>} : vector<32x32xbf16>, vector<32x32xbf16>, vector<32x32xf32> -> vector<32x32xf32>
    %c1_74 = arith.constant 1 : index
    %c0_75 = arith.constant 0 : index
    %c96_76 = arith.constant 96 : index
    %307 = vector.load %arg6[%c1_74, %c0_75, %c96_76] : memref<2x2x128xf32, #tpu.memory_space<vmem>>, vector<1x1x32xf32>
    %308 = vector.shape_cast %307 : vector<1x1x32xf32> to vector<1x32xf32>
    %309 = vector.broadcast %308 : vector<1x32xf32> to vector<32x32xf32>
    %310 = arith.addf %306, %309 : vector<32x32xf32>
    %311 = arith.addf %201, %310 : vector<32x32xf32>
    %312 = arith.truncf %311 : vector<32x32xf32> to vector<32x32xbf16>
    %cst_77 = arith.constant dense<0.000000e+00> : vector<32x32xf32>
    %313 = tpu.matmul %66, %312, %cst_77 {dimension_numbers = #tpu.dot_dimension_numbers<[1], [0], [0], [1], [0, 0, 1, 1], [], []>} : vector<32x32xbf16>, vector<32x32xbf16>, vector<32x32xf32> -> vector<32x32xf32>
    %314 = arith.subf %311, %313 : vector<32x32xf32>
    %315 = arith.truncf %314 : vector<32x32xf32> to vector<32x32xbf16>
    %c1_78 = arith.constant 1 : index
    %c0_79 = arith.constant 0 : index
    %c0_80 = arith.constant 0 : index
    %316 = vector.load %arg4[%c1_78, %c0_79, %c0_80] : memref<2x32x64xbf16, #tpu.memory_space<vmem>>, vector<1x32x64xbf16>
    %317 = vector.shape_cast %316 : vector<1x32x64xbf16> to vector<32x64xbf16>
    %cst_81 = arith.constant dense<0.000000e+00> : vector<32x64xf32>
    %318 = tpu.matmul %315, %317, %cst_81 {dimension_numbers = #tpu.dot_dimension_numbers<[1], [0], [0], [1], [0, 0, 1, 1], [], []>} : vector<32x32xbf16>, vector<32x64xbf16>, vector<32x64xf32> -> vector<32x64xf32>
    %c1_82 = arith.constant 1 : index
    %c1_83 = arith.constant 1 : index
    %c0_84 = arith.constant 0 : index
    %319 = vector.load %arg6[%c1_82, %c1_83, %c0_84] : memref<2x2x128xf32, #tpu.memory_space<vmem>>, vector<1x1x64xf32>
    %320 = vector.shape_cast %319 : vector<1x1x64xf32> to vector<1x64xf32>
    %321 = vector.broadcast %320 : vector<1x64xf32> to vector<32x64xf32>
    %322 = arith.addf %318, %321 : vector<32x64xf32>
    %cst_85 = arith.constant 0.000000e+00 : f32
    %323 = vector.broadcast %cst_85 : f32 to vector<32x64xf32>
    %324 = arith.maximumf %322, %323 : vector<32x64xf32>
    %325 = arith.truncf %324 : vector<32x64xf32> to vector<32x64xbf16>
    %c1_86 = arith.constant 1 : index
    %c0_87 = arith.constant 0 : index
    %c0_88 = arith.constant 0 : index
    %326 = vector.load %arg5[%c1_86, %c0_87, %c0_88] : memref<2x64x32xbf16, #tpu.memory_space<vmem>>, vector<1x64x32xbf16>
    %327 = vector.shape_cast %326 : vector<1x64x32xbf16> to vector<64x32xbf16>
    %cst_89 = arith.constant dense<0.000000e+00> : vector<32x32xf32>
    %328 = tpu.matmul %325, %327, %cst_89 {dimension_numbers = #tpu.dot_dimension_numbers<[1], [0], [0], [1], [0, 0, 1, 1], [], []>} : vector<32x64xbf16>, vector<64x32xbf16>, vector<32x32xf32> -> vector<32x32xf32>
    %c1_90 = arith.constant 1 : index
    %c1_91 = arith.constant 1 : index
    %c64_92 = arith.constant 64 : index
    %329 = vector.load %arg6[%c1_90, %c1_91, %c64_92] : memref<2x2x128xf32, #tpu.memory_space<vmem>>, vector<1x1x32xf32>
    %330 = vector.shape_cast %329 : vector<1x1x32xf32> to vector<1x32xf32>
    %331 = vector.broadcast %330 : vector<1x32xf32> to vector<32x32xf32>
    %332 = arith.addf %328, %331 : vector<32x32xf32>
    %333 = arith.addf %314, %332 : vector<32x32xf32>
    %334 = arith.truncf %333 : vector<32x32xf32> to vector<32x32xbf16>
    %cst_93 = arith.constant dense<0.000000e+00> : vector<32x32xf32>
    %335 = tpu.matmul %66, %334, %cst_93 {dimension_numbers = #tpu.dot_dimension_numbers<[1], [0], [0], [1], [0, 0, 1, 1], [], []>} : vector<32x32xbf16>, vector<32x32xbf16>, vector<32x32xf32> -> vector<32x32xf32>
    %336 = arith.subf %333, %335 : vector<32x32xf32>
    %cst_94 = arith.constant dense<0.000000e+00> : vector<32xf32>
    %337 = vector.multi_reduction <add>, %336, %cst_94 [1] : vector<32x32xf32> to vector<32xf32>
    %338 = vector.shape_cast %337 : vector<32xf32> to vector<32x1xf32>
    %cst_95 = arith.constant 3.200000e+01 : f32
    %339 = vector.broadcast %cst_95 : f32 to vector<32x1xf32>
    %340 = arith.divf %338, %339 : vector<32x1xf32>
    %341 = vector.broadcast %340 : vector<32x1xf32> to vector<32x32xf32>
    %342 = arith.subf %336, %341 : vector<32x32xf32>
    %343 = arith.mulf %342, %342 : vector<32x32xf32>
    %cst_96 = arith.constant dense<0.000000e+00> : vector<32xf32>
    %344 = vector.multi_reduction <add>, %343, %cst_96 [1] : vector<32x32xf32> to vector<32xf32>
    %345 = vector.shape_cast %344 : vector<32xf32> to vector<32x1xf32>
    %cst_97 = arith.constant 3.200000e+01 : f32
    %346 = vector.broadcast %cst_97 : f32 to vector<32x1xf32>
    %347 = arith.divf %345, %346 : vector<32x1xf32>
    %cst_98 = arith.constant 9.99999974E-6 : f32
    %348 = vector.broadcast %cst_98 : f32 to vector<32x1xf32>
    %349 = arith.addf %347, %348 : vector<32x1xf32>
    %350 = math.rsqrt %349 : vector<32x1xf32>
    %351 = vector.broadcast %350 : vector<32x1xf32> to vector<32x32xf32>
    %352 = arith.mulf %342, %351 : vector<32x32xf32>
    %c0_99 = arith.constant 0 : index
    %c0_100 = arith.constant 0 : index
    %353 = vector.load %arg7[%c0_99, %c0_100] : memref<2x32xf32, #tpu.memory_space<vmem>>, vector<1x32xf32>
    %354 = vector.broadcast %353 : vector<1x32xf32> to vector<32x32xf32>
    %355 = arith.mulf %352, %354 : vector<32x32xf32>
    %c1_101 = arith.constant 1 : index
    %c0_102 = arith.constant 0 : index
    %356 = vector.load %arg7[%c1_101, %c0_102] : memref<2x32xf32, #tpu.memory_space<vmem>>, vector<1x32xf32>
    %357 = vector.broadcast %356 : vector<1x32xf32> to vector<32x32xf32>
    %358 = arith.addf %355, %357 : vector<32x32xf32>
    %359 = vector.shape_cast %358 : vector<32x32xf32> to vector<2x16x32xf32>
    %c0_103 = arith.constant 0 : index
    %c0_104 = arith.constant 0 : index
    %c0_105 = arith.constant 0 : index
    %360 = vector.load %arg8[%c0_103, %c0_104, %c0_105] : memref<2x16x32xf32, #tpu.memory_space<vmem>>, vector<2x16x32xf32>
    tpu.vector_store %arg8[%c0_103, %c0_104, %c0_105], %359 {strides = array<i32>} : memref<2x16x32xf32, #tpu.memory_space<vmem>>, vector<2x16x32xf32>,
    return
  }
  func.func @transform_0(%arg0: i32) -> (i32, i32, i32) {
    %c0_i32 = arith.constant 0 : i32
    %c0_i32_0 = arith.constant 0 : i32
    %c0_i32_1 = arith.constant 0 : i32
    return %arg0, %c0_i32, %c0_i32_0 : i32, i32, i32
  }
  func.func @transform_1(%arg0: i32) -> (i32, i32, i32) {
    %c0_i32 = arith.constant 0 : i32
    %c0_i32_0 = arith.constant 0 : i32
    %c0_i32_1 = arith.constant 0 : i32
    %c0_i32_2 = arith.constant 0 : i32
    return %c0_i32, %c0_i32_0, %c0_i32_1 : i32, i32, i32
  }
  func.func @transform_2(%arg0: i32) -> (i32, i32, i32) {
    %c0_i32 = arith.constant 0 : i32
    %c0_i32_0 = arith.constant 0 : i32
    %c0_i32_1 = arith.constant 0 : i32
    %c0_i32_2 = arith.constant 0 : i32
    return %c0_i32, %c0_i32_0, %c0_i32_1 : i32, i32, i32
  }
  func.func @transform_3(%arg0: i32) -> (i32, i32, i32) {
    %c0_i32 = arith.constant 0 : i32
    %c0_i32_0 = arith.constant 0 : i32
    %c0_i32_1 = arith.constant 0 : i32
    %c0_i32_2 = arith.constant 0 : i32
    return %c0_i32, %c0_i32_0, %c0_i32_1 : i32, i32, i32
  }
  func.func @transform_4(%arg0: i32) -> (i32, i32, i32) {
    %c0_i32 = arith.constant 0 : i32
    %c0_i32_0 = arith.constant 0 : i32
    %c0_i32_1 = arith.constant 0 : i32
    %c0_i32_2 = arith.constant 0 : i32
    return %c0_i32, %c0_i32_0, %c0_i32_1 : i32, i32, i32
  }
  func.func @transform_5(%arg0: i32) -> (i32, i32, i32) {
    %c0_i32 = arith.constant 0 : i32
    %c0_i32_0 = arith.constant 0 : i32
    %c0_i32_1 = arith.constant 0 : i32
    %c0_i32_2 = arith.constant 0 : i32
    return %c0_i32, %c0_i32_0, %c0_i32_1 : i32, i32, i32
  }
  func.func @transform_6(%arg0: i32) -> (i32, i32) {
    %c0_i32 = arith.constant 0 : i32
    %c0_i32_0 = arith.constant 0 : i32
    %c0_i32_1 = arith.constant 0 : i32
    return %c0_i32, %c0_i32_0 : i32, i32
  }
  func.func @transform_7(%arg0: i32) -> (i32, i32, i32) {
    %c0_i32 = arith.constant 0 : i32
    %c0_i32_0 = arith.constant 0 : i32
    %c0_i32_1 = arith.constant 0 : i32
    return %arg0, %c0_i32, %c0_i32_0 : i32, i32, i32
  }
  func.func @transform_8(%arg0: i32) -> (i32, i32, i32, i32, i32) {
    %c0_i32 = arith.constant 0 : i32
    %c0_i32_0 = arith.constant 0 : i32
    %c0_i32_1 = arith.constant 0 : i32
    %c0_i32_2 = arith.constant 0 : i32
    %c0_i32_3 = arith.constant 0 : i32
    return %arg0, %c0_i32, %c0_i32_0, %c0_i32_1, %c0_i32_2 : i32, i32, i32, i32, i32
  }
}

</mosaic_0001>

<bundles_post_ra>
// kernel: tpu_custom_call.1
= control target key start
LH: loop header
LB: loop body
LE: loop exit
PB: predicated region body
PF: predicated region fallthrough
CT: control target
= control target key end

     0   :  { %14 = vsyncpa [#allocation3], 0  ;;  %s5307_s0 = inlined_call_operand.vmem [shape: f32[2,16,32], index: 0, kind: input, shape index: {}]   ;;  %s5308_s1 = inlined_call_operand.vmem [shape: bf16[2,32,96], index: 1, kind: input, shape index: {}]   ;;  %s5309_s2 = inlined_call_operand.vmem [shape: bf16[2,32,32], index: 2, kind: input, shape index: {}]   ;;  %s5310_s3 = inlined_call_operand.hbm [shape: bf16[2,32,64], index: 3, kind: input, shape index: {}]   ;;  %s5311_s4 = inlined_call_operand.vmem [shape: bf16[2,64,32], index: 4, kind: input, shape index: {}]   ;;  %s5312_s5 = inlined_call_operand.vmem [shape: f32[2,2,128], index: 5, kind: input, shape index: {}]   ;;  %s5313_s6 = inlined_call_operand.vmem [shape: f32[2,32], index: 6, kind: input, shape index: {}]   ;;  %s5314_s7 = inlined_call_operand.hbm [shape: f32[2,16,32], index: 7, kind: output, shape index: {0}]   ;;  %s5315_s8 = inlined_call_operand.hbm [shape: f32[2,2,4,16,16], index: 8, kind: output, shape index: {1}]  }
   0x1   :  { %15 = vsyncpa [#allocation4], 0 }
   0x2   :  { %16 = vsyncpa [#allocation7], 0  ;;  %s4300_s27 = smov [#allocation2]   ;;  %s4228_s9 = scalar_lea.hbm %s5310_s3, 512 }
   0x3   :  { %s28_s28 = sshll.u32 %s4300_s27, 4  ;;  %p4229_p0 = scmp.ne.s32.totalorder %s5310_s3, %s4228_s9  ;;  %s29_s28 = int_to_ptr.vmem [resolvable:$true] %s28_s28 }
   0x4   :  { %p4232_p1 = scmp.lt.u32.totalorder %s4228_s9, %s5310_s3 }
   0x6   :  { %p4234_p2 = pnand %p4232_p1, %p4229_p0 }
   0x8   :  { %4237 = shalt.err (!%p4234_p2)
}
   0x9   :  { %s4238_s14 = scalar_lea.vmem %s29_s28, 512  ;;  %p4243_p4 = scmp.lt.s32.totalorder %s29_s28, %s29_s28 }
   0xa   :  { %p4239_p3 = scmp.ne.s32.totalorder %s29_s28, %s4238_s14  ;;  %p4244_p5 = scmp.lt.s32.totalorder %s4238_s14, %s4238_s14 }
   0xc   :  { %p4245_p6 = por %p4244_p5, %p4243_p4 }
   0xe   :  { %p4246_p7 = pnand %p4245_p6, %p4239_p3 }
  0x10   :  { %4249 = shalt.err (!%p4246_p7)
}
  0x11   :  { %s4301_s15 = smov 64   ;;  %s4302_s16 = smov 4  }
  0x12   :  { %34 = dma.hbm_to_vmem [thread:$0]  %s5310_s3, 512, %s29_s28, [#allocation3], %s4301_s15, %s4301_s15, %s4302_s16  }
  0x13   :  { %4294 = dma.done.wait [#allocation3], 512  }
  0x14   :  { %4295 = vsyncadd [#allocation3], 4294966784  ;;  %v4068_v0 = vld [vmem:[%s5308_s1] sm:$0xff]   ;;  %v4069_v1 = vld [vmem:[%s5308_s1 + $0x8] sm:$0xff]   ;;  %vm237_vm0 = vcmask 261120   ;;  %v4303_v21 = vmov 0.0  }
  0x15   :  { %3636 = vmatprep.subr.bf16.mxu0 %v4068_v0  ;;  %v45_v2 = vld [vmem:[%s5307_s0] sm:$0xff]  ;;  %v46_v3 = vld [vmem:[%s5307_s0 + $0x8] sm:$0xff]  ;;  %v47_v4 = vld [vmem:[%s5307_s0 + $0x10] sm:$0xff]  ;;  %3644 = vmatprep.subr.bf16.mxu1 %v4303_v21  ;;  %s4304_s10 = smov 104   ;;  %s4305_s11 = smov 120   ;;  %vm4307_vm1 = vmmov 0  }
  0x16   :  { %3637 = vmatpush3.bf16.msra.mxu0 %v4068_v0  ;;  %v214_v5 = vpack.c.bf16 %v46_v3, %v45_v2  ;;  %v48_v6 = vld [vmem:[%s5307_s0 + $0x18] sm:$0xff]  ;;  %v4398_v9 = vld [vmem:[%s5312_s5] ss:$0 sm:$0xff]  ;;  %s4306_s12 = smov 112   ;;  %3646 = vmatprep.mubr.msk.bf16.mxu1 %vm4307_vm1, %v4303_v21  ;;  %s4308_s13 = smov 96   ;;  %vm344_vm2 = vcmask 64512  }
  0x17   :  { %3638 = vmatprep.subr.bf16.mxu0 %v4069_v1  ;;  %v215_v7 = vpack.c.bf16 %v48_v6, %v47_v4  ;;  %vm742_vm3 = vcmask 130048   ;;  %s4309_s14 = smov 8   ;;  %s4310_s16 = smov 16   ;;  %vm1347_vm4 = vcmask 195584  }
  0x18   :  { %3640 = vmatprep.mubr.msk.bf16.mxu0 %vm237_vm0, %v214_v5  ;;  %s4311_s19 = smov 24   ;;  %s4312_s22 = smov 32  }
  0x1a   :  { %3639 = vmatpush3.bf16.msra.mxu0 %v4069_v1 }
  0x1b   :  { %3650 = vmatprep.subr.bf16.mxu0 %v4303_v21 }
  0x1d   :  { %3641 = vmatmul.mubr.msk.bf16.vlgmr.msra.gmra.mrb[0].mxu0 %vm237_vm0, %v215_v7 }
  0x1e   :  { %3652 = vmatprep.mubr.msk.bf16.mxu0 %vm4307_vm1, %v4303_v21 }
  0xf0   :  { %v3642_v8 = vpop.f32.mrb[0].mxu0 }
  0xf1   :  { %v278_v10 = vpop.f32.mrb[1].mxu0  ;;  %v287_v12 = vadd.f32 %v3642_v8, %v4398_v9 }
  0xf2   :  { %v3643_v11 = vpop.f32.mrb[2].mxu0  ;;  %v279_v15 = vadd.f32 %v4398_v9, %v278_v10 }
  0xf3   :  { %v290_v13 = vadd.f32 %v3643_v11, %v4398_v9  ;;  %v281_v14 = vpop.f32.mrb[3].mxu0 }
  0xf4   :  { %v282_v16 = vadd.f32 %v4398_v9, %v281_v14 }
  0xf5   :  { %v3963_v17 = vpack.i.bf16 %v290_v13, %v287_v12  ;;  %v4404_v18 = vpack.c.bf16 %v290_v13, %v287_v12 }
  0xf6   :  { %v3958_v19 = vpack.i.bf16 %v282_v16, %v279_v15  ;;  %v333_v20 = vpack.c.bf16 %v282_v16, %v279_v15 }
  0xf8   :  { %3959 = vrot.lane.b32.xlu1 %v3958_v19, %s4304_s10  ;;  %3949 = vrot.lane.b32.xlu0 %v3958_v19, %s4305_s11 }
  0xfc   :  { %3964 = vrot.lane.b32.xlu1 %v3963_v17, %s4305_s11  ;;  %3954 = vrot.lane.b32.xlu0 %v3958_v19, %s4306_s12 }
 0x100   :  { %3974 = vrot.lane.b32.xlu1 %v3963_v17, %s4304_s10  ;;  %3969 = vrot.lane.b32.xlu0 %v3963_v17, %s4306_s12 }
 0x104   :  { %342 = vrot.lane.b32.xlu0 %v333_v20, %s4308_s13 }
 0x16a   :  { %v3960_v22 = vpop.permute.xlu1 %3959  ;;  %v3950_v23 = vpop.permute.xlu0 %3949 }
 0x16b   :  { %v3952_v24 = vunpack.i.h.bf16 %v3950_v23  ;;  %v3951_v25 = vunpack.i.l.bf16 %v3950_v23  ;;  %v3962_v26 = vunpack.i.h.bf16 %v3960_v22  ;;  %v3961_v27 = vunpack.i.l.bf16 %v3960_v22 }
 0x16d   :  { %v4419_v28 = vpack.c.bf16 %v3952_v24, %v3951_v25  ;;  %v4423_v35 = vpack.c.bf16 %v3962_v26, %v3961_v27 }
 0x16e   :  { %v3965_v29 = vpop.permute.xlu1 %3964  ;;  %v3955_v30 = vpop.permute.xlu0 %3954 }
 0x16f   :  { %v3957_v31 = vunpack.i.h.bf16 %v3955_v30  ;;  %v3956_v32 = vunpack.i.l.bf16 %v3955_v30  ;;  %393 = vrot.lane.b32.xlu1 %v4419_v28, %s4308_s13  ;;  %v3967_v33 = vunpack.i.h.bf16 %v3965_v29  ;;  %v3966_v34 = vunpack.i.l.bf16 %v3965_v29 }
 0x171   :  { %v4425_v36 = vpack.c.bf16 %v3957_v31, %v3956_v32  ;;  %v4431_v39 = vpack.c.bf16 %v3967_v33, %v3966_v34 }
 0x172   :  { %v3975_v37 = vpop.permute.xlu1 %3974  ;;  %v3970_v38 = vpop.permute.xlu0 %3969 }
 0x173   :  { %493 = vrot.lane.b32.xlu1 %v4423_v35, %s4308_s13  ;;  %443 = vrot.lane.b32.xlu0 %v4425_v36, %s4308_s13  ;;  %v3977_v40 = vunpack.i.h.bf16 %v3975_v37  ;;  %v3976_v41 = vunpack.i.l.bf16 %v3975_v37  ;;  %v3972_v42 = vunpack.i.h.bf16 %v3970_v38  ;;  %v3971_v43 = vunpack.i.l.bf16 %v3970_v38 }
 0x175   :  { %v4438_v46 = vpack.c.bf16 %v3977_v40, %v3976_v41  ;;  %v4440_v47 = vpack.c.bf16 %v3972_v42, %v3971_v43 }
 0x176   :  { %v343_v44 = vpop.permute.xlu0 %342 }
 0x177   :  { %593 = vrot.lane.b32.xlu1 %v4431_v39, %s4308_s13  ;;  %543 = vrot.lane.b32.xlu0 %v4404_v18, %s4308_s13  ;;  %v349_v45 = vsel %vm344_vm2, %v343_v44, 0 }
 0x178   :  { %3645 = vmatpush3.bf16.xpose.msra.mxu1 %v349_v45 }
 0x179   :  { %3656 = vmatprep.subr.bf16.mxu1 %v4303_v21 }
 0x17b   :  { %693 = vrot.lane.b32.xlu1 %v4438_v46, %s4308_s13  ;;  %643 = vrot.lane.b32.xlu0 %v4440_v47, %s4308_s13 }
 0x17f   :  { %943 = vrot.lane.b32.xlu1 %v333_v20, %s4301_s15  ;;  %3647 = vmatmul.mubr.msk.bf16.vlgmr.msra.gmra.mrb[0].mxu1 %vm344_vm2, %v333_v20 }
 0x180   :  { %3658 = vmatprep.mubr.msk.bf16.mxu1 %vm4307_vm1, %v4303_v21 }
 0x1e1   :  { %v394_v48 = vpop.permute.xlu1 %393 }
 0x1e2   :  { %v399_v49 = vsel %vm344_vm2, %v394_v48, 0 }
 0x1e3   :  { %3651 = vmatpush3.bf16.xpose.msra.mxu0 %v399_v49 }
 0x1e4   :  { %3662 = vmatprep.subr.bf16.mxu0 %v4303_v21 }
 0x1e5   :  { %v444_v50 = vpop.permute.xlu0 %443  ;;  %v494_v52 = vpop.permute.xlu1 %493 }
 0x1e6   :  { %v449_v51 = vsel %vm344_vm2, %v444_v50, 0  ;;  %v499_v53 = vsel %vm344_vm2, %v494_v52, 0 }
 0x1e7   :  { %3657 = vmatpush3.bf16.xpose.msra.mxu1 %v449_v51 }
 0x1e8   :  { %3668 = vmatprep.subr.bf16.mxu1 %v4303_v21 }
 0x1e9   :  { %v544_v54 = vpop.permute.xlu0 %543  ;;  %v594_v56 = vpop.permute.xlu1 %593 }
 0x1ea   :  { %3653 = vmatmul.mubr.msk.bf16.vlgmr.msra.gmra.mrb[4].mxu0 %vm344_vm2, %v4419_v28  ;;  %v549_v55 = vsel %vm344_vm2, %v544_v54, 0  ;;  %v599_v57 = vsel %vm344_vm2, %v594_v56, 0 }
 0x1eb   :  { %3663 = vmatpush3.bf16.xpose.msra.mxu0 %v499_v53  ;;  %3664 = vmatprep.mubr.msk.bf16.mxu0 %vm4307_vm1, %v4303_v21 }
 0x1ec   :  { %3674 = vmatprep.subr.bf16.mxu0 %v4303_v21 }
 0x1ed   :  { %v644_v58 = vpop.permute.xlu0 %643  ;;  %v694_v60 = vpop.permute.xlu1 %693 }
 0x1ee   :  { %3659 = vmatmul.mubr.msk.bf16.vlgmr.msra.gmra.mrb[4].mxu1 %vm344_vm2, %v4425_v36  ;;  %v649_v59 = vsel %vm344_vm2, %v644_v58, 0  ;;  %v699_v61 = vsel %vm344_vm2, %v694_v60, 0 }
 0x1ef   :  { %3669 = vmatpush3.bf16.xpose.msra.mxu1 %v549_v55  ;;  %3670 = vmatprep.mubr.msk.bf16.mxu1 %vm4307_vm1, %v4303_v21 }
 0x1f0   :  { %3680 = vmatprep.subr.bf16.mxu1 %v4303_v21 }
 0x1f1   :  { %v944_v62 = vpop.permute.xlu1 %943 }
 0x1f2   :  { %3665 = vmatmul.mubr.msk.bf16.vlgmr.msra.gmra.mrb[8].mxu0 %vm344_vm2, %v4423_v35 }
 0x1f3   :  { %3675 = vmatpush3.bf16.xpose.msra.mxu0 %v599_v57  ;;  %3676 = vmatprep.mubr.msk.bf16.mxu0 %vm4307_vm1, %v4303_v21 }
 0x1f4   :  { %3686 = vmatprep.subr.bf16.mxu0 %v4303_v21 }
 0x1f6   :  { %3671 = vmatmul.mubr.msk.bf16.vlgmr.msra.gmra.mrb[8].mxu1 %vm344_vm2, %v4404_v18 }
 0x1f7   :  { %3681 = vmatpush3.bf16.xpose.msra.mxu1 %v649_v59  ;;  %3682 = vmatprep.mubr.msk.bf16.mxu1 %vm4307_vm1, %v4303_v21 }
 0x1f8   :  { %3692 = vmatprep.subr.bf16.mxu1 %v4303_v21 }
 0x1fa   :  { %3677 = vmatmul.mubr.msk.bf16.vlgmr.msra.gmra.mrb[12].mxu0 %vm344_vm2, %v4431_v39 }
 0x1fb   :  { %3687 = vmatpush3.bf16.xpose.msra.mxu0 %v699_v61  ;;  %3688 = vmatprep.mubr.msk.bf16.mxu0 %vm4307_vm1, %v4303_v21 }
 0x1fc   :  { %3698 = vmatprep.subr.bf16.mxu0 %v4303_v21 }
 0x1fe   :  { %3683 = vmatmul.mubr.msk.bf16.vlgmr.msra.gmra.mrb[12].mxu1 %vm344_vm2, %v4440_v47 }
 0x1ff   :  { %3693 = vmatpush3.bf16.msra.mxu1 %v944_v62  ;;  %3694 = vmatprep.mubr.msk.bf16.mxu1 %vm4307_vm1, %v4303_v21 }
 0x200   :  { %3704 = vmatprep.subr.bf16.mxu1 %v4303_v21 }
 0x202   :  { %3689 = vmatmul.mubr.msk.bf16.vlgmr.msra.gmra.mrb[16].mxu0 %vm344_vm2, %v4438_v46 }
 0x203   :  { %3700 = vmatprep.mubr.msk.bf16.mxu0 %vm4307_vm1, %v4303_v21 }
 0x252   :  { %v4494_v63 = vpop.f32.mrb[0].mxu1 }
 0x253   :  { %v3648_v0 = vpop.f32.mrb[1].mxu1  ;;  %v743_v1 = vsel %vm742_vm3, %v4494_v63, -inf }
 0x254   :  { %744 = vmax.xlane.f32.xlu0 %v743_v1  ;;  %v4498_v2 = vpop.f32.mrb[2].mxu1 }
 0x255   :  { %v3649_v3 = vpop.f32.mrb[3].mxu1  ;;  %v746_v4 = vsel %vm742_vm3, %v4498_v2, -inf }
 0x256   :  { %747 = vmax.xlane.f32.xlu1 %v746_v4 }
 0x2bd   :  { %v4502_v5 = vpop.f32.mrb[4].mxu0 }
 0x2be   :  { %v3654_v6 = vpop.f32.mrb[5].mxu0  ;;  %v749_v7 = vsel %vm742_vm3, %v4502_v5, -inf }
 0x2bf   :  { %v4506_v8 = vpop.f32.mrb[6].mxu0  ;;  %750 = vmax.xlane.f32.xlu0 %v749_v7 }
 0x2c0   :  { %v3655_v10 = vpop.f32.mrb[7].mxu0  ;;  %v752_v13 = vsel %vm742_vm3, %v4506_v8, -inf }
 0x2c1   :  { %v4508_v11 = vpop.f32.mrb[4].mxu1 }
 0x2c2   :  { %v3660_v12 = vpop.f32.mrb[5].mxu1  ;;  %v755_v14 = vsel %vm742_vm3, %v4508_v11, -inf }
 0x2c3   :  { %753 = vmax.xlane.f32.xlu0 %v752_v13  ;;  %756 = vmax.xlane.f32.xlu1 %v755_v14  ;;  %v4514_v15 = vpop.f32.mrb[6].mxu1 }
 0x2c4   :  { %v3661_v16 = vpop.f32.mrb[7].mxu1  ;;  %v758_v22 = vsel %vm742_vm3, %v4514_v15, -inf }
 0x2c5   :  { %v4516_v17 = vpop.f32.mrb[8].mxu0 }
 0x2c6   :  { %v3666_v19 = vpop.f32.mrb[9].mxu0  ;;  %v761_v20 = vsel %vm742_vm3, %v4516_v17, -inf }
 0x2c7   :  { %v4522_v23 = vpop.f32.mrb[10].mxu0  ;;  %762 = vmax.xlane.f32.xlu1 %v761_v20  ;;  %759 = vmax.xlane.f32.xlu0 %v758_v22 }
 0x2c8   :  { %v3667_v24 = vpop.f32.mrb[11].mxu0  ;;  %v764_v27 = vsel %vm742_vm3, %v4522_v23, -inf }
 0x2c9   :  { %v4524_v25 = vpop.f32.mrb[8].mxu1 }
 0x2ca   :  { %v3672_v26 = vpop.f32.mrb[9].mxu1  ;;  %v767_v29 = vsel %vm742_vm3, %v4524_v25, -inf }
 0x2cb   :  { %765 = vmax.xlane.f32.xlu0 %v764_v27  ;;  %768 = vmax.xlane.f32.xlu1 %v767_v29  ;;  %v4530_v30 = vpop.f32.mrb[10].mxu1 }
 0x2cc   :  { %v3673_v31 = vpop.f32.mrb[11].mxu1  ;;  %v770_v37 = vsel %vm742_vm3, %v4530_v30, -inf }
 0x2cd   :  { %v4532_v32 = vpop.f32.mrb[12].mxu0 }
 0x2ce   :  { %v3678_v33 = vpop.f32.mrb[13].mxu0  ;;  %v773_v34 = vsel %vm742_vm3, %v4532_v32, -inf }
 0x2cf   :  { %v4538_v38 = vpop.f32.mrb[14].mxu0  ;;  %774 = vmax.xlane.f32.xlu1 %v773_v34  ;;  %771 = vmax.xlane.f32.xlu0 %v770_v37 }
 0x2d0   :  { %v3679_v40 = vpop.f32.mrb[15].mxu0  ;;  %v776_v43 = vsel %vm742_vm3, %v4538_v38, -inf }
 0x2d1   :  { %v4540_v41 = vpop.f32.mrb[12].mxu1 }
 0x2d2   :  { %v3684_v42 = vpop.f32.mrb[13].mxu1  ;;  %v779_v44 = vsel %vm742_vm3, %v4540_v41, -inf }
 0x2d3   :  { %777 = vmax.xlane.f32.xlu0 %v776_v43  ;;  %780 = vmax.xlane.f32.xlu1 %v779_v44  ;;  %v4546_v45 = vpop.f32.mrb[14].mxu1 }
 0x2d4   :  { %v3685_v48 = vpop.f32.mrb[15].mxu1  ;;  %v782_v52 = vsel %vm742_vm3, %v4546_v45, -inf }
 0x2d5   :  { %v4548_v49 = vpop.f32.mrb[16].mxu0 }
 0x2d6   :  { %v3690_v50 = vpop.f32.mrb[17].mxu0  ;;  %v785_v51 = vsel %vm742_vm3, %v4548_v49, -inf }
 0x2d7   :  { %v4554_v53 = vpop.f32.mrb[18].mxu0  ;;  %786 = vmax.xlane.f32.xlu1 %v785_v51  ;;  %783 = vmax.xlane.f32.xlu0 %v782_v52 }
 0x2d8   :  { %v3691_v54 = vpop.f32.mrb[19].mxu0  ;;  %v788_v55 = vsel %vm742_vm3, %v4554_v53, -inf }
 0x2db   :  { %789 = vmax.xlane.f32.xlu0 %v788_v55 }
 0x2e1   :  { %v745_v56 = vpop.xlane.xlu0 %744 }
 0x2e2   :  { %v791_v58 = vsub.f32 %v4494_v63, %v745_v56 }
 0x2e3   :  { %v748_v57 = vpop.xlane.xlu1 %747 }
 0x2e4   :  { %v792_v59 = vsub.f32 %v4498_v2, %v748_v57  ;;  %v807_v60 = vmul.f32 1.442695, %v791_v58 }
 0x2e6   :  { %4088 = vpow2.f32 %v807_v60 }
 0x2e8   :  { %1037 = vrot.lane.b32.xlu1 %v4425_v36, %s4301_s15  ;;  %v809_v36 = vmul.f32 1.442695, %v792_v59 }
 0x2ea   :  { %4090 = vpow2.f32 %v809_v36 }
 0x2ec   :  { %1084 = vrot.lane.b32.xlu1 %v4423_v35, %s4301_s15 }
 0x2f0   :  { %1178 = vrot.lane.b32.xlu1 %v4431_v39, %s4301_s15  ;;  %v4570_v35 = vpop.eup %4088 }
 0x2f1   :  { %990 = vrot.lane.b32.xlu0 %v4419_v28, %s4301_s15 }
 0x2f4   :  { %v4572_v61 = vpop.eup %4090 }
 0x2f5   :  { %1131 = vrot.lane.b32.xlu0 %v4404_v18, %s4301_s15  ;;  %v842_v28 = vsel %vm742_vm3, %v4572_v61, 0.0  ;;  %v839_v18 = vsel %vm742_vm3, %v4570_v35, 0.0 }
 0x314   :  { %843 = vadd.xlane.f32.xlu0 %v842_v28  ;;  %840 = vadd.xlane.f32.xlu1 %v839_v18 }
 0x34c   :  { %v751_v39 = vpop.xlane.xlu0 %750 }
 0x34d   :  { %v793_v62 = vsub.f32 %v4502_v5, %v751_v39 }
 0x34f   :  { %v811_v63 = vmul.f32 1.442695, %v793_v62 }
 0x350   :  { %v757_v0 = vpop.xlane.xlu1 %756  ;;  %v754_v1 = vpop.xlane.xlu0 %753 }
 0x351   :  { %4092 = vpow2.f32 %v811_v63  ;;  %v795_v2 = vsub.f32 %v4508_v11, %v757_v0  ;;  %v794_v3 = vsub.f32 %v4506_v8, %v754_v1 }
 0x353   :  { %v815_v4 = vmul.f32 1.442695, %v795_v2  ;;  %v813_v6 = vmul.f32 1.442695, %v794_v3 }
 0x354   :  { %v763_v7 = vpop.xlane.xlu1 %762  ;;  %v760_v10 = vpop.xlane.xlu0 %759 }
 0x355   :  { %4094 = vpow2.f32 %v815_v4  ;;  %v797_v12 = vsub.f32 %v4516_v17, %v763_v7  ;;  %v796_v13 = vsub.f32 %v4514_v15, %v760_v10 }
 0x356   :  { %4096 = vpow2.f32 %v813_v6 }
 0x357   :  { %v819_v14 = vmul.f32 1.442695, %v797_v12  ;;  %v817_v5 = vmul.f32 1.442695, %v796_v13 }
 0x358   :  { %v769_v16 = vpop.xlane.xlu1 %768  ;;  %v766_v19 = vpop.xlane.xlu0 %765 }
 0x359   :  { %4098 = vpow2.f32 %v819_v14  ;;  %v799_v20 = vsub.f32 %v4524_v25, %v769_v16  ;;  %v798_v11 = vsub.f32 %v4522_v23, %v766_v19 }
 0x35a   :  { %4100 = vpow2.f32 %v817_v5 }
 0x35b   :  { %v4585_v8 = vpop.eup %4092  ;;  %v823_v22 = vmul.f32 1.442695, %v799_v20  ;;  %v821_v24 = vmul.f32 1.442695, %v798_v11 }
 0x35c   :  { %v775_v26 = vpop.xlane.xlu1 %774  ;;  %v772_v27 = vpop.xlane.xlu0 %771  ;;  %v845_v15 = vsel %vm742_vm3, %v4585_v8, 0.0 }
 0x35d   :  { %4102 = vpow2.f32 %v823_v22  ;;  %v801_v17 = vsub.f32 %v4532_v32, %v775_v26  ;;  %v800_v29 = vsub.f32 %v4530_v30, %v772_v27  ;;  %846 = vadd.xlane.f32.xlu1 %v845_v15 }
 0x35e   :  { %4104 = vpow2.f32 %v821_v24 }
 0x35f   :  { %v4591_v25 = vpop.eup %4094  ;;  %v827_v23 = vmul.f32 1.442695, %v801_v17  ;;  %v825_v31 = vmul.f32 1.442695, %v800_v29 }
 0x360   :  { %v4593_v33 = vpop.eup %4096  ;;  %v781_v34 = vpop.xlane.xlu1 %780  ;;  %v851_v40 = vsel %vm742_vm3, %v4591_v25, 0.0 }
 0x361   :  { %v778_v37 = vpop.xlane.xlu0 %777  ;;  %4106 = vpow2.f32 %v827_v23  ;;  %v803_v42 = vsub.f32 %v4540_v41, %v781_v34  ;;  %852 = vadd.xlane.f32.xlu1 %v851_v40  ;;  %v848_v30 = vsel %vm742_vm3, %v4593_v33, 0.0 }
 0x362   :  { %v802_v32 = vsub.f32 %v4538_v38, %v778_v37  ;;  %4108 = vpow2.f32 %v825_v31  ;;  %849 = vadd.xlane.f32.xlu0 %v848_v30 }
 0x363   :  { %v4601_v43 = vpop.eup %4098  ;;  %v831_v44 = vmul.f32 1.442695, %v803_v42 }
 0x364   :  { %v829_v48 = vmul.f32 1.442695, %v802_v32  ;;  %v4603_v50 = vpop.eup %4100  ;;  %v787_v51 = vpop.xlane.xlu1 %786  ;;  %v857_v54 = vsel %vm742_vm3, %v4601_v43, 0.0 }
 0x365   :  { %v784_v52 = vpop.xlane.xlu0 %783  ;;  %4110 = vpow2.f32 %v831_v44  ;;  %v805_v38 = vsub.f32 %v4548_v49, %v787_v51  ;;  %858 = vadd.xlane.f32.xlu1 %v857_v54  ;;  %v854_v55 = vsel %vm742_vm3, %v4603_v50, 0.0 }
 0x366   :  { %v804_v41 = vsub.f32 %v4546_v45, %v784_v52  ;;  %4112 = vpow2.f32 %v829_v48  ;;  %855 = vadd.xlane.f32.xlu0 %v854_v55 }
 0x367   :  { %v4611_v56 = vpop.eup %4102  ;;  %v835_v57 = vmul.f32 1.442695, %v805_v38 }
 0x368   :  { %v833_v58 = vmul.f32 1.442695, %v804_v41  ;;  %v4613_v59 = vpop.eup %4104  ;;  %v863_v36 = vsel %vm742_vm3, %v4611_v56, 0.0  ;;  %v1038_v14 = vpop.permute.xlu1 %1037 }
 0x369   :  { %v790_v60 = vpop.xlane.xlu0 %789  ;;  %4114 = vpow2.f32 %v835_v57  ;;  %864 = vadd.xlane.f32.xlu1 %v863_v36  ;;  %v860_v45 = vsel %vm742_vm3, %v4613_v59, 0.0 }
 0x36a   :  { %v806_v49 = vsub.f32 %v4554_v53, %v790_v60  ;;  %4116 = vpow2.f32 %v833_v58  ;;  %861 = vadd.xlane.f32.xlu0 %v860_v45 }
 0x36b   :  { %v4620_v28 = vpop.eup %4106 }
 0x36c   :  { %v837_v18 = vmul.f32 1.442695, %v806_v49  ;;  %v4622_v39 = vpop.eup %4108  ;;  %v869_v63 = vsel %vm742_vm3, %v4620_v28, 0.0  ;;  %v1085_v5 = vpop.permute.xlu1 %1084 }
 0x36d   :  { %v991_v62 = vpop.permute.xlu0 %990  ;;  %870 = vadd.xlane.f32.xlu1 %v869_v63  ;;  %v866_v53 = vsel %vm742_vm3, %v4622_v39, 0.0 }
 0x36e   :  { %4118 = vpow2.f32 %v837_v18  ;;  %3699 = vmatpush3.bf16.msra.mxu0 %v991_v62  ;;  %867 = vadd.xlane.f32.xlu0 %v866_v53 }
 0x36f   :  { %3710 = vmatprep.subr.bf16.mxu0 %v4303_v21  ;;  %v4629_v0 = vpop.eup %4110 }
 0x370   :  { %v4631_v1 = vpop.eup %4112  ;;  %v875_v2 = vsel %vm742_vm3, %v4629_v0, 0.0  ;;  %v4653_v16 = vpop.permute.xlu1 %1178 }
 0x371   :  { %876 = vadd.xlane.f32.xlu1 %v875_v2  ;;  %v872_v3 = vsel %vm742_vm3, %v4631_v1, 0.0  ;;  %v4655_v19 = vpop.permute.xlu0 %1131 }
 0x372   :  { %873 = vadd.xlane.f32.xlu0 %v872_v3 }
 0x373   :  { %v4637_v4 = vpop.eup %4114 }
 0x374   :  { %v4639_v6 = vpop.eup %4116  ;;  %v881_v7 = vsel %vm742_vm3, %v4637_v4, 0.0 }
 0x375   :  { %882 = vadd.xlane.f32.xlu1 %v881_v7  ;;  %v878_v10 = vsel %vm742_vm3, %v4639_v6, 0.0 }
 0x376   :  { %879 = vadd.xlane.f32.xlu0 %v878_v10 }
 0x378   :  { %v4645_v12 = vpop.eup %4118 }
 0x379   :  { %v884_v13 = vsel %vm742_vm3, %v4645_v12, 0.0 }
 0x37a   :  { %885 = vadd.xlane.f32.xlu0 %v884_v13 }
 0x386   :  { %1272 = vrot.lane.b32.xlu1 %v4438_v46, %s4301_s15 }
 0x390   :  { %1225 = vrot.lane.b32.xlu0 %v4440_v47, %s4301_s15 }
 0x3a1   :  { %v841_v20 = vpop.xlane.xlu1 %840  ;;  %v844_v11 = vpop.xlane.xlu0 %843 }
 0x3a2   :  { %4120 = vrcp.f32 %v841_v20 }
 0x3a3   :  { %4122 = vrcp.f32 %v844_v11 }
 0x3ac   :  { %v4121_v22 = vpop.eup %4120 }
 0x3ad   :  { %v4123_v24 = vpop.eup %4122  ;;  %v903_v26 = vmul.f32 %v4121_v22, %v4570_v35 }
 0x3ae   :  { %v904_v27 = vmul.f32 %v4123_v24, %v4572_v61 }
 0x3af   :  { %919 = vst.msk [vmem:[#allocation6] sm:$0xff] %vm742_vm3, %v903_v26 }
 0x3b0   :  { %920 = vst.msk [vmem:[#allocation6 + $0x8] sm:$0xff] %vm742_vm3, %v904_v27  ;;  %v935_v46 = vpack.c.bf16 %v904_v27, %v903_v26 }
 0x3b2   :  { %3695 = vmatmul.mubr.msk.bf16.vlgmr.msra.gmra.mrb[16].mxu1 %vm742_vm3, %v935_v46 }
 0x3b3   :  { %3705 = vmatpush3.bf16.msra.mxu1 %v1038_v14  ;;  %3706 = vmatprep.mubr.msk.bf16.mxu1 %vm4307_vm1, %v4303_v21 }
 0x3b4   :  { %3716 = vmatprep.subr.bf16.mxu1 %v4303_v21 }
 0x3ea   :  { %v847_v47 = vpop.xlane.xlu1 %846 }
 0x3eb   :  { %4124 = vrcp.f32 %v847_v47 }
 0x3ee   :  { %v853_v15 = vpop.xlane.xlu1 %852 }
 0x3ef   :  { %4126 = vrcp.f32 %v853_v15  ;;  %v850_v35 = vpop.xlane.xlu0 %849 }
 0x3f0   :  { %4128 = vrcp.f32 %v850_v35 }
 0x3f2   :  { %v859_v61 = vpop.xlane.xlu1 %858 }
 0x3f3   :  { %4130 = vrcp.f32 %v859_v61  ;;  %v856_v17 = vpop.xlane.xlu0 %855 }
 0x3f4   :  { %4132 = vrcp.f32 %v856_v17 }
 0x3f5   :  { %v4125_v29 = vpop.eup %4124 }
 0x3f6   :  { %v905_v23 = vmul.f32 %v4125_v29, %v4585_v8  ;;  %v865_v31 = vpop.xlane.xlu1 %864 }
 0x3f7   :  { %4134 = vrcp.f32 %v865_v31  ;;  %v862_v34 = vpop.xlane.xlu0 %861 }
 0x3f8   :  { %921 = vst.msk [vmem:[#allocation6 + $0x10] sm:$0xff] %vm742_vm3, %v905_v23  ;;  %4136 = vrcp.f32 %v862_v34 }
 0x3f9   :  { %v4127_v37 = vpop.eup %4126 }
 0x3fa   :  { %v4129_v40 = vpop.eup %4128  ;;  %v907_v42 = vmul.f32 %v4127_v37, %v4591_v25  ;;  %v871_v32 = vpop.xlane.xlu1 %870  ;;  %v4070_v37 = vld [vmem:[%s5309_s2] sm:$0xff]  }
 0x3fb   :  { %v906_v30 = vmul.f32 %v4129_v40, %v4593_v33  ;;  %4138 = vrcp.f32 %v871_v32  ;;  %v868_v44 = vpop.xlane.xlu0 %867 }
 0x3fc   :  { %923 = vst.msk [vmem:[#allocation6 + $0x20] sm:$0xff] %vm742_vm3, %v907_v42  ;;  %4140 = vrcp.f32 %v868_v44  ;;  %v4071_v44 = vld [vmem:[%s5309_s2 + $0x8] sm:$0xff]  }
 0x3fd   :  { %v4131_v48 = vpop.eup %4130  ;;  %922 = vst.msk [vmem:[#allocation6 + $0x18] sm:$0xff] %vm742_vm3, %v906_v30  ;;  %v936_v8 = vpack.c.bf16 %v906_v30, %v905_v23 }
 0x3fe   :  { %v4133_v51 = vpop.eup %4132  ;;  %v909_v52 = vmul.f32 %v4131_v48, %v4601_v43  ;;  %v877_v54 = vpop.xlane.xlu1 %876 }
 0x3ff   :  { %v908_v38 = vmul.f32 %v4133_v51, %v4603_v50  ;;  %4142 = vrcp.f32 %v877_v54  ;;  %3701 = vmatmul.mubr.msk.bf16.vlgmr.msra.gmra.mrb[20].mxu0 %vm742_vm3, %v936_v8  ;;  %v874_v25 = vpop.xlane.xlu0 %873 }
 0x400   :  { %925 = vst.msk [vmem:[#allocation6 + $0x30] sm:$0xff] %vm742_vm3, %v909_v52  ;;  %3711 = vmatpush3.bf16.msra.mxu0 %v1085_v5  ;;  %4144 = vrcp.f32 %v874_v25  ;;  %3712 = vmatprep.mubr.msk.bf16.mxu0 %vm4307_vm1, %v4303_v21 }
 0x401   :  { %v4135_v33 = vpop.eup %4134  ;;  %924 = vst.msk [vmem:[#allocation6 + $0x28] sm:$0xff] %vm742_vm3, %v908_v38  ;;  %v937_v41 = vpack.c.bf16 %v908_v38, %v907_v42  ;;  %3722 = vmatprep.subr.bf16.mxu0 %v4303_v21 }
 0x402   :  { %v4137_v43 = vpop.eup %4136  ;;  %v911_v50 = vmul.f32 %v4135_v33, %v4611_v56  ;;  %v883_v55 = vpop.xlane.xlu1 %882 }
 0x403   :  { %v910_v57 = vmul.f32 %v4137_v43, %v4613_v59  ;;  %4146 = vrcp.f32 %v883_v55  ;;  %3707 = vmatmul.mubr.msk.bf16.vlgmr.msra.gmra.mrb[20].mxu1 %vm742_vm3, %v937_v41  ;;  %v880_v58 = vpop.xlane.xlu0 %879 }
 0x404   :  { %927 = vst.msk [vmem:[#allocation6 + $0x80] sm:$0xff] %vm742_vm3, %v911_v50  ;;  %3717 = vmatpush3.bf16.msra.mxu1 %v4655_v19  ;;  %4148 = vrcp.f32 %v880_v58  ;;  %3718 = vmatprep.mubr.msk.bf16.mxu1 %vm4307_vm1, %v4303_v21 }
 0x405   :  { %v4139_v60 = vpop.eup %4138  ;;  %926 = vst.msk [vmem:[#allocation6 + $0x38] sm:$0xff] %vm742_vm3, %v910_v57  ;;  %v938_v36 = vpack.c.bf16 %v910_v57, %v909_v52  ;;  %3728 = vmatprep.subr.bf16.mxu1 %v4303_v21 }
 0x406   :  { %v4141_v56 = vpop.eup %4140  ;;  %v913_v59 = vmul.f32 %v4139_v60, %v4620_v28  ;;  %v1273_v13 = vpop.permute.xlu1 %1272 }
 0x407   :  { %v912_v49 = vmul.f32 %v4141_v56, %v4622_v39  ;;  %3713 = vmatmul.mubr.msk.bf16.vlgmr.msra.gmra.mrb[24].mxu0 %vm742_vm3, %v938_v36  ;;  %v886_v45 = vpop.xlane.xlu0 %885 }
 0x408   :  { %929 = vst.msk [vmem:[#allocation6 + $0x90] sm:$0xff] %vm742_vm3, %v913_v59  ;;  %3723 = vmatpush3.bf16.msra.mxu0 %v4653_v16  ;;  %4150 = vrcp.f32 %v886_v45  ;;  %3724 = vmatprep.mubr.msk.bf16.mxu0 %vm4307_vm1, %v4303_v21 }
 0x409   :  { %v4143_v18 = vpop.eup %4142  ;;  %928 = vst.msk [vmem:[#allocation6 + $0x88] sm:$0xff] %vm742_vm3, %v912_v49  ;;  %v939_v62 = vpack.c.bf16 %v912_v49, %v911_v50  ;;  %3734 = vmatprep.subr.bf16.mxu0 %v4303_v21 }
 0x40a   :  { %v4145_v28 = vpop.eup %4144  ;;  %v915_v39 = vmul.f32 %v4143_v18, %v4629_v0 }
 0x40b   :  { %v914_v63 = vmul.f32 %v4145_v28, %v4631_v1  ;;  %3719 = vmatmul.mubr.msk.bf16.vlgmr.msra.gmra.mrb[24].mxu1 %vm742_vm3, %v939_v62  ;;  %v1226_v53 = vpop.permute.xlu0 %1225 }
 0x40c   :  { %931 = vst.msk [vmem:[#allocation6 + $0xa0] sm:$0xff] %vm742_vm3, %v915_v39  ;;  %3729 = vmatpush3.bf16.msra.mxu1 %v1226_v53  ;;  %3730 = vmatprep.mubr.msk.bf16.mxu1 %vm4307_vm1, %v4303_v21 }
 0x40d   :  { %v4147_v2 = vpop.eup %4146  ;;  %930 = vst.msk [vmem:[#allocation6 + $0x98] sm:$0xff] %vm742_vm3, %v914_v63  ;;  %v940_v3 = vpack.c.bf16 %v914_v63, %v913_v59  ;;  %3740 = vmatprep.subr.bf16.mxu1 %v4070_v37 }
 0x40e   :  { %v4149_v7 = vpop.eup %4148  ;;  %v917_v10 = vmul.f32 %v4147_v2, %v4637_v4 }
 0x40f   :  { %v916_v0 = vmul.f32 %v4149_v7, %v4639_v6  ;;  %3725 = vmatmul.mubr.msk.bf16.vlgmr.msra.gmra.mrb[28].mxu0 %vm742_vm3, %v940_v3 }
 0x410   :  { %933 = vst.msk [vmem:[#allocation6 + $0xb0] sm:$0xff] %vm742_vm3, %v917_v10  ;;  %3735 = vmatpush3.bf16.msra.mxu0 %v1273_v13  ;;  %3736 = vmatprep.mubr.msk.bf16.mxu0 %vm4307_vm1, %v4303_v21 }
 0x411   :  { %932 = vst.msk [vmem:[#allocation6 + $0xa8] sm:$0xff] %vm742_vm3, %v916_v0  ;;  %v941_v1 = vpack.c.bf16 %v916_v0, %v915_v39 }
 0x412   :  { %v4151_v14 = vpop.eup %4150 }
 0x413   :  { %v918_v5 = vmul.f32 %v4151_v14, %v4645_v12  ;;  %3731 = vmatmul.mubr.msk.bf16.vlgmr.msra.gmra.mrb[28].mxu1 %vm742_vm3, %v941_v1 }
 0x414   :  { %3741 = vmatpush3.bf16.msra.mxu1 %v4070_v37 }
 0x415   :  { %934 = vst.msk [vmem:[#allocation6 + $0xb8] sm:$0xff] %vm742_vm3, %v918_v5  ;;  %v942_v4 = vpack.c.bf16 %v918_v5, %v917_v10  ;;  %3742 = vmatprep.subr.bf16.mxu1 %v4071_v44 }
 0x417   :  { %3737 = vmatmul.mubr.msk.bf16.vlgmr.msra.gmra.mrb[32].mxu0 %vm742_vm3, %v942_v4 }
 0x418   :  { %3743 = vmatpush3.bf16.msra.mxu1 %v4071_v44 }
 0x485   :  { %v4715_v6 = vpop.f32.mrb[16].mxu1 }
 0x486   :  { %v3696_v16 = vpop.f32.mrb[17].mxu1 }
 0x487   :  { %v986_v19 = vpop.f32.mrb[18].mxu1 }
 0x488   :  { %v3697_v20 = vpop.f32.mrb[19].mxu1 }
 0x4d2   :  { %v1030_v11 = vpop.f32.mrb[20].mxu0 }
 0x4d3   :  { %v3702_v22 = vpop.f32.mrb[21].mxu0 }
 0x4d4   :  { %v1033_v24 = vpop.f32.mrb[22].mxu0 }
 0x4d5   :  { %v3978_v26 = vpack.i.bf16 %v1033_v24, %v1030_v11  ;;  %v3703_v27 = vpop.f32.mrb[23].mxu0 }
 0x4d6   :  { %v1077_v46 = vpop.f32.mrb[20].mxu1 }
 0x4d7   :  { %3979 = vrot.lane.b32.xlu0 %v3978_v26, %s4309_s14  ;;  %v3708_v12 = vpop.f32.mrb[21].mxu1 }
 0x4d8   :  { %v1080_v47 = vpop.f32.mrb[22].mxu1 }
 0x4d9   :  { %v3983_v15 = vpack.i.bf16 %v1080_v47, %v1077_v46  ;;  %v3709_v35 = vpop.f32.mrb[23].mxu1  ;;  %v49_v46 = vlaneseq }
 0x4da   :  { %v1124_v61 = vpop.f32.mrb[24].mxu0 }
 0x4db   :  { %3984 = vrot.lane.b32.xlu1 %v3983_v15, %s4310_s16  ;;  %v3714_v17 = vpop.f32.mrb[25].mxu0  ;;  %v50_v12 = vshrl.u32 %v49_v46, 7 }
 0x4dc   :  { %v1127_v29 = vpop.f32.mrb[26].mxu0 }
 0x4dd   :  { %v3988_v23 = vpack.i.bf16 %v1127_v29, %v1124_v61  ;;  %v3715_v31 = vpop.f32.mrb[27].mxu0  ;;  %v4746_v47 = vadd.s32 16, %v50_v12  ;;  %v3413_v15 = vadd.s32 4294967294, %v50_v12  ;;  %v51_v61 = vadd.s32 8, %v50_v12 }
 0x4de   :  { %v1171_v34 = vpop.f32.mrb[24].mxu1  ;;  %v4751_v29 = vadd.s32 24, %v50_v12  ;;  %vm120_vm15 = vcmp.gt.s32.totalorder %v50_v12, 0 }
 0x4df   :  { %3989 = vrot.lane.b32.xlu1 %v3988_v23, %s4311_s19  ;;  %v3720_v40 = vpop.f32.mrb[25].mxu1  ;;  %v4749_v35 = vadd.s32 4294967294, %v4746_v47  ;;  %v88_v17 = vadd.s32 1, %v3413_v15  ;;  %v3414_v23 = vadd.s32 4294967294, %v51_v61  ;;  %vm60_vm7 = vcmp.gt.s32.totalorder %v3413_v15, 0 }
 0x4e0   :  { %v1174_v42 = vpop.f32.mrb[26].mxu1  ;;  %v4755_v37 = vadd.s32 4294967294, %v4751_v29  ;;  %v4758_v40 = vand.u32 127, %v49_v46 }
 0x4e1   :  { %v3721_v32 = vpop.f32.mrb[27].mxu1  ;;  %vm92_vm5 = vcmp.gt.s32.totalorder %v88_v17, 0  ;;  %v90_v31 = vadd.s32 1, %v4749_v35  ;;  %vm64_vm6 = vcmp.gt.s32.totalorder %v4749_v35, 16 }
 0x4e2   :  { %v1218_v30 = vpop.f32.mrb[28].mxu0  ;;  %v61_v32 = vsel %vm60_vm7, %v3413_v15, 0  ;;  %v65_v44 = vsel %vm64_vm6, %v4749_v35, 16  ;;  %vm77_vm10 = vcmp.eq.s32.totalorder %v3414_v23, %v4758_v40  ;;  %vm79_vm14 = vcmp.eq.s32.totalorder %v4755_v37, %v4758_v40 }
 0x4e3   :  { %v3726_v48 = vpop.f32.mrb[29].mxu0  ;;  %vm76_vm9 = vcmp.eq.s32.totalorder %v61_v32, %v4758_v40  ;;  %vm96_vm13 = vcmp.gt.s32.totalorder %v90_v31, 16 }
 0x4e4   :  { %v1221_v8 = vpop.f32.mrb[30].mxu0  ;;  %v91_v48 = vadd.s32 1, %v4755_v37 }
 0x4e5   :  { %v3993_v51 = vpack.i.bf16 %v1221_v8, %v1218_v30  ;;  %v3727_v52 = vpop.f32.mrb[31].mxu0  ;;  %v80_v8 = vsel %vm76_vm9, 0.2, %v4303_v21 }
 0x4e6   :  { %v1265_v54 = vpop.f32.mrb[28].mxu1 }
 0x4e7   :  { %3994 = vrot.lane.b32.xlu0 %v3993_v51, %s4309_s14  ;;  %v3732_v38 = vpop.f32.mrb[29].mxu1  ;;  %v81_v51 = vsel %vm77_vm10, 0.2, %v4303_v21 }
 0x4e8   :  { %v1268_v25 = vpop.f32.mrb[30].mxu1 }
 0x4e9   :  { %v3998_v33 = vpack.i.bf16 %v1268_v25, %v1265_v54  ;;  %v3733_v41 = vpop.f32.mrb[31].mxu1 }
 0x4ea   :  { %v1312_v43 = vpop.f32.mrb[32].mxu0 }
 0x4eb   :  { %v3738_v50 = vpop.f32.mrb[33].mxu0  ;;  %3999 = vrot.lane.b32.xlu0 %v3998_v33, %s4310_s16  ;;  %v121_v33 = vsel %vm120_vm15, %v50_v12, 0 }
 0x4ec   :  { %v1315_v55 = vpop.f32.mrb[34].mxu0  ;;  %vm136_vm6 = vcmp.eq.s32.totalorder %v121_v33, %v4758_v40  ;;  %v149_v50 = vadd.s32 3, %v3414_v23 }
 0x4ed   :  { %v4003_v57 = vpack.i.bf16 %v1315_v55, %v1312_v43  ;;  %v3739_v58 = vpop.f32.mrb[35].mxu0  ;;  %v148_v43 = vadd.s32 3, %v3413_v15  ;;  %v180_v55 = vadd.s32 4, %v3413_v15 }
 0x4ee   :  { %vm162_vm9 = vcmp.lt.s32.totalorder %v149_v50, 15 }
 0x4ef   :  { %4004 = vrot.lane.b32.xlu1 %v4003_v57, %s4311_s19  ;;  %1404 = vrot.lane.b32.xlu0 %v4398_v9, %s4312_s22  ;;  %v140_v57 = vsel %vm136_vm6, 0.2, %v4303_v21 }
 0x549   :  { %v3980_v60 = vpop.permute.xlu0 %3979 }
 0x54a   :  { %v3982_v56 = vunpack.i.h.bf16 %v3980_v60  ;;  %v3981_v59 = vunpack.i.l.bf16 %v3980_v60  ;;  %v181_v60 = vadd.s32 4, %v3414_v23 }
 0x54c   :  { %v1344_v62 = vsel %vm344_vm2, %v986_v19, %v3982_v56  ;;  %v1343_v28 = vsel %vm344_vm2, %v4715_v6, %v3981_v59  ;;  %vm194_vm10 = vcmp.lt.s32.totalorder %v181_v60, 15 }
 0x54d   :  { %v3985_v36 = vpop.permute.xlu1 %3984 }
 0x54e   :  { %v3987_v49 = vunpack.i.h.bf16 %v3985_v36  ;;  %v3986_v45 = vunpack.i.l.bf16 %v3985_v36 }
 0x550   :  { %v1345_v53 = vsel %vm742_vm3, %v1343_v28, %v3986_v45  ;;  %v1346_v2 = vsel %vm742_vm3, %v1344_v62, %v3987_v49  ;;  %v163_v49 = vsel %vm162_vm9, %v149_v50, 15  ;;  %v4227_v50 = vld [vmem:[%s5307_s0 + $0x10] sm:$0xff] }
 0x551   :  { %v3990_v18 = vpop.permute.xlu1 %3989  ;;  %vm169_vm15 = vcmp.eq.s32.totalorder %v163_v49, %v4758_v40 }
 0x552   :  { %v3992_v39 = vunpack.i.h.bf16 %v3990_v18  ;;  %v3991_v63 = vunpack.i.l.bf16 %v3990_v18  ;;  %v195_v18 = vsel %vm194_vm10, %v181_v60, 15  ;;  %v173_v28 = vsel %vm169_vm15, 0.2, %v4303_v21  ;;  %v4072_v60 = vld [vmem:[#allocation2] sm:$0xff]  }
 0x553   :  { %3756 = vmatprep.subr.bf16.mxu1 %v4072_v60 }
 0x554   :  { %v1348_v9 = vsel %vm1347_vm4, %v1345_v53, %v3991_v63  ;;  %v1349_v3 = vsel %vm1347_vm4, %v1346_v2, %v3992_v39  ;;  %v83_v63 = vsel %vm79_vm14, 0.2, %v4303_v21  ;;  %vm134_vm14 = vcmp.lt.s32.totalorder %v4751_v29, 31 }
 0x555   :  { %v1380_v7 = vpack.c.bf16 %v1349_v3, %v1348_v9 }
 0x557   :  { %3744 = vmatprep.mubr.msk.bf16.mxu1 %vm237_vm0, %v1380_v7  ;;  %v97_v7 = vsel %vm96_vm13, %v90_v31, 16 }
 0x558   :  { %vm104_vm9 = vcmp.lt.s32.totalorder %v97_v7, 31 }
 0x559   :  { %v3995_v10 = vpop.permute.xlu0 %3994 }
 0x55a   :  { %v3997_v13 = vunpack.i.h.bf16 %v3995_v10  ;;  %v3996_v1 = vunpack.i.l.bf16 %v3995_v10 }
 0x55c   :  { %v1375_v6 = vsel %vm344_vm2, %v1174_v42, %v3997_v13  ;;  %v1374_v16 = vsel %vm344_vm2, %v1171_v34, %v3996_v1  ;;  %v93_v34 = vsel %vm92_vm5, %v88_v17, 0  ;;  %v89_v42 = vadd.s32 1, %v3414_v23 }
 0x55d   :  { %v4000_v0 = vpop.permute.xlu0 %3999  ;;  %vm100_vm8 = vcmp.lt.s32.totalorder %v93_v34, 15  ;;  %vm130_vm5 = vcmp.lt.s32.totalorder %v51_v61, 15  ;;  %v105_v1 = vsel %vm104_vm9, %v97_v7, 31  ;;  %v4076_v7 = vld [vmem:[%s5311_s4 + $0x10] sm:$0xff]   ;;  %vm1647_vm9 = vcmask 523264  }
 0x55e   :  { %v4002_v14 = vunpack.i.h.bf16 %v4000_v0  ;;  %v4001_v5 = vunpack.i.l.bf16 %v4000_v0  ;;  %v101_v30 = vsel %vm100_vm8, %v93_v34, 15  ;;  %vm109_vm12 = vcmp.eq.s32.totalorder %v89_v42, %v4758_v40 }
 0x55f   :  { %vm108_vm11 = vcmp.eq.s32.totalorder %v101_v30, %v4758_v40  ;;  %v113_v54 = vsel %vm109_vm12, 0.2, %v4303_v21  ;;  %v131_v41 = vsel %vm130_vm5, %v51_v61, 15  ;;  %vm168_vm8 = vcmp.eq.s32.totalorder %v148_v43, %v4758_v40 }
 0x560   :  { %v1376_v11 = vsel %vm742_vm3, %v1374_v16, %v4001_v5  ;;  %v1377_v22 = vsel %vm742_vm3, %v1375_v6, %v4002_v14  ;;  %v112_v52 = vsel %vm108_vm11, 0.2, %v4303_v21  ;;  %v117_v25 = vadd.f32 %v113_v54, %v81_v51 }
 0x561   :  { %v4005_v4 = vpop.permute.xlu1 %4004  ;;  %v116_v38 = vadd.f32 %v112_v52, %v80_v8  ;;  %vm137_vm7 = vcmp.eq.s32.totalorder %v131_v41, %v4758_v40  ;;  %v172_v59 = vsel %vm168_vm8, 0.2, %v4303_v21  ;;  %vm200_vm11 = vcmp.eq.s32.totalorder %v180_v55, %v4758_v40  ;;  %v1405_v42 = vpop.permute.xlu0 %1404  ;;  %v4226_v41 = vld [vmem:[%s5307_s0 + $0x8] sm:$0xff] }
 0x562   :  { %v4007_v19 = vunpack.i.h.bf16 %v4005_v4  ;;  %v4006_v20 = vunpack.i.l.bf16 %v4005_v4  ;;  %v141_v58 = vsel %vm137_vm7, 0.2, %v4303_v21  ;;  %vm72_vm12 = vcmp.lt.s32.totalorder %v65_v44, 31 }
 0x563   :  { %v144_v36 = vadd.f32 %v140_v57, %v116_v38  ;;  %v145_v56 = vadd.f32 %v141_v58, %v117_v25  ;;  %v204_v62 = vsel %vm200_vm11, 0.2, %v4303_v21  ;;  %vm201_vm5 = vcmp.eq.s32.totalorder %v195_v18, %v4758_v40  ;;  %v4225_v25 = vld [vmem:[%s5307_s0 + $0x18] sm:$0xff] }
 0x564   :  { %v1378_v24 = vsel %vm1347_vm4, %v1376_v11, %v4006_v20  ;;  %v1379_v26 = vsel %vm1347_vm4, %v1377_v22, %v4007_v19  ;;  %v73_v39 = vsel %vm72_vm12, %v65_v44, 31  ;;  %v205_v2 = vsel %vm201_vm5, 0.2, %v4303_v21 }
 0x565   :  { %v1381_v27 = vpack.c.bf16 %v1379_v26, %v1378_v24  ;;  %v176_v45 = vadd.f32 %v172_v59, %v144_v36  ;;  %v177_v53 = vadd.f32 %v173_v28, %v145_v56  ;;  %vm78_vm6 = vcmp.eq.s32.totalorder %v73_v39, %v4758_v40  ;;  %v4073_v36 = vld [vmem:[#allocation2 + $0x8] sm:$0xff]   ;;  %v4074_v56 = vld [vmem:[%s5311_s4] sm:$0xff]  }
 0x566   :  { %v82_v3 = vsel %vm78_vm6, 0.2, %v4303_v21  ;;  %vm111_vm7 = vcmp.eq.s32.totalorder %v91_v48, %v4758_v40  ;;  %vm124_vm8 = vcmp.gt.s32.totalorder %v4746_v47, 16  ;;  %vm110_vm13 = vcmp.eq.s32.totalorder %v105_v1, %v4758_v40  ;;  %v4075_v59 = vld [vmem:[%s5311_s4 + $0x8] sm:$0xff]  }
 0x567   :  { %3745 = vmatmul.mubr.msk.bf16.vlgmr.msra.gmra.mrb[32].mxu1 %vm237_vm0, %v1381_v27  ;;  %v208_v9 = vadd.f32 %v204_v62, %v176_v45  ;;  %v209_v10 = vadd.f32 %v205_v2, %v177_v53  ;;  %v115_v0 = vsel %vm111_vm7, 0.2, %v4303_v21  ;;  %v125_v13 = vsel %vm124_vm8, %v4746_v47, 16 }
 0x568   :  { %v119_v14 = vadd.f32 %v115_v0, %v83_v63  ;;  %vm138_vm10 = vcmp.eq.s32.totalorder %v125_v13, %v4758_v40  ;;  %v135_v4 = vsel %vm134_vm14, %v4751_v29, 31  ;;  %v114_v16 = vsel %vm110_vm13, 0.2, %v4303_v21  ;;  %3757 = vmatpush3.bf16.msra.mxu1 %v4072_v60 }
 0x569   :  { %v4797_v5 = vpack.c.bf16 %v209_v10, %v208_v9  ;;  %v142_v6 = vsel %vm138_vm10, 0.2, %v4303_v21  ;;  %vm139_vm11 = vcmp.eq.s32.totalorder %v135_v4, %v4758_v40  ;;  %v150_v19 = vadd.s32 3, %v4749_v35  ;;  %3758 = vmatprep.subr.bf16.mxu1 %v4073_v36  ;;  %v4077_v10 = vld [vmem:[%s5311_s4 + $0x18] sm:$0xff]  }
 0x56a   :  { %v151_v20 = vadd.s32 3, %v4755_v37  ;;  %v118_v11 = vadd.f32 %v114_v16, %v82_v3  ;;  %v143_v22 = vsel %vm139_vm11, 0.2, %v4303_v21  ;;  %v182_v24 = vadd.s32 4, %v4749_v35  ;;  %v3445_v3 = vld [vmem:[%s5312_s5 + $0x1] ss:$0 sm:$0xff] }
 0x56b   :  { %3752 = vmatprep.mubr.msk.bf16.mxu0 %vm237_vm0, %v4797_v5  ;;  %v183_v26 = vadd.s32 4, %v4755_v37  ;;  %v147_v27 = vadd.f32 %v143_v22, %v119_v14  ;;  %vm170_vm15 = vcmp.eq.s32.totalorder %v150_v19, %v4758_v40  ;;  %1644 = vrot.lane.b32.xlu1 %v3445_v3, %s4301_s15 }
 0x56c   :  { %vm166_vm12 = vcmp.lt.s32.totalorder %v151_v20, 31  ;;  %v146_v46 = vadd.f32 %v142_v6, %v118_v11  ;;  %v174_v47 = vsel %vm170_vm15, 0.2, %v4303_v21  ;;  %vm202_vm7 = vcmp.eq.s32.totalorder %v182_v24, %v4758_v40  ;;  %3759 = vmatpush3.bf16.msra.mxu1 %v4073_v36 }
 0x56d   :  { %v167_v12 = vsel %vm166_vm12, %v151_v20, 31  ;;  %vm198_vm5 = vcmp.lt.s32.totalorder %v183_v26, 31  ;;  %v206_v35 = vsel %vm202_vm7, 0.2, %v4303_v21 }
 0x56e   :  { %vm171_vm6 = vcmp.eq.s32.totalorder %v167_v12, %v4758_v40  ;;  %v199_v15 = vsel %vm198_vm5, %v183_v26, 31  ;;  %v178_v17 = vadd.f32 %v174_v47, %v146_v46 }
 0x56f   :  { %v175_v61 = vsel %vm171_vm6, 0.2, %v4303_v21  ;;  %vm203_vm8 = vcmp.eq.s32.totalorder %v199_v15, %v4758_v40  ;;  %v4224_v40 = vld [vmem:[%s5307_s0] sm:$0xff] }
 0x570   :  { %v179_v29 = vadd.f32 %v175_v61, %v147_v27  ;;  %v207_v23 = vsel %vm203_vm8, 0.2, %v4303_v21  ;;  %v210_v31 = vadd.f32 %v206_v35, %v178_v17 }
 0x572   :  { %v211_v34 = vadd.f32 %v207_v23, %v179_v29 }
 0x574   :  { %v4819_v37 = vpack.c.bf16 %v211_v34, %v210_v31 }
 0x5dd   :  { %v1645_v46 = vpop.permute.xlu1 %1644 }
 0x63a   :  { %v3746_v32 = vpop.f32.mrb[32].mxu1 }
 0x63b   :  { %v1447_v30 = vpop.f32.mrb[33].mxu1  ;;  %v1456_v52 = vadd.f32 %v3746_v32, %v1405_v42 }
 0x63c   :  { %v1448_v44 = vadd.f32 %v1447_v30, %v1405_v42  ;;  %v3747_v48 = vpop.f32.mrb[34].mxu1 }
 0x63d   :  { %v1459_v8 = vadd.f32 %v3747_v48, %v1405_v42  ;;  %v1450_v51 = vpop.f32.mrb[35].mxu1  ;;  %v1464_v55 = vadd.f32 %v4227_v50, %v1456_v52  ;;  %v4078_v48 = vld [vmem:[%s5308_s1 + $0x10] sm:$0xff]  }
 0x63e   :  { %v1451_v54 = vadd.f32 %v1450_v51, %v1405_v42  ;;  %v1462_v38 = vadd.f32 %v4224_v40, %v1448_v44 }
 0x63f   :  { %v1465_v33 = vadd.f32 %v4225_v25, %v1459_v8  ;;  %v4079_v8 = vld [vmem:[%s5308_s1 + $0x18] sm:$0xff]  }
 0x640   :  { %v1463_v43 = vadd.f32 %v4226_v41, %v1451_v54 }
 0x641   :  { %v1467_v58 = vpack.c.bf16 %v1465_v33, %v1464_v55 }
 0x642   :  { %v1466_v57 = vpack.c.bf16 %v1463_v43, %v1462_v38 }
 0x644   :  { %3748 = vmatprep.subr.bf16.mxu0 %v1466_v57 }
 0x645   :  { %3749 = vmatpush3.bf16.msra.mxu0 %v1466_v57  ;;  %v4888_v57 = vld [vmem:[%s5312_s5 + $0x2] ss:$0 sm:$0xff] }
 0x646   :  { %3750 = vmatprep.subr.bf16.mxu0 %v1467_v58 }
 0x649   :  { %3751 = vmatpush3.bf16.msra.mxu0 %v1467_v58 }
 0x64a   :  { %3764 = vmatprep.subr.bf16.mxu0 %v4074_v56 }
 0x64c   :  { %3753 = vmatmul.mubr.msk.bf16.vlgmr.msra.gmra.mrb[36].mxu0 %vm237_vm0, %v4819_v37 }
 0x64d   :  { %3765 = vmatpush3.bf16.msra.mxu0 %v4074_v56 }
 0x64e   :  { %3766 = vmatprep.subr.bf16.mxu0 %v4075_v59 }
 0x651   :  { %3767 = vmatpush3.bf16.msra.mxu0 %v4075_v59 }
 0x652   :  { %3768 = vmatprep.subr.bf16.mxu0 %v4076_v7 }
 0x655   :  { %3769 = vmatpush3.bf16.msra.mxu0 %v4076_v7 }
 0x656   :  { %3770 = vmatprep.subr.bf16.mxu0 %v4077_v10 }
 0x659   :  { %3771 = vmatpush3.bf16.msra.mxu0 %v4077_v10 }
 0x65a   :  { %3792 = vmatprep.subr.bf16.mxu0 %v4303_v21 }
 0x71f   :  { %v3754_v49 = vpop.f32.mrb[36].mxu0 }
 0x720   :  { %v1508_v45 = vpop.f32.mrb[37].mxu0  ;;  %v1525_v53 = vsub.f32 %v1464_v55, %v3754_v49 }
 0x721   :  { %v3755_v18 = vpop.f32.mrb[38].mxu0  ;;  %v1523_v39 = vsub.f32 %v1462_v38, %v1508_v45 }
 0x722   :  { %v1526_v62 = vsub.f32 %v1465_v33, %v3755_v18  ;;  %v1511_v28 = vpop.f32.mrb[39].mxu0 }
 0x723   :  { %v1524_v63 = vsub.f32 %v1463_v43, %v1511_v28 }
 0x724   :  { %v1528_v9 = vpack.c.bf16 %v1526_v62, %v1525_v53 }
 0x725   :  { %v1527_v2 = vpack.c.bf16 %v1524_v63, %v1523_v39 }
 0x727   :  { %3760 = vmatprep.mubr.msk.bf16.mxu1 %vm237_vm0, %v1527_v2 }
 0x728   :  { %3761 = vmatmul.mubr.msk.bf16.vlgmr.msra.gmra.mrb[36].mxu1 %vm237_vm0, %v1528_v9 }
 0x729   :  { %3780 = vmatprep.mubr.msk.bf16.mxu1 %vm237_vm0, %v4797_v5 }
 0x7fb   :  { %v3762_v0 = vpop.f32.mrb[36].mxu1 }
 0x7fc   :  { %v1599_v13 = vadd.f32 %v3762_v0, %v3445_v3  ;;  %v1590_v1 = vpop.f32.mrb[37].mxu1 }
 0x7fd   :  { %v1591_v14 = vadd.f32 %v3445_v3, %v1590_v1  ;;  %v3763_v4 = vpop.f32.mrb[38].mxu1 }
 0x7fe   :  { %v1602_v6 = vadd.f32 %v3763_v4, %v3445_v3  ;;  %v1593_v16 = vpop.f32.mrb[39].mxu1  ;;  %v1607_v20 = vmax.f32 %v1599_v13, 0.0 }
 0x7ff   :  { %v1594_v19 = vadd.f32 %v3445_v3, %v1593_v16  ;;  %v1605_v22 = vmax.f32 %v1591_v14, 0.0 }
 0x800   :  { %v1608_v11 = vmax.f32 %v1602_v6, 0.0 }
 0x801   :  { %v1606_v24 = vmax.f32 %v1594_v19, 0.0 }
 0x802   :  { %v1610_v26 = vpack.c.bf16 %v1608_v11, %v1607_v20 }
 0x803   :  { %v1609_v27 = vpack.c.bf16 %v1606_v24, %v1605_v22 }
 0x805   :  { %3772 = vmatprep.mubr.msk.bf16.mxu0 %vm1647_vm9, %v1609_v27 }
 0x806   :  { %3773 = vmatmul.mubr.msk.bf16.vlgmr.msra.gmra.mrb[40].mxu0 %vm1647_vm9, %v1610_v26 }
 0x807   :  { %3794 = vmatprep.mubr.msk.bf16.mxu0 %vm4307_vm1, %v4303_v21 }
 0x8d9   :  { %v3774_v12 = vpop.f32.mrb[40].mxu0 }
 0x8da   :  { %v1688_v47 = vpop.f32.mrb[41].mxu0  ;;  %v1697_v29 = vadd.f32 %v3774_v12, %v1645_v46 }
 0x8db   :  { %v1689_v15 = vadd.f32 %v1688_v47, %v1645_v46  ;;  %v3775_v61 = vpop.f32.mrb[42].mxu0 }
 0x8dc   :  { %v1700_v17 = vadd.f32 %v3775_v61, %v1645_v46  ;;  %v1691_v35 = vpop.f32.mrb[43].mxu0  ;;  %v1705_v32 = vadd.f32 %v1697_v29, %v1525_v53 }
 0x8dd   :  { %v1692_v23 = vadd.f32 %v1691_v35, %v1645_v46  ;;  %v1703_v31 = vadd.f32 %v1689_v15, %v1523_v39 }
 0x8de   :  { %v1706_v34 = vadd.f32 %v1700_v17, %v1526_v62 }
 0x8df   :  { %v1704_v42 = vadd.f32 %v1692_v23, %v1524_v63 }
 0x8e0   :  { %v1708_v44 = vpack.c.bf16 %v1706_v34, %v1705_v32 }
 0x8e1   :  { %v1707_v30 = vpack.c.bf16 %v1704_v42, %v1703_v31 }
 0x8e3   :  { %3776 = vmatprep.subr.bf16.mxu1 %v1707_v30 }
 0x8e4   :  { %3777 = vmatpush3.bf16.msra.mxu1 %v1707_v30 }
 0x8e5   :  { %3778 = vmatprep.subr.bf16.mxu1 %v1708_v44 }
 0x8e8   :  { %3779 = vmatpush3.bf16.msra.mxu1 %v1708_v44 }
 0x8e9   :  { %3784 = vmatprep.subr.bf16.mxu1 %v4078_v48 }
 0x8eb   :  { %3781 = vmatmul.mubr.msk.bf16.vlgmr.msra.gmra.mrb[40].mxu1 %vm237_vm0, %v4819_v37 }
 0x8ec   :  { %3785 = vmatpush3.bf16.msra.mxu1 %v4078_v48 }
 0x8ed   :  { %3786 = vmatprep.subr.bf16.mxu1 %v4079_v8 }
 0x8f0   :  { %3787 = vmatpush3.bf16.msra.mxu1 %v4079_v8 }
 0x8f1   :  { %3798 = vmatprep.subr.bf16.mxu1 %v4303_v21 }
 0x9be   :  { %v3782_v51 = vpop.f32.mrb[40].mxu1 }
 0x9bf   :  { %v1743_v52 = vpop.f32.mrb[41].mxu1  ;;  %v4875_v41 = vsub.f32 %v1705_v32, %v3782_v51 }
 0x9c0   :  { %v3783_v54 = vpop.f32.mrb[42].mxu1  ;;  %v4871_v25 = vsub.f32 %v1703_v31, %v1743_v52 }
 0x9c1   :  { %v4869_v40 = vsub.f32 %v1706_v34, %v3783_v54  ;;  %v1746_v38 = vpop.f32.mrb[43].mxu1 }
 0x9c2   :  { %v4873_v33 = vsub.f32 %v1704_v42, %v1746_v38 }
 0x9c3   :  { %v1763_v50 = vpack.c.bf16 %v4869_v40, %v4875_v41 }
 0x9c4   :  { %v1762_v43 = vpack.c.bf16 %v4873_v33, %v4871_v25 }
 0x9c6   :  { %3788 = vmatprep.mubr.msk.bf16.mxu1 %vm237_vm0, %v1762_v43 }
 0x9c7   :  { %3789 = vmatmul.mubr.msk.bf16.vlgmr.msra.gmra.mrb[44].mxu1 %vm237_vm0, %v1763_v50 }
 0x9c8   :  { %3800 = vmatprep.mubr.msk.bf16.mxu1 %vm4307_vm1, %v4303_v21 }
 0xa9a   :  { %v3790_v55 = vpop.f32.mrb[44].mxu1 }
 0xa9b   :  { %v1827_v58 = vpop.f32.mrb[45].mxu1  ;;  %v1836_v36 = vadd.f32 %v3790_v55, %v4888_v57 }
 0xa9c   :  { %v3791_v60 = vpop.f32.mrb[46].mxu1  ;;  %v1828_v49 = vadd.f32 %v4888_v57, %v1827_v58 }
 0xa9d   :  { %v1839_v56 = vadd.f32 %v3791_v60, %v4888_v57  ;;  %v1830_v59 = vpop.f32.mrb[47].mxu1 }
 0xa9e   :  { %v1831_v45 = vadd.f32 %v4888_v57, %v1830_v59 }
 0xa9f   :  { %v4023_v18 = vpack.i.bf16 %v1839_v56, %v1836_v36  ;;  %v4894_v62 = vpack.c.bf16 %v1839_v56, %v1836_v36 }
 0xaa0   :  { %v4013_v28 = vpack.i.bf16 %v1831_v45, %v1828_v49  ;;  %v1882_v39 = vpack.c.bf16 %v1831_v45, %v1828_v49 }
 0xaa2   :  { %4014 = vrot.lane.b32.xlu1 %v4013_v28, %s4306_s12  ;;  %4009 = vrot.lane.b32.xlu0 %v4013_v28, %s4305_s11 }
 0xaa6   :  { %4024 = vrot.lane.b32.xlu1 %v4023_v18, %s4305_s11  ;;  %4019 = vrot.lane.b32.xlu0 %v4013_v28, %s4304_s10 }
 0xaaa   :  { %4034 = vrot.lane.b32.xlu1 %v4023_v18, %s4304_s10  ;;  %4029 = vrot.lane.b32.xlu0 %v4023_v18, %s4306_s12 }
 0xaae   :  { %1891 = vrot.lane.b32.xlu0 %v1882_v39, %s4308_s13 }
 0xb14   :  { %v4015_v63 = vpop.permute.xlu1 %4014  ;;  %v4010_v53 = vpop.permute.xlu0 %4009 }
 0xb15   :  { %v4017_v2 = vunpack.i.h.bf16 %v4015_v63  ;;  %v4016_v9 = vunpack.i.l.bf16 %v4015_v63  ;;  %v4012_v3 = vunpack.i.h.bf16 %v4010_v53  ;;  %v4011_v7 = vunpack.i.l.bf16 %v4010_v53 }
 0xb17   :  { %v4903_v10 = vpack.c.bf16 %v4017_v2, %v4016_v9  ;;  %v4905_v0 = vpack.c.bf16 %v4012_v3, %v4011_v7 }
 0xb18   :  { %v4025_v13 = vpop.permute.xlu1 %4024  ;;  %v4020_v1 = vpop.permute.xlu0 %4019 }
 0xb19   :  { %v4022_v14 = vunpack.i.h.bf16 %v4020_v1  ;;  %v4021_v4 = vunpack.i.l.bf16 %v4020_v1  ;;  %1941 = vrot.lane.b32.xlu1 %v4905_v0, %s4308_s13  ;;  %1991 = vrot.lane.b32.xlu0 %v4903_v10, %s4308_s13  ;;  %v4027_v6 = vunpack.i.h.bf16 %v4025_v13  ;;  %v4026_v16 = vunpack.i.l.bf16 %v4025_v13 }
 0xb1b   :  { %v4911_v19 = vpack.c.bf16 %v4022_v14, %v4021_v4  ;;  %v4917_v26 = vpack.c.bf16 %v4027_v6, %v4026_v16 }
 0xb1c   :  { %v4035_v20 = vpop.permute.xlu1 %4034  ;;  %v4030_v11 = vpop.permute.xlu0 %4029 }
 0xb1d   :  { %v4032_v22 = vunpack.i.h.bf16 %v4030_v11  ;;  %v4031_v24 = vunpack.i.l.bf16 %v4030_v11  ;;  %2041 = vrot.lane.b32.xlu1 %v4911_v19, %s4308_s13  ;;  %2091 = vrot.lane.b32.xlu0 %v4894_v62, %s4308_s13  ;;  %v4037_v27 = vunpack.i.h.bf16 %v4035_v20  ;;  %v4036_v46 = vunpack.i.l.bf16 %v4035_v20 }
 0xb1f   :  { %v4919_v12 = vpack.c.bf16 %v4032_v22, %v4031_v24  ;;  %v4926_v61 = vpack.c.bf16 %v4037_v27, %v4036_v46 }
 0xb20   :  { %v1892_v47 = vpop.permute.xlu0 %1891 }
 0xb21   :  { %v1897_v15 = vsel %vm344_vm2, %v1892_v47, 0  ;;  %2141 = vrot.lane.b32.xlu1 %v4917_v26, %s4308_s13  ;;  %2191 = vrot.lane.b32.xlu0 %v4919_v12, %s4308_s13 }
 0xb22   :  { %3793 = vmatpush3.bf16.xpose.msra.mxu0 %v1897_v15 }
 0xb23   :  { %3804 = vmatprep.subr.bf16.mxu0 %v4303_v21 }
 0xb25   :  { %2241 = vrot.lane.b32.xlu1 %v4926_v61, %s4308_s13 }
 0xb29   :  { %2491 = vrot.lane.b32.xlu1 %v1882_v39, %s4301_s15  ;;  %3795 = vmatmul.mubr.msk.bf16.vlgmr.msra.gmra.mrb[44].mxu0 %vm344_vm2, %v1882_v39 }
 0xb2a   :  { %3806 = vmatprep.mubr.msk.bf16.mxu0 %vm4307_vm1, %v4303_v21 }
 0xb8b   :  { %v1942_v17 = vpop.permute.xlu1 %1941  ;;  %v1992_v35 = vpop.permute.xlu0 %1991 }
 0xb8c   :  { %v1947_v29 = vsel %vm344_vm2, %v1942_v17, 0  ;;  %v1997_v23 = vsel %vm344_vm2, %v1992_v35, 0 }
 0xb8d   :  { %3799 = vmatpush3.bf16.xpose.msra.mxu1 %v1947_v29  ;;  %3805 = vmatpush3.bf16.xpose.msra.mxu0 %v1997_v23 }
 0xb8e   :  { %3810 = vmatprep.subr.bf16.mxu1 %v4303_v21  ;;  %3816 = vmatprep.subr.bf16.mxu0 %v4303_v21 }
 0xb8f   :  { %v2042_v31 = vpop.permute.xlu1 %2041  ;;  %v2092_v34 = vpop.permute.xlu0 %2091 }
 0xb90   :  { %v2047_v42 = vsel %vm344_vm2, %v2042_v31, 0  ;;  %v2097_v32 = vsel %vm344_vm2, %v2092_v34, 0 }
 0xb93   :  { %v2142_v30 = vpop.permute.xlu1 %2141  ;;  %v2192_v44 = vpop.permute.xlu0 %2191 }
 0xb94   :  { %3801 = vmatmul.mubr.msk.bf16.vlgmr.msra.gmra.mrb[48].mxu1 %vm344_vm2, %v4905_v0  ;;  %3807 = vmatmul.mubr.msk.bf16.vlgmr.msra.gmra.mrb[48].mxu0 %vm344_vm2, %v4903_v10  ;;  %v2147_v48 = vsel %vm344_vm2, %v2142_v30, 0  ;;  %v2197_v8 = vsel %vm344_vm2, %v2192_v44, 0 }
 0xb95   :  { %3811 = vmatpush3.bf16.xpose.msra.mxu1 %v2047_v42  ;;  %3817 = vmatpush3.bf16.xpose.msra.mxu0 %v2097_v32 }
 0xb96   :  { %3812 = vmatprep.mubr.msk.bf16.mxu1 %vm4307_vm1, %v4303_v21  ;;  %3818 = vmatprep.mubr.msk.bf16.mxu0 %vm4307_vm1, %v4303_v21 }
 0xb97   :  { %3822 = vmatprep.subr.bf16.mxu1 %v4303_v21  ;;  %3828 = vmatprep.subr.bf16.mxu0 %v4303_v21  ;;  %v2242_v51 = vpop.permute.xlu1 %2241 }
 0xb98   :  { %v2247_v52 = vsel %vm344_vm2, %v2242_v51, 0 }
 0xb9b   :  { %v2492_v54 = vpop.permute.xlu1 %2491 }
 0xb9c   :  { %3813 = vmatmul.mubr.msk.bf16.vlgmr.msra.gmra.mrb[52].mxu1 %vm344_vm2, %v4911_v19  ;;  %3819 = vmatmul.mubr.msk.bf16.vlgmr.msra.gmra.mrb[52].mxu0 %vm344_vm2, %v4894_v62 }
 0xb9d   :  { %3823 = vmatpush3.bf16.xpose.msra.mxu1 %v2147_v48  ;;  %3829 = vmatpush3.bf16.xpose.msra.mxu0 %v2197_v8 }
 0xb9e   :  { %3824 = vmatprep.mubr.msk.bf16.mxu1 %vm4307_vm1, %v4303_v21  ;;  %3830 = vmatprep.mubr.msk.bf16.mxu0 %vm4307_vm1, %v4303_v21 }
 0xb9f   :  { %3834 = vmatprep.subr.bf16.mxu1 %v4303_v21  ;;  %3840 = vmatprep.subr.bf16.mxu0 %v4303_v21 }
 0xba4   :  { %3825 = vmatmul.mubr.msk.bf16.vlgmr.msra.gmra.mrb[56].mxu1 %vm344_vm2, %v4917_v26  ;;  %3831 = vmatmul.mubr.msk.bf16.vlgmr.msra.gmra.mrb[56].mxu0 %vm344_vm2, %v4919_v12 }
 0xba5   :  { %3835 = vmatpush3.bf16.xpose.msra.mxu1 %v2247_v52  ;;  %3841 = vmatpush3.bf16.msra.mxu0 %v2492_v54 }
 0xba6   :  { %3836 = vmatprep.mubr.msk.bf16.mxu1 %vm4307_vm1, %v4303_v21  ;;  %3846 = vmatprep.subr.bf16.mxu1 %v4303_v21 }
 0xba7   :  { %3842 = vmatprep.mubr.msk.bf16.mxu0 %vm4307_vm1, %v4303_v21  ;;  %3852 = vmatprep.subr.bf16.mxu0 %v4303_v21 }
 0xbac   :  { %3837 = vmatmul.mubr.msk.bf16.vlgmr.msra.gmra.mrb[60].mxu1 %vm344_vm2, %v4926_v61 }
 0xbad   :  { %3848 = vmatprep.mubr.msk.bf16.mxu1 %vm4307_vm1, %v4303_v21 }
 0xbfc   :  { %v4978_v38 = vpop.f32.mrb[44].mxu0 }
 0xbfd   :  { %v3796_v43 = vpop.f32.mrb[45].mxu0  ;;  %v2290_v50 = vsel %vm742_vm3, %v4978_v38, -inf }
 0xbfe   :  { %2291 = vmax.xlane.f32.xlu0 %v2290_v50  ;;  %v4982_v55 = vpop.f32.mrb[46].mxu0 }
 0xbff   :  { %v3797_v58 = vpop.f32.mrb[47].mxu0  ;;  %v2293_v60 = vsel %vm742_vm3, %v4982_v55, -inf }
 0xc00   :  { %2294 = vmax.xlane.f32.xlu1 %v2293_v60 }
 0xc67   :  { %v4986_v36 = vpop.f32.mrb[48].mxu1  ;;  %v4988_v56 = vpop.f32.mrb[48].mxu0 }
 0xc68   :  { %v3802_v59 = vpop.f32.mrb[49].mxu1  ;;  %v3808_v49 = vpop.f32.mrb[49].mxu0  ;;  %v2296_v45 = vsel %vm742_vm3, %v4986_v36, -inf  ;;  %v2302_v18 = vsel %vm742_vm3, %v4988_v56, -inf }
 0xc69   :  { %v4994_v28 = vpop.f32.mrb[50].mxu1  ;;  %2297 = vmax.xlane.f32.xlu0 %v2296_v45  ;;  %2303 = vmax.xlane.f32.xlu1 %v2302_v18  ;;  %v4996_v39 = vpop.f32.mrb[50].mxu0 }
 0xc6a   :  { %v3803_v63 = vpop.f32.mrb[51].mxu1  ;;  %v3809_v53 = vpop.f32.mrb[51].mxu0  ;;  %v2299_v2 = vsel %vm742_vm3, %v4994_v28, -inf  ;;  %v2305_v14 = vsel %vm742_vm3, %v4996_v39, -inf }
 0xc6d   :  { %2300 = vmax.xlane.f32.xlu0 %v2299_v2 }
 0xc6f   :  { %v5000_v9 = vpop.f32.mrb[52].mxu1  ;;  %v5002_v3 = vpop.f32.mrb[52].mxu0 }
 0xc70   :  { %v3814_v7 = vpop.f32.mrb[53].mxu1  ;;  %v3820_v13 = vpop.f32.mrb[53].mxu0  ;;  %v2308_v1 = vsel %vm742_vm3, %v5000_v9, -inf  ;;  %v2314_v22 = vsel %vm742_vm3, %v5002_v3, -inf }
 0xc71   :  { %v5008_v4 = vpop.f32.mrb[54].mxu1  ;;  %2309 = vmax.xlane.f32.xlu1 %v2308_v1  ;;  %2306 = vmax.xlane.f32.xlu0 %v2305_v14  ;;  %v5010_v6 = vpop.f32.mrb[54].mxu0 }
 0xc72   :  { %v3815_v16 = vpop.f32.mrb[55].mxu1  ;;  %v3821_v20 = vpop.f32.mrb[55].mxu0  ;;  %v2311_v11 = vsel %vm742_vm3, %v5008_v4, -inf  ;;  %v2317_v17 = vsel %vm742_vm3, %v5010_v6, -inf }
 0xc75   :  { %2312 = vmax.xlane.f32.xlu0 %v2311_v11  ;;  %2315 = vmax.xlane.f32.xlu1 %v2314_v22 }
 0xc77   :  { %v5016_v24 = vpop.f32.mrb[56].mxu1  ;;  %v5018_v27 = vpop.f32.mrb[56].mxu0 }
 0xc78   :  { %v3826_v46 = vpop.f32.mrb[57].mxu1  ;;  %v3832_v47 = vpop.f32.mrb[57].mxu0  ;;  %v2320_v15 = vsel %vm742_vm3, %v5016_v24, -inf  ;;  %v2326_v42 = vsel %vm742_vm3, %v5018_v27, -inf }
 0xc79   :  { %v5024_v35 = vpop.f32.mrb[58].mxu1  ;;  %2321 = vmax.xlane.f32.xlu1 %v2320_v15  ;;  %2318 = vmax.xlane.f32.xlu0 %v2317_v17  ;;  %v5026_v29 = vpop.f32.mrb[58].mxu0 }
 0xc7a   :  { %v3827_v23 = vpop.f32.mrb[59].mxu1  ;;  %v3833_v31 = vpop.f32.mrb[59].mxu0  ;;  %v2323_v34 = vsel %vm742_vm3, %v5024_v35, -inf  ;;  %v2329_v48 = vsel %vm742_vm3, %v5026_v29, -inf }
 0xc7d   :  { %2324 = vmax.xlane.f32.xlu0 %v2323_v34  ;;  %2327 = vmax.xlane.f32.xlu1 %v2326_v42 }
 0xc7f   :  { %v5032_v32 = vpop.f32.mrb[60].mxu1 }
 0xc80   :  { %v3838_v30 = vpop.f32.mrb[61].mxu1  ;;  %v2332_v44 = vsel %vm742_vm3, %v5032_v32, -inf }
 0xc81   :  { %v5038_v8 = vpop.f32.mrb[62].mxu1  ;;  %2333 = vmax.xlane.f32.xlu1 %v2332_v44  ;;  %2330 = vmax.xlane.f32.xlu0 %v2329_v48 }
 0xc82   :  { %v3839_v51 = vpop.f32.mrb[63].mxu1  ;;  %v2335_v52 = vsel %vm742_vm3, %v5038_v8, -inf }
 0xc85   :  { %2336 = vmax.xlane.f32.xlu0 %v2335_v52 }
 0xc8b   :  { %v2292_v54 = vpop.xlane.xlu0 %2291 }
 0xc8c   :  { %v2338_v50 = vsub.f32 %v4978_v38, %v2292_v54 }
 0xc8d   :  { %v2295_v43 = vpop.xlane.xlu1 %2294 }
 0xc8e   :  { %v2339_v58 = vsub.f32 %v4982_v55, %v2295_v43  ;;  %v2354_v60 = vmul.f32 1.442695, %v2338_v50 }
 0xc90   :  { %4152 = vpow2.f32 %v2354_v60 }
 0xc92   :  { %2585 = vrot.lane.b32.xlu1 %v4903_v10, %s4301_s15  ;;  %v2356_v10 = vmul.f32 1.442695, %v2339_v58 }
 0xc94   :  { %4154 = vpow2.f32 %v2356_v10 }
 0xc96   :  { %2632 = vrot.lane.b32.xlu1 %v4911_v19, %s4301_s15 }
 0xc9a   :  { %2726 = vrot.lane.b32.xlu1 %v4917_v26, %s4301_s15  ;;  %v5054_v19 = vpop.eup %4152 }
 0xc9b   :  { %2538 = vrot.lane.b32.xlu0 %v4905_v0, %s4301_s15 }
 0xc9e   :  { %v5056_v59 = vpop.eup %4154 }
 0xc9f   :  { %2679 = vrot.lane.b32.xlu0 %v4894_v62, %s4301_s15  ;;  %v2389_v0 = vsel %vm742_vm3, %v5056_v59, 0.0  ;;  %v2386_v62 = vsel %vm742_vm3, %v5054_v19, 0.0 }
 0xcbe   :  { %2390 = vadd.xlane.f32.xlu0 %v2389_v0  ;;  %2387 = vadd.xlane.f32.xlu1 %v2386_v62 }
 0xcf6   :  { %v2304_v26 = vpop.xlane.xlu1 %2303  ;;  %v2298_v38 = vpop.xlane.xlu0 %2297 }
 0xcf7   :  { %v2342_v55 = vsub.f32 %v4988_v56, %v2304_v26  ;;  %v2340_v49 = vsub.f32 %v4986_v36, %v2298_v38 }
 0xcf9   :  { %v2358_v45 = vmul.f32 1.442695, %v2340_v49  ;;  %v2362_v18 = vmul.f32 1.442695, %v2342_v55 }
 0xcfa   :  { %v2301_v63 = vpop.xlane.xlu0 %2300 }
 0xcfb   :  { %v2341_v53 = vsub.f32 %v4994_v28, %v2301_v63  ;;  %4156 = vpow2.f32 %v2358_v45 }
 0xcfc   :  { %4158 = vpow2.f32 %v2362_v18 }
 0xcfd   :  { %v2360_v2 = vmul.f32 1.442695, %v2341_v53 }
 0xcfe   :  { %v2310_v7 = vpop.xlane.xlu1 %2309  ;;  %v2307_v13 = vpop.xlane.xlu0 %2306 }
 0xcff   :  { %4160 = vpow2.f32 %v2360_v2  ;;  %v2344_v1 = vsub.f32 %v5000_v9, %v2310_v7  ;;  %v2343_v14 = vsub.f32 %v4996_v39, %v2307_v13 }
 0xd01   :  { %v2366_v16 = vmul.f32 1.442695, %v2344_v1  ;;  %v2364_v20 = vmul.f32 1.442695, %v2343_v14 }
 0xd02   :  { %v2316_v56 = vpop.xlane.xlu1 %2315  ;;  %v2313_v11 = vpop.xlane.xlu0 %2312 }
 0xd03   :  { %4162 = vpow2.f32 %v2366_v16  ;;  %v2346_v36 = vsub.f32 %v5002_v3, %v2316_v56  ;;  %v2345_v22 = vsub.f32 %v5008_v4, %v2313_v11 }
 0xd04   :  { %4164 = vpow2.f32 %v2364_v20 }
 0xd05   :  { %v2370_v28 = vmul.f32 1.442695, %v2346_v36  ;;  %v2368_v46 = vmul.f32 1.442695, %v2345_v22  ;;  %v5069_v47 = vpop.eup %4156 }
 0xd06   :  { %v2322_v15 = vpop.xlane.xlu1 %2321  ;;  %v2319_v17 = vpop.xlane.xlu0 %2318  ;;  %v2392_v23 = vsel %vm742_vm3, %v5069_v47, 0.0 }
 0xd07   :  { %4166 = vpow2.f32 %v2370_v28  ;;  %v2348_v9 = vsub.f32 %v5016_v24, %v2322_v15  ;;  %v2347_v39 = vsub.f32 %v5010_v6, %v2319_v17  ;;  %v5075_v31 = vpop.eup %4158  ;;  %2393 = vadd.xlane.f32.xlu1 %v2392_v23 }
 0xd08   :  { %4168 = vpow2.f32 %v2368_v46  ;;  %v2398_v48 = vsel %vm742_vm3, %v5075_v31, 0.0 }
 0xd09   :  { %v5077_v3 = vpop.eup %4160  ;;  %v2374_v4 = vmul.f32 1.442695, %v2348_v9  ;;  %v2372_v34 = vmul.f32 1.442695, %v2347_v39 }
 0xd0a   :  { %v2328_v42 = vpop.xlane.xlu1 %2327  ;;  %v2325_v30 = vpop.xlane.xlu0 %2324  ;;  %v2395_v44 = vsel %vm742_vm3, %v5077_v3, 0.0 }
 0xd0b   :  { %4170 = vpow2.f32 %v2374_v4  ;;  %v2350_v24 = vsub.f32 %v5018_v27, %v2328_v42  ;;  %v2349_v6 = vsub.f32 %v5024_v35, %v2325_v30  ;;  %2396 = vadd.xlane.f32.xlu0 %v2395_v44  ;;  %2399 = vadd.xlane.f32.xlu1 %v2398_v48 }
 0xd0c   :  { %4172 = vpow2.f32 %v2372_v34 }
 0xd0d   :  { %v5085_v51 = vpop.eup %4162  ;;  %v2378_v52 = vmul.f32 1.442695, %v2350_v24  ;;  %v2376_v54 = vmul.f32 1.442695, %v2349_v6 }
 0xd0e   :  { %v5087_v43 = vpop.eup %4164  ;;  %v2334_v50 = vpop.xlane.xlu1 %2333  ;;  %v2404_v60 = vsel %vm742_vm3, %v5085_v51, 0.0 }
 0xd0f   :  { %v2331_v58 = vpop.xlane.xlu0 %2330  ;;  %4174 = vpow2.f32 %v2378_v52  ;;  %v2352_v27 = vsub.f32 %v5032_v32, %v2334_v50  ;;  %v2401_v10 = vsel %vm742_vm3, %v5087_v43, 0.0  ;;  %2405 = vadd.xlane.f32.xlu1 %v2404_v60 }
 0xd10   :  { %v2351_v35 = vsub.f32 %v5026_v29, %v2331_v58  ;;  %4176 = vpow2.f32 %v2376_v54  ;;  %2402 = vadd.xlane.f32.xlu0 %v2401_v10 }
 0xd11   :  { %v5095_v0 = vpop.eup %4166  ;;  %v2382_v62 = vmul.f32 1.442695, %v2352_v27 }
 0xd12   :  { %v2380_v26 = vmul.f32 1.442695, %v2351_v35  ;;  %v5097_v38 = vpop.eup %4168  ;;  %v2410_v49 = vsel %vm742_vm3, %v5095_v0, 0.0  ;;  %v2586_v28 = vpop.permute.xlu1 %2585 }
 0xd13   :  { %v2337_v55 = vpop.xlane.xlu0 %2336  ;;  %4178 = vpow2.f32 %v2382_v62  ;;  %v2407_v29 = vsel %vm742_vm3, %v5097_v38, 0.0  ;;  %2411 = vadd.xlane.f32.xlu1 %v2410_v49 }
 0xd14   :  { %v2353_v32 = vsub.f32 %v5038_v8, %v2337_v55  ;;  %4180 = vpow2.f32 %v2380_v26  ;;  %2408 = vadd.xlane.f32.xlu0 %v2407_v29 }
 0xd15   :  { %v5104_v45 = vpop.eup %4170 }
 0xd16   :  { %v2384_v18 = vmul.f32 1.442695, %v2353_v32  ;;  %v5106_v63 = vpop.eup %4172  ;;  %v2416_v2 = vsel %vm742_vm3, %v5104_v45, 0.0  ;;  %v2633_v46 = vpop.permute.xlu1 %2632 }
 0xd17   :  { %v2539_v53 = vpop.permute.xlu0 %2538  ;;  %v2413_v7 = vsel %vm742_vm3, %v5106_v63, 0.0  ;;  %2417 = vadd.xlane.f32.xlu1 %v2416_v2 }
 0xd18   :  { %4182 = vpow2.f32 %v2384_v18  ;;  %3847 = vmatpush3.bf16.msra.mxu1 %v2539_v53  ;;  %2414 = vadd.xlane.f32.xlu0 %v2413_v7 }
 0xd19   :  { %v5112_v8 = vpop.eup %4174  ;;  %3858 = vmatprep.subr.bf16.mxu1 %v4303_v21 }
 0xd1a   :  { %v5115_v13 = vpop.eup %4176  ;;  %v2422_v1 = vsel %vm742_vm3, %v5112_v8, 0.0  ;;  %v5137_v15 = vpop.permute.xlu1 %2726 }
 0xd1b   :  { %v2419_v14 = vsel %vm742_vm3, %v5115_v13, 0.0  ;;  %2423 = vadd.xlane.f32.xlu1 %v2422_v1  ;;  %v5139_v17 = vpop.permute.xlu0 %2679 }
 0xd1c   :  { %2420 = vadd.xlane.f32.xlu0 %v2419_v14 }
 0xd1d   :  { %v5121_v16 = vpop.eup %4178 }
 0xd1e   :  { %v5123_v20 = vpop.eup %4180  ;;  %v2428_v56 = vsel %vm742_vm3, %v5121_v16, 0.0 }
 0xd1f   :  { %v2425_v11 = vsel %vm742_vm3, %v5123_v20, 0.0  ;;  %2429 = vadd.xlane.f32.xlu1 %v2428_v56 }
 0xd20   :  { %2426 = vadd.xlane.f32.xlu0 %v2425_v11 }
 0xd22   :  { %v5129_v36 = vpop.eup %4182 }
 0xd23   :  { %v2431_v22 = vsel %vm742_vm3, %v5129_v36, 0.0 }
 0xd24   :  { %2432 = vadd.xlane.f32.xlu0 %v2431_v22 }
 0xd30   :  { %2820 = vrot.lane.b32.xlu1 %v4926_v61, %s4301_s15 }
 0xd3a   :  { %2773 = vrot.lane.b32.xlu0 %v4919_v12, %s4301_s15 }
 0xd4b   :  { %v2388_v9 = vpop.xlane.xlu1 %2387  ;;  %v2391_v39 = vpop.xlane.xlu0 %2390 }
 0xd4c   :  { %4184 = vrcp.f32 %v2388_v9 }
 0xd4d   :  { %4186 = vrcp.f32 %v2391_v39 }
 0xd56   :  { %v4185_v23 = vpop.eup %4184 }
 0xd57   :  { %v4187_v4 = vpop.eup %4186  ;;  %v2450_v34 = vmul.f32 %v4185_v23, %v5054_v19 }
 0xd58   :  { %v2451_v42 = vmul.f32 %v4187_v4, %v5056_v59 }
 0xd59   :  { %2467 = vst.msk [vmem:[#allocation6 + $0x40] sm:$0xff] %vm742_vm3, %v2450_v34 }
 0xd5a   :  { %2468 = vst.msk [vmem:[#allocation6 + $0x48] sm:$0xff] %vm742_vm3, %v2451_v42  ;;  %v2483_v12 = vpack.c.bf16 %v2451_v42, %v2450_v34 }
 0xd5c   :  { %3843 = vmatmul.mubr.msk.bf16.vlgmr.msra.gmra.mrb[60].mxu0 %vm742_vm3, %v2483_v12 }
 0xd5d   :  { %3853 = vmatpush3.bf16.msra.mxu0 %v2586_v28  ;;  %3854 = vmatprep.mubr.msk.bf16.mxu0 %vm4307_vm1, %v4303_v21 }
 0xd5e   :  { %3864 = vmatprep.subr.bf16.mxu0 %v4303_v21 }
 0xd94   :  { %v2394_v61 = vpop.xlane.xlu1 %2393 }
 0xd95   :  { %4188 = vrcp.f32 %v2394_v61 }
 0xd98   :  { %v2397_v30 = vpop.xlane.xlu0 %2396  ;;  %v2400_v44 = vpop.xlane.xlu1 %2399 }
 0xd99   :  { %4190 = vrcp.f32 %v2397_v30 }
 0xd9a   :  { %4192 = vrcp.f32 %v2400_v44 }
 0xd9c   :  { %v2406_v19 = vpop.xlane.xlu1 %2405 }
 0xd9d   :  { %v2403_v59 = vpop.xlane.xlu0 %2402  ;;  %4194 = vrcp.f32 %v2406_v19 }
 0xd9e   :  { %4196 = vrcp.f32 %v2403_v59 }
 0xd9f   :  { %v4189_v24 = vpop.eup %4188 }
 0xda0   :  { %v2452_v6 = vmul.f32 %v4189_v24, %v5069_v47  ;;  %v2412_v48 = vpop.xlane.xlu1 %2411 }
 0xda1   :  { %v2409_v52 = vpop.xlane.xlu0 %2408  ;;  %4198 = vrcp.f32 %v2412_v48 }
 0xda2   :  { %2469 = vst.msk [vmem:[#allocation6 + $0x50] sm:$0xff] %vm742_vm3, %v2452_v6  ;;  %4200 = vrcp.f32 %v2409_v52 }
 0xda3   :  { %v4191_v54 = vpop.eup %4190 }
 0xda4   :  { %v4193_v50 = vpop.eup %4192  ;;  %v2453_v58 = vmul.f32 %v4191_v54, %v5077_v3  ;;  %v2418_v27 = vpop.xlane.xlu1 %2417 }
 0xda5   :  { %v2454_v60 = vmul.f32 %v4193_v50, %v5075_v31  ;;  %v2415_v35 = vpop.xlane.xlu0 %2414  ;;  %4202 = vrcp.f32 %v2418_v27 }
 0xda6   :  { %2470 = vst.msk [vmem:[#allocation6 + $0x58] sm:$0xff] %vm742_vm3, %v2453_v58  ;;  %v2484_v10 = vpack.c.bf16 %v2453_v58, %v2452_v6  ;;  %4204 = vrcp.f32 %v2415_v35  ;;  %v4080_v35 = vld [vmem:[%s5309_s2 + $0x10] sm:$0xff]  }
 0xda7   :  { %2471 = vst.msk [vmem:[#allocation6 + $0x60] sm:$0xff] %vm742_vm3, %v2454_v60  ;;  %v4195_v47 = vpop.eup %4194 }
 0xda8   :  { %3849 = vmatmul.mubr.msk.bf16.vlgmr.msra.gmra.mrb[64].mxu1 %vm742_vm3, %v2484_v10  ;;  %v4197_v62 = vpop.eup %4196  ;;  %v2456_v26 = vmul.f32 %v4195_v47, %v5085_v51  ;;  %v2424_v55 = vpop.xlane.xlu1 %2423 }
 0xda9   :  { %3859 = vmatpush3.bf16.msra.mxu1 %v2633_v46  ;;  %v2421_v3 = vpop.xlane.xlu0 %2420  ;;  %3860 = vmatprep.mubr.msk.bf16.mxu1 %vm4307_vm1, %v4303_v21  ;;  %v2455_v31 = vmul.f32 %v4197_v62, %v5087_v43  ;;  %4206 = vrcp.f32 %v2424_v55  ;;  %v4081_v55 = vld [vmem:[%s5309_s2 + $0x18] sm:$0xff]  }
 0xdaa   :  { %3870 = vmatprep.subr.bf16.mxu1 %v4303_v21  ;;  %2473 = vst.msk [vmem:[#allocation6 + $0x70] sm:$0xff] %vm742_vm3, %v2456_v26  ;;  %4208 = vrcp.f32 %v2421_v3 }
 0xdab   :  { %v4199_v49 = vpop.eup %4198  ;;  %2472 = vst.msk [vmem:[#allocation6 + $0x68] sm:$0xff] %vm742_vm3, %v2455_v31  ;;  %v2485_v32 = vpack.c.bf16 %v2455_v31, %v2454_v60 }
 0xdac   :  { %v4201_v29 = vpop.eup %4200  ;;  %v2458_v51 = vmul.f32 %v4199_v49, %v5095_v0  ;;  %v2430_v18 = vpop.xlane.xlu1 %2429 }
 0xdad   :  { %v2427_v53 = vpop.xlane.xlu0 %2426  ;;  %v2457_v2 = vmul.f32 %v4201_v29, %v5097_v38  ;;  %4210 = vrcp.f32 %v2430_v18  ;;  %3855 = vmatmul.mubr.msk.bf16.vlgmr.msra.gmra.mrb[64].mxu0 %vm742_vm3, %v2485_v32 }
 0xdae   :  { %2475 = vst.msk [vmem:[#allocation6 + $0xc0] sm:$0xff] %vm742_vm3, %v2458_v51  ;;  %3865 = vmatpush3.bf16.msra.mxu0 %v5139_v17  ;;  %4212 = vrcp.f32 %v2427_v53  ;;  %3866 = vmatprep.mubr.msk.bf16.mxu0 %vm4307_vm1, %v4303_v21 }
 0xdaf   :  { %v4203_v43 = vpop.eup %4202  ;;  %2474 = vst.msk [vmem:[#allocation6 + $0x78] sm:$0xff] %vm742_vm3, %v2457_v2  ;;  %v2486_v7 = vpack.c.bf16 %v2457_v2, %v2456_v26  ;;  %3876 = vmatprep.subr.bf16.mxu0 %v4303_v21 }
 0xdb0   :  { %v4205_v0 = vpop.eup %4204  ;;  %v2460_v38 = vmul.f32 %v4203_v43, %v5104_v45  ;;  %v2821_v39 = vpop.permute.xlu1 %2820 }
 0xdb1   :  { %v2433_v1 = vpop.xlane.xlu0 %2432  ;;  %v2459_v14 = vmul.f32 %v4205_v0, %v5106_v63  ;;  %3861 = vmatmul.mubr.msk.bf16.vlgmr.msra.gmra.mrb[68].mxu1 %vm742_vm3, %v2486_v7 }
 0xdb2   :  { %4214 = vrcp.f32 %v2433_v1  ;;  %2477 = vst.msk [vmem:[#allocation6 + $0xd0] sm:$0xff] %vm742_vm3, %v2460_v38  ;;  %3871 = vmatpush3.bf16.msra.mxu1 %v5137_v15  ;;  %3872 = vmatprep.mubr.msk.bf16.mxu1 %vm4307_vm1, %v4303_v21 }
 0xdb3   :  { %v4207_v56 = vpop.eup %4206  ;;  %2476 = vst.msk [vmem:[#allocation6 + $0xc8] sm:$0xff] %vm742_vm3, %v2459_v14  ;;  %v2487_v11 = vpack.c.bf16 %v2459_v14, %v2458_v51  ;;  %3882 = vmatprep.subr.bf16.mxu1 %v4303_v21 }
 0xdb4   :  { %v4209_v45 = vpop.eup %4208  ;;  %v2462_v22 = vmul.f32 %v4207_v56, %v5112_v8 }
 0xdb5   :  { %v2774_v63 = vpop.permute.xlu0 %2773  ;;  %v2461_v28 = vmul.f32 %v4209_v45, %v5115_v13  ;;  %3867 = vmatmul.mubr.msk.bf16.vlgmr.msra.gmra.mrb[68].mxu0 %vm742_vm3, %v2487_v11 }
 0xdb6   :  { %2479 = vst.msk [vmem:[#allocation6 + $0xe0] sm:$0xff] %vm742_vm3, %v2462_v22  ;;  %3877 = vmatpush3.bf16.msra.mxu0 %v2774_v63  ;;  %3878 = vmatprep.mubr.msk.bf16.mxu0 %vm4307_vm1, %v4303_v21 }
 0xdb7   :  { %v4211_v46 = vpop.eup %4210  ;;  %2478 = vst.msk [vmem:[#allocation6 + $0xd8] sm:$0xff] %vm742_vm3, %v2461_v28  ;;  %v2488_v15 = vpack.c.bf16 %v2461_v28, %v2460_v38  ;;  %3888 = vmatprep.subr.bf16.mxu0 %v4080_v35 }
 0xdb8   :  { %v4213_v17 = vpop.eup %4212  ;;  %v2464_v9 = vmul.f32 %v4211_v46, %v5121_v16 }
 0xdb9   :  { %v2463_v8 = vmul.f32 %v4213_v17, %v5123_v20  ;;  %3873 = vmatmul.mubr.msk.bf16.vlgmr.msra.gmra.mrb[72].mxu1 %vm742_vm3, %v2488_v15 }
 0xdba   :  { %2481 = vst.msk [vmem:[#allocation6 + $0xf0] sm:$0xff] %vm742_vm3, %v2464_v9  ;;  %3883 = vmatpush3.bf16.msra.mxu1 %v2821_v39  ;;  %3884 = vmatprep.mubr.msk.bf16.mxu1 %vm4307_vm1, %v4303_v21 }
 0xdbb   :  { %2480 = vst.msk [vmem:[#allocation6 + $0xe8] sm:$0xff] %vm742_vm3, %v2463_v8  ;;  %v2489_v23 = vpack.c.bf16 %v2463_v8, %v2462_v22 }
 0xdbc   :  { %v4215_v13 = vpop.eup %4214 }
 0xdbd   :  { %v2465_v4 = vmul.f32 %v4215_v13, %v5129_v36  ;;  %3879 = vmatmul.mubr.msk.bf16.vlgmr.msra.gmra.mrb[72].mxu0 %vm742_vm3, %v2489_v23 }
 0xdbe   :  { %3889 = vmatpush3.bf16.msra.mxu0 %v4080_v35 }
 0xdbf   :  { %2482 = vst.msk [vmem:[#allocation6 + $0xf8] sm:$0xff] %vm742_vm3, %v2465_v4  ;;  %v2490_v16 = vpack.c.bf16 %v2465_v4, %v2464_v9  ;;  %3890 = vmatprep.subr.bf16.mxu0 %v4081_v55 }
 0xdc1   :  { %3885 = vmatmul.mubr.msk.bf16.vlgmr.msra.gmra.mrb[76].mxu1 %vm742_vm3, %v2490_v16 }
 0xdc2   :  { %3900 = vmatprep.mubr.msk.bf16.mxu1 %vm237_vm0, %v4797_v5  ;;  %3891 = vmatpush3.bf16.msra.mxu0 %v4081_v55 }
 0xe2f   :  { %v2531_v20 = vpop.f32.mrb[60].mxu0 }
 0xe30   :  { %v3844_v34 = vpop.f32.mrb[61].mxu0 }
 0xe31   :  { %v2534_v42 = vpop.f32.mrb[62].mxu0 }
 0xe32   :  { %v3845_v21 = vpop.f32.mrb[63].mxu0 }
 0xe7b   :  { %v2578_v12 = vpop.f32.mrb[64].mxu1 }
 0xe7c   :  { %v3850_v61 = vpop.f32.mrb[65].mxu1 }
 0xe7d   :  { %v2581_v30 = vpop.f32.mrb[66].mxu1 }
 0xe7e   :  { %v4038_v44 = vpack.i.bf16 %v2581_v30, %v2578_v12  ;;  %v3851_v19 = vpop.f32.mrb[67].mxu1 }
 0xe80   :  { %4039 = vrot.lane.b32.xlu0 %v4038_v44, %s4309_s14  ;;  %v2625_v36 = vpop.f32.mrb[64].mxu0 }
 0xe81   :  { %v3856_v59 = vpop.f32.mrb[65].mxu0 }
 0xe82   :  { %v2628_v24 = vpop.f32.mrb[66].mxu0 }
 0xe83   :  { %v4043_v6 = vpack.i.bf16 %v2628_v24, %v2625_v36  ;;  %v3857_v48 = vpop.f32.mrb[67].mxu0 }
 0xe84   :  { %v2672_v52 = vpop.f32.mrb[68].mxu1 }
 0xe85   :  { %4044 = vrot.lane.b32.xlu1 %v4043_v6, %s4310_s16  ;;  %v3862_v54 = vpop.f32.mrb[69].mxu1 }
 0xe86   :  { %v2675_v50 = vpop.f32.mrb[70].mxu1 }
 0xe87   :  { %v4048_v58 = vpack.i.bf16 %v2675_v50, %v2672_v52  ;;  %v3863_v60 = vpop.f32.mrb[71].mxu1 }
 0xe88   :  { %v2719_v27 = vpop.f32.mrb[68].mxu0 }
 0xe89   :  { %4049 = vrot.lane.b32.xlu1 %v4048_v58, %s4311_s19  ;;  %v3868_v10 = vpop.f32.mrb[69].mxu0 }
 0xe8a   :  { %v2722_v47 = vpop.f32.mrb[70].mxu0 }
 0xe8b   :  { %v3869_v62 = vpop.f32.mrb[71].mxu0 }
 0xe8c   :  { %v2766_v26 = vpop.f32.mrb[72].mxu1 }
 0xe8d   :  { %v3874_v3 = vpop.f32.mrb[73].mxu1 }
 0xe8e   :  { %v2769_v31 = vpop.f32.mrb[74].mxu1 }
 0xe8f   :  { %v4053_v49 = vpack.i.bf16 %v2769_v31, %v2766_v26  ;;  %v3875_v32 = vpop.f32.mrb[75].mxu1 }
 0xe90   :  { %v2813_v29 = vpop.f32.mrb[72].mxu0  ;;  %v4082_v32 = vld [vmem:[#allocation2 + $0x10] sm:$0xff]  }
 0xe91   :  { %4054 = vrot.lane.b32.xlu0 %v4053_v49, %s4309_s14  ;;  %v3880_v51 = vpop.f32.mrb[73].mxu0  ;;  %3904 = vmatprep.subr.bf16.mxu0 %v4082_v32 }
 0xe92   :  { %v2816_v18 = vpop.f32.mrb[74].mxu0 }
 0xe93   :  { %v4058_v53 = vpack.i.bf16 %v2816_v18, %v2813_v29  ;;  %v3881_v2 = vpop.f32.mrb[75].mxu0  ;;  %v4083_v29 = vld [vmem:[#allocation2 + $0x18] sm:$0xff]  }
 0xe94   :  { %v2860_v43 = vpop.f32.mrb[76].mxu1 }
 0xe95   :  { %v3886_v7 = vpop.f32.mrb[77].mxu1  ;;  %4059 = vrot.lane.b32.xlu0 %v4058_v53, %s4310_s16 }
 0xe96   :  { %v2863_v0 = vpop.f32.mrb[78].mxu1 }
 0xe97   :  { %v4063_v38 = vpack.i.bf16 %v2863_v0, %v2860_v43  ;;  %v3887_v1 = vpop.f32.mrb[79].mxu1 }
 0xe98   :  { %v3497_v1 = vld [vmem:[%s5312_s5 + $0x3] ss:$0 sm:$0xff] }
 0xe99   :  { %4064 = vrot.lane.b32.xlu1 %v4063_v38, %s4311_s19  ;;  %2952 = vrot.lane.b32.xlu0 %v4888_v57, %s4312_s22 }
 0xe9d   :  { %3188 = vrot.lane.b32.xlu1 %v3497_v1, %s4301_s15 }
 0xef2   :  { %v4040_v14 = vpop.permute.xlu0 %4039 }
 0xef3   :  { %v4042_v11 = vunpack.i.h.bf16 %v4040_v14  ;;  %v4041_v45 = vunpack.i.l.bf16 %v4040_v14  ;;  %v4086_v14 = vld [vmem:[%s5311_s4 + $0x30] sm:$0xff]  }
 0xef5   :  { %v2892_v46 = vsel %vm344_vm2, %v2534_v42, %v4042_v11  ;;  %v2891_v15 = vsel %vm344_vm2, %v2531_v20, %v4041_v45 }
 0xef7   :  { %v4045_v56 = vpop.permute.xlu1 %4044 }
 0xef8   :  { %v4047_v22 = vunpack.i.h.bf16 %v4045_v56  ;;  %v4046_v63 = vunpack.i.l.bf16 %v4045_v56  ;;  %v4087_v56 = vld [vmem:[%s5311_s4 + $0x38] sm:$0xff]  }
 0xefa   :  { %v2893_v8 = vsel %vm742_vm3, %v2891_v15, %v4046_v63  ;;  %v2894_v39 = vsel %vm742_vm3, %v2892_v46, %v4047_v22 }
 0xefb   :  { %v4050_v28 = vpop.permute.xlu1 %4049 }
 0xefc   :  { %v4052_v17 = vunpack.i.h.bf16 %v4050_v28  ;;  %v4051_v9 = vunpack.i.l.bf16 %v4050_v28 }
 0xefe   :  { %v2895_v13 = vsel %vm1347_vm4, %v2893_v8, %v4051_v9  ;;  %v2896_v57 = vsel %vm1347_vm4, %v2894_v39, %v4052_v17 }
 0xeff   :  { %v2927_v23 = vpack.c.bf16 %v2896_v57, %v2895_v13 }
 0xf01   :  { %3892 = vmatprep.mubr.msk.bf16.mxu0 %vm237_vm0, %v2927_v23 }
 0xf03   :  { %v4055_v4 = vpop.permute.xlu0 %4054 }
 0xf04   :  { %v4057_v34 = vunpack.i.h.bf16 %v4055_v4  ;;  %v4056_v21 = vunpack.i.l.bf16 %v4055_v4 }
 0xf06   :  { %v2922_v61 = vsel %vm344_vm2, %v2722_v47, %v4057_v34  ;;  %v2921_v30 = vsel %vm344_vm2, %v2719_v27, %v4056_v21 }
 0xf07   :  { %v4060_v16 = vpop.permute.xlu0 %4059 }
 0xf08   :  { %v4062_v42 = vunpack.i.h.bf16 %v4060_v16  ;;  %v4061_v12 = vunpack.i.l.bf16 %v4060_v16 }
 0xf0a   :  { %v2923_v36 = vsel %vm742_vm3, %v2921_v30, %v4061_v12  ;;  %v2924_v59 = vsel %vm742_vm3, %v2922_v61, %v4062_v42 }
 0xf0b   :  { %v4065_v20 = vpop.permute.xlu1 %4064  ;;  %v2953_v52 = vpop.permute.xlu0 %2952 }
 0xf0c   :  { %v4067_v44 = vunpack.i.h.bf16 %v4065_v20  ;;  %v4066_v19 = vunpack.i.l.bf16 %v4065_v20 }
 0xf0e   :  { %v2925_v24 = vsel %vm1347_vm4, %v2923_v36, %v4066_v19  ;;  %v2926_v6 = vsel %vm1347_vm4, %v2924_v59, %v4067_v44 }
 0xf0f   :  { %v2928_v48 = vpack.c.bf16 %v2926_v6, %v2925_v24  ;;  %v3189_v23 = vpop.permute.xlu1 %3188 }
 0xf11   :  { %3893 = vmatmul.mubr.msk.bf16.vlgmr.msra.gmra.mrb[76].mxu0 %vm237_vm0, %v2928_v48 }
 0xf12   :  { %3905 = vmatpush3.bf16.msra.mxu0 %v4082_v32 }
 0xf13   :  { %3906 = vmatprep.subr.bf16.mxu0 %v4083_v29 }
 0xf16   :  { %3907 = vmatpush3.bf16.msra.mxu0 %v4083_v29 }
 0xfe4   :  { %v3894_v54 = vpop.f32.mrb[76].mxu0 }
 0xfe5   :  { %v2995_v50 = vpop.f32.mrb[77].mxu0  ;;  %v3004_v10 = vadd.f32 %v3894_v54, %v2953_v52 }
 0xfe6   :  { %v2996_v58 = vadd.f32 %v2995_v50, %v2953_v52  ;;  %v3895_v60 = vpop.f32.mrb[78].mxu0 }
 0xfe7   :  { %v3007_v35 = vadd.f32 %v3895_v60, %v2953_v52  ;;  %v2998_v27 = vpop.f32.mrb[79].mxu0  ;;  %v3012_v3 = vadd.f32 %v3004_v10, %v4875_v41 }
 0xfe8   :  { %v2999_v47 = vadd.f32 %v2998_v27, %v2953_v52  ;;  %v3010_v62 = vadd.f32 %v2996_v58, %v4871_v25  ;;  %v4085_v25 = vld [vmem:[%s5311_s4 + $0x28] sm:$0xff]  }
 0xfe9   :  { %v3013_v26 = vadd.f32 %v3007_v35, %v4869_v40  ;;  %v4084_v40 = vld [vmem:[%s5311_s4 + $0x20] sm:$0xff]   ;;  %s4313_s4 = smov [#allocation6]  }
 0xfea   :  { %v3011_v55 = vadd.f32 %v2999_v47, %v4873_v33  ;;  %s3397_s5 = sshll.u32 %s4313_s4, 4  ;;  %s3398_s5 = int_to_ptr.vmem [resolvable:$true] %s3397_s5 }
 0xfeb   :  { %v3015_v49 = vpack.c.bf16 %v3013_v26, %v3012_v3  ;;  %s4250_s15 = scalar_lea.vmem %s3398_s5, 4096  ;;  %p4255_p9 = scmp.lt.s32.totalorder %s3398_s5, %s3398_s5 }
 0xfec   :  { %v3014_v31 = vpack.c.bf16 %v3011_v55, %v3010_v62  ;;  %p4251_p8 = scmp.ne.s32.totalorder %s3398_s5, %s4250_s15  ;;  %p4256_p10 = scmp.lt.s32.totalorder %s4250_s15, %s4250_s15 }
 0xfee   :  { %3896 = vmatprep.subr.bf16.mxu1 %v3014_v31  ;;  %p4257_p11 = por %p4256_p10, %p4255_p9 }
 0xfef   :  { %3897 = vmatpush3.bf16.msra.mxu1 %v3014_v31 }
 0xff0   :  { %3898 = vmatprep.subr.bf16.mxu1 %v3015_v49  ;;  %p4258_p12 = pnand %p4257_p11, %p4251_p8 }
 0xff3   :  { %3899 = vmatpush3.bf16.msra.mxu1 %v3015_v49 }
 0xff4   :  { %3912 = vmatprep.subr.bf16.mxu1 %v4084_v40 }
 0xff6   :  { %3901 = vmatmul.mubr.msk.bf16.vlgmr.msra.gmra.mrb[80].mxu1 %vm237_vm0, %v4819_v37 }
 0xff7   :  { %3913 = vmatpush3.bf16.msra.mxu1 %v4084_v40 }
 0xff8   :  { %3914 = vmatprep.subr.bf16.mxu1 %v4085_v25 }
 0xffb   :  { %3915 = vmatpush3.bf16.msra.mxu1 %v4085_v25 }
 0xffc   :  { %3916 = vmatprep.subr.bf16.mxu1 %v4086_v14 }
 0xfff   :  { %3917 = vmatpush3.bf16.msra.mxu1 %v4086_v14 }
0x1000   :  { %3918 = vmatprep.subr.bf16.mxu1 %v4087_v56 }
0x1003   :  { %3919 = vmatpush3.bf16.msra.mxu1 %v4087_v56 }
0x10c9   :  { %v3902_v33 = vpop.f32.mrb[80].mxu1 }
0x10ca   :  { %v3050_v41 = vpop.f32.mrb[81].mxu1  ;;  %v3067_v7 = vsub.f32 %v3012_v3, %v3902_v33 }
0x10cb   :  { %v3903_v51 = vpop.f32.mrb[82].mxu1  ;;  %v3065_v2 = vsub.f32 %v3010_v62, %v3050_v41 }
0x10cc   :  { %v3068_v18 = vsub.f32 %v3013_v26, %v3903_v51  ;;  %v3053_v53 = vpop.f32.mrb[83].mxu1 }
0x10cd   :  { %v3066_v43 = vsub.f32 %v3011_v55, %v3053_v53 }
0x10ce   :  { %v3070_v38 = vpack.c.bf16 %v3068_v18, %v3067_v7 }
0x10cf   :  { %v3069_v0 = vpack.c.bf16 %v3066_v43, %v3065_v2 }
0x10d1   :  { %3908 = vmatprep.mubr.msk.bf16.mxu0 %vm237_vm0, %v3069_v0 }
0x10d2   :  { %3909 = vmatmul.mubr.msk.bf16.vlgmr.msra.gmra.mrb[80].mxu0 %vm237_vm0, %v3070_v38 }
0x10d3   :  { %3928 = vmatprep.mubr.msk.bf16.mxu0 %vm237_vm0, %v4797_v5 }
0x11a5   :  { %v3910_v11 = vpop.f32.mrb[80].mxu0 }
0x11a6   :  { %v3142_v5 = vadd.f32 %v3910_v11, %v3497_v1  ;;  %v3133_v45 = vpop.f32.mrb[81].mxu0 }
0x11a7   :  { %v3134_v22 = vadd.f32 %v3497_v1, %v3133_v45  ;;  %v3911_v63 = vpop.f32.mrb[82].mxu0 }
0x11a8   :  { %v3145_v28 = vadd.f32 %v3911_v63, %v3497_v1  ;;  %v3136_v46 = vpop.f32.mrb[83].mxu0  ;;  %v3150_v17 = vmax.f32 %v3142_v5, 0.0 }
0x11a9   :  { %v3137_v15 = vadd.f32 %v3497_v1, %v3136_v46  ;;  %v3148_v8 = vmax.f32 %v3134_v22, 0.0 }
0x11aa   :  { %v3151_v9 = vmax.f32 %v3145_v28, 0.0 }
0x11ab   :  { %v3149_v39 = vmax.f32 %v3137_v15, 0.0 }
0x11ac   :  { %v3153_v13 = vpack.c.bf16 %v3151_v9, %v3150_v17 }
0x11ad   :  { %v3152_v57 = vpack.c.bf16 %v3149_v39, %v3148_v8 }
0x11af   :  { %3920 = vmatprep.mubr.msk.bf16.mxu1 %vm1647_vm9, %v3152_v57 }
0x11b0   :  { %3921 = vmatmul.mubr.msk.bf16.vlgmr.msra.gmra.mrb[84].mxu1 %vm1647_vm9, %v3153_v13 }
0x1283   :  { %v3922_v4 = vpop.f32.mrb[84].mxu1 }
0x1284   :  { %v3231_v16 = vpop.f32.mrb[85].mxu1  ;;  %v3240_v20 = vadd.f32 %v3922_v4, %v3189_v23 }
0x1285   :  { %v3232_v34 = vadd.f32 %v3231_v16, %v3189_v23  ;;  %v3923_v21 = vpop.f32.mrb[86].mxu1 }
0x1286   :  { %v3243_v42 = vadd.f32 %v3923_v21, %v3189_v23  ;;  %v3234_v12 = vpop.f32.mrb[87].mxu1  ;;  %v3248_v36 = vadd.f32 %v3240_v20, %v3067_v7 }
0x1287   :  { %v3235_v61 = vadd.f32 %v3234_v12, %v3189_v23  ;;  %v3246_v30 = vadd.f32 %v3232_v34, %v3065_v2 }
0x1288   :  { %v3249_v44 = vadd.f32 %v3243_v42, %v3068_v18 }
0x1289   :  { %v3247_v19 = vadd.f32 %v3235_v61, %v3066_v43 }
0x128a   :  { %v3251_v24 = vpack.c.bf16 %v3249_v44, %v3248_v36 }
0x128b   :  { %v3250_v59 = vpack.c.bf16 %v3247_v19, %v3246_v30 }
0x128d   :  { %3924 = vmatprep.subr.bf16.mxu0 %v3250_v59 }
0x128e   :  { %3925 = vmatpush3.bf16.msra.mxu0 %v3250_v59 }
0x128f   :  { %3926 = vmatprep.subr.bf16.mxu0 %v3251_v24 }
0x1292   :  { %3927 = vmatpush3.bf16.msra.mxu0 %v3251_v24 }
0x1295   :  { %3929 = vmatmul.mubr.msk.bf16.vlgmr.msra.gmra.mrb[84].mxu0 %vm237_vm0, %v4819_v37 }
0x1368   :  { %v3930_v6 = vpop.f32.mrb[84].mxu0 }
0x1369   :  { %v3286_v48 = vpop.f32.mrb[85].mxu0  ;;  %v3303_v58 = vsub.f32 %v3248_v36, %v3930_v6 }
0x136a   :  { %v3301_v52 = vsub.f32 %v3246_v30, %v3286_v48  ;;  %v3931_v54 = vpop.f32.mrb[86].mxu0 }
0x136b   :  { %v3289_v50 = vpop.f32.mrb[87].mxu0  ;;  %v3304_v10 = vsub.f32 %v3249_v44, %v3931_v54  ;;  %v3311_v47 = vsel %vm237_vm0, %v3303_v58, 0.0 }
0x136c   :  { %v3302_v60 = vsub.f32 %v3247_v19, %v3289_v50  ;;  %v3305_v35 = vsel %vm237_vm0, %v3301_v52, 0.0 }
0x136d   :  { %3306 = vadd.xlane.f32.xlu0 %v3305_v35  ;;  %v3314_v62 = vsel %vm237_vm0, %v3304_v10, 0.0 }
0x136e   :  { %v3308_v27 = vsel %vm237_vm0, %v3302_v60, 0.0 }
0x136f   :  { %3309 = vadd.xlane.f32.xlu1 %v3308_v27 }
0x1371   :  { %3312 = vadd.xlane.f32.xlu0 %v3311_v47 }
0x1375   :  { %3315 = vadd.xlane.f32.xlu0 %v3314_v62 }
0x13fa   :  { %v3307_v37 = vpop.xlane.xlu0 %3306 }
0x13fb   :  { %v3318_v26 = vmul.f32 0.03125, %v3307_v37 }
0x13fc   :  { %v3310_v55 = vpop.xlane.xlu1 %3309 }
0x13fd   :  { %v3322_v3 = vsub.f32 %v3301_v52, %v3318_v26  ;;  %v3319_v31 = vmul.f32 0.03125, %v3310_v55 }
0x13fe   :  { %v3313_v49 = vpop.xlane.xlu0 %3312 }
0x13ff   :  { %v3323_v32 = vsub.f32 %v3302_v60, %v3319_v31  ;;  %v3320_v29 = vmul.f32 0.03125, %v3313_v49  ;;  %v3326_v40 = vmul.f32 %v3322_v3, %v3322_v3 }
0x1401   :  { %v3324_v25 = vsub.f32 %v3303_v58, %v3320_v29  ;;  %v3330_v33 = vsel %vm237_vm0, %v3326_v40, 0.0  ;;  %v3327_v41 = vmul.f32 %v3323_v32, %v3323_v32 }
0x1402   :  { %v3316_v51 = vpop.xlane.xlu0 %3315  ;;  %3331 = vadd.xlane.f32.xlu1 %v3330_v33 }
0x1403   :  { %v3321_v18 = vmul.f32 0.03125, %v3316_v51  ;;  %v3333_v53 = vsel %vm237_vm0, %v3327_v41, 0.0  ;;  %v3328_v2 = vmul.f32 %v3324_v25, %v3324_v25 }
0x1404   :  { %3334 = vadd.xlane.f32.xlu0 %v3333_v53 }
0x1405   :  { %v3325_v43 = vsub.f32 %v3304_v10, %v3321_v18  ;;  %v3336_v7 = vsel %vm237_vm0, %v3328_v2, 0.0 }
0x1406   :  { %3337 = vadd.xlane.f32.xlu1 %v3336_v7 }
0x1407   :  { %v3329_v0 = vmul.f32 %v3325_v43, %v3325_v43 }
0x1409   :  { %v3339_v38 = vsel %vm237_vm0, %v3329_v0, 0.0 }
0x140a   :  { %3340 = vadd.xlane.f32.xlu0 %v3339_v38 }
0x140b   :  { %4261 = shalt.err (!%p4258_p12)
}
0x140c   :  { %s4262_s24 = scalar_lea.hbm %s5315_s8, 4096 }
0x140d   :  { %p4263_p13 = scmp.ne.s32.totalorder %s5315_s8, %s4262_s24  ;;  %p4266_p0 = scmp.lt.u32.totalorder %s4262_s24, %s5315_s8 }
0x140f   :  { %p4268_p1 = pnand %p4266_p0, %p4263_p13 }
0x1411   :  { %4271 = shalt.err (!%p4268_p1)
}
0x1412   :  { %s4314_s28 = smov 128   ;;  %v3518_v8 = vld [vmem:[%s5313_s6] ss:$0 sm:$0xff]  ;;  %v3519_v57 = vld [vmem:[%s5313_s6 + $0x1] ss:$0 sm:$0xff]  ;;  %s4315_s13 = smov [#allocation5]  }
0x1413   :  { %3403 = dma.vmem_to_hbm [thread:$0]  %s3398_s5, 4096, %s5315_s8, [#allocation7], %s4314_s28, %s4314_s28, %s4309_s14  }
0x1414   :  { %s3385_s2 = sshll.u32 %s4315_s13, 4  ;;  %s3386_s2 = int_to_ptr.vmem [resolvable:$true] %s3385_s2 }
0x1415   :  { %s4272_s6 = scalar_lea.vmem %s3386_s2, 512  ;;  %p4277_p3 = scmp.lt.s32.totalorder %s3386_s2, %s3386_s2 }
0x1416   :  { %p4273_p2 = scmp.ne.s32.totalorder %s3386_s2, %s4272_s6  ;;  %p4278_p4 = scmp.lt.s32.totalorder %s4272_s6, %s4272_s6 }
0x1418   :  { %p4279_p5 = por %p4278_p4, %p4277_p3 }
0x141a   :  { %p4280_p6 = pnand %p4279_p5, %p4273_p2 }
0x148f   :  { %v3332_v1 = vpop.xlane.xlu1 %3331 }
0x1490   :  { %v3342_v14 = vmul.f32 0.03125, %v3332_v1 }
0x1491   :  { %v3335_v56 = vpop.xlane.xlu0 %3334 }
0x1492   :  { %v3346_v11 = vadd.f32 1e-05, %v3342_v14  ;;  %v3343_v5 = vmul.f32 0.03125, %v3335_v56 }
0x1493   :  { %v3338_v45 = vpop.xlane.xlu1 %3337 }
0x1494   :  { %4216 = vrsqrt.f32 %v3346_v11  ;;  %v3347_v22 = vadd.f32 1e-05, %v3343_v5  ;;  %v3344_v63 = vmul.f32 0.03125, %v3338_v45 }
0x1496   :  { %4218 = vrsqrt.f32 %v3347_v22  ;;  %v3348_v28 = vadd.f32 1e-05, %v3344_v63 }
0x1497   :  { %v3341_v46 = vpop.xlane.xlu0 %3340 }
0x1498   :  { %4220 = vrsqrt.f32 %v3348_v28  ;;  %v3345_v15 = vmul.f32 0.03125, %v3341_v46 }
0x149a   :  { %v3349_v17 = vadd.f32 1e-05, %v3345_v15 }
0x149c   :  { %4222 = vrsqrt.f32 %v3349_v17 }
0x149e   :  { %v4217_v9 = vpop.eup %4216 }
0x149f   :  { %v3354_v39 = vmul.f32 %v4217_v9, %v3322_v3 }
0x14a0   :  { %v4219_v13 = vpop.eup %4218 }
0x14a1   :  { %v3363_v23 = vmul.f32 %v3518_v8, %v3354_v39  ;;  %v3355_v4 = vmul.f32 %v4219_v13, %v3323_v32 }
0x14a2   :  { %v4221_v16 = vpop.eup %4220 }
0x14a3   :  { %v3372_v34 = vadd.f32 %v3519_v57, %v3363_v23  ;;  %v3364_v21 = vmul.f32 %v3518_v8, %v3355_v4  ;;  %v3356_v42 = vmul.f32 %v4221_v16, %v3324_v25 }
0x14a5   :  { %3376 = vst.msk [vmem:[#allocation5] sm:$0xff] %vm237_vm0, %v3372_v34  ;;  %v3373_v12 = vadd.f32 %v3519_v57, %v3364_v21  ;;  %v3365_v20 = vmul.f32 %v3518_v8, %v3356_v42 }
0x14a6   :  { %v4223_v61 = vpop.eup %4222 }
0x14a7   :  { %3377 = vst.msk [vmem:[#allocation5 + $0x8] sm:$0xff] %vm237_vm0, %v3373_v12  ;;  %v3374_v30 = vadd.f32 %v3519_v57, %v3365_v20  ;;  %v3357_v44 = vmul.f32 %v4223_v61, %v3325_v43 }
0x14a9   :  { %3378 = vst.msk [vmem:[#allocation5 + $0x10] sm:$0xff] %vm237_vm0, %v3374_v30  ;;  %v3366_v19 = vmul.f32 %v3518_v8, %v3357_v44 }
0x14ab   :  { %v3375_v36 = vadd.f32 %v3519_v57, %v3366_v19 }
0x14ad   :  { %3379 = vst.msk [vmem:[#allocation5 + $0x18] sm:$0xff] %vm237_vm0, %v3375_v36 }
0x14ae   :  { %4283 = shalt.err (!%p4280_p6)
}
0x14af   :  { %s4284_s22 = scalar_lea.hbm %s5314_s7, 512 }
0x14b0   :  { %p4285_p7 = scmp.ne.s32.totalorder %s5314_s7, %s4284_s22  ;;  %p4288_p8 = scmp.lt.u32.totalorder %s4284_s22, %s5314_s7 }
0x14b2   :  { %p4290_p9 = pnand %p4288_p8, %p4285_p7 }
0x14b4   :  { %4293 = shalt.err (!%p4290_p9)
}
0x14b5   :  { %3391 = dma.vmem_to_hbm [thread:$0]  %s3386_s2, 512, %s5314_s7, [#allocation4], %s4314_s28, %s4314_s28, %s4309_s14  }
0x14b6   :  { %4296 = dma.done.wait [#allocation4], 512  }
0x14b7   :  { %4297 = vsyncadd [#allocation4], 4294966784 }
0x14b8   :  { %4298 = dma.done.wait [#allocation7], 4096  }
0x14b9   :  { %4299 = vsyncadd [#allocation7], 4294963200 }
0x14ba   :  { %3410 = vsyncpa [#allocation3], 1 }
0x14bb   :  { %3411 = vsyncpa [#allocation4], 1 }
0x14bc   :  { %3412 = vsyncpa [#allocation7], 1 }

</bundles_post_ra>
